<compile_context>
chip_gen: v7x
topology: tpu7x:2x2x1
jax: 0.10.0
libtpu: 0.0.40
codegen_flags: <defaults>
</compile_context>

<pallas_src>
import jax
import jax.numpy as jnp
from jax.experimental import pallas as pl
from jax.experimental.pallas import tpu as pltpu


# ----------------------------- fused kernel -------------------------------- #

def _numnet_kernel(patches_ref, w1_ref, b1_ref, w2_ref, b2_ref,
                   wfc1_ref, bfc1_ref, wcls_ref, bcls_ref,
                   out_ref, pool1_s):
    """Whole NUMNet forward for one image (one grid step).

    patches_ref: (1, 768, 25) bf16  conv1 im2col, rows = 4 pool-parity groups
                                    x zero-padded (12 x 16) pooled grid
    w1_ref:      (25, 128)      bf16   conv1 weight  (taps, padded cout)
    b1_ref:      (1, 128)       f32
    w2_ref:      (25, 128, 128) bf16   conv2 weight  (tap, padded cin, cout)
    b2_ref:      (1, 128)       f32
    wfc1_ref:    (16, 128, 512) bf16   fc1 weight    (pooled pixel, cin, cout)
    bfc1_ref:    (1, 512)       f32
    wcls_ref:    (512, 128)     bf16
    bcls_ref:    (1, 128)       f32
    out_ref:     (1, 8, 128)    f32    logits, lane-dense, broadcast on rows
    pool1_s:     (12, 16, 128)  f32    VMEM scratch with pool1 output
    """
    f32 = jnp.float32
    bf16 = jnp.bfloat16

    # ---- conv1 (4 parity-group matmuls) fused with MaxPool2d(2) + ReLU ----
    w1 = w1_ref[...]
    m = None
    for g in range(4):
        taps = patches_ref[0, g * 192:(g + 1) * 192, :]           # (192, 25)
        d = jnp.dot(taps, w1, preferred_element_type=f32)         # (192, 128)
        m = d if m is None else jnp.maximum(m, d)
    p1 = jnp.maximum(m + b1_ref[...], 0.0)                        # (192, 128)
    pool1_s[...] = p1.reshape(12, 16, 128)

    # ---- conv2: in-VMEM im2col, 25 per-tap matmuls, f32 accumulation ----
    acc2 = jnp.zeros((64, 128), f32)
    for i in range(5):
        for j in range(5):
            patch = pool1_s[i:i + 8, j:j + 8, :]                  # (8, 8, 128)
            patch = patch.reshape(64, 128).astype(bf16)
            acc2 = acc2 + jnp.dot(patch, w2_ref[i * 5 + j],
                                  preferred_element_type=f32)     # (64, 128)
    acc2 = acc2 + b2_ref[...]

    # ---- MaxPool2d(2) + ReLU fused with fc1 (per pooled-pixel matmuls) ----
    z = acc2.reshape(8, 8, 128)                                   # (h, w, c)
    h = jnp.zeros((1, 512), f32)
    for ph in range(4):
        vmax = jnp.maximum(z[2 * ph], z[2 * ph + 1])              # (8, 128)
        for pw in range(4):
            row = jnp.maximum(vmax[2 * pw:2 * pw + 1, :],
                              vmax[2 * pw + 1:2 * pw + 2, :])     # (1, 128)
            row = jnp.maximum(row, 0.0)
            h = h + jnp.dot(row.astype(bf16), wfc1_ref[ph * 4 + pw],
                            preferred_element_type=f32)           # (1, 512)
    h = jnp.maximum(h + bfc1_ref[...], 0.0)

    # ---- classifier ----
    logits = jnp.dot(h.astype(bf16), wcls_ref[...],
                     preferred_element_type=f32) + bcls_ref[...]  # (1, 128)
    out_ref[0] = jnp.broadcast_to(logits, (8, 128))


def _numnet_pallas_call(batch):
    return pl.pallas_call(
        _numnet_kernel,
        out_shape=jax.ShapeDtypeStruct((batch, 8, 128), jnp.float32),
        grid=(batch,),
        in_specs=[
            pl.BlockSpec((1, 768, 25), lambda b: (b, 0, 0)),   # conv1 patches
            pl.BlockSpec((25, 128), lambda b: (0, 0)),         # w1
            pl.BlockSpec((1, 128), lambda b: (0, 0)),          # b1
            pl.BlockSpec((25, 128, 128), lambda b: (0, 0, 0)),  # w2
            pl.BlockSpec((1, 128), lambda b: (0, 0)),          # b2
            pl.BlockSpec((16, 128, 512), lambda b: (0, 0, 0)),  # wfc1
            pl.BlockSpec((1, 512), lambda b: (0, 0)),          # bfc1
            pl.BlockSpec((512, 128), lambda b: (0, 0)),        # wcls
            pl.BlockSpec((1, 128), lambda b: (0, 0)),          # bcls
        ],
        out_specs=pl.BlockSpec((1, 8, 128), lambda b: (b, 0, 0)),
        scratch_shapes=[pltpu.VMEM((12, 16, 128), jnp.float32)],
        compiler_params=pltpu.CompilerParams(
            dimension_semantics=("parallel",),
            vmem_limit_bytes=32 * 1024 * 1024),
    )


# ------------------------------ param packing ------------------------------ #

def init_params(key):
    """Deterministic, PyTorch-default-style uniform(-1/sqrt(fan_in), ...)."""
    def uniform(k, shape, fan_in):
        bound = 1.0 / (fan_in ** 0.5)
        return jax.random.uniform(k, shape, jnp.float32, -bound, bound)

    ks = jax.random.split(key, 8)
    return {
        "conv1_w": uniform(ks[0], (20, 1, 5, 5), 25),
        "conv1_b": uniform(ks[1], (20,), 25),
        "conv2_w": uniform(ks[2], (50, 20, 5, 5), 500),
        "conv2_b": uniform(ks[3], (50,), 500),
        "fc1_w":   uniform(ks[4], (500, 800), 800),
        "fc1_b":   uniform(ks[5], (500,), 800),
        "cls_w":   uniform(ks[6], (10, 500), 500),
        "cls_b":   uniform(ks[7], (10,), 500),
    }


def pack_params(p):
    """One-time (hoisted) repack: reshape / transpose / flatten-permutation,
    zero-pad to lane-dense widths, cast matmul operands to bf16."""
    bf16, f32 = jnp.bfloat16, jnp.float32
    # conv1: (20,1,5,5) -> (25 taps, 128 padded cout)
    w1 = jnp.pad(p["conv1_w"].reshape(20, 25).T, ((0, 0), (0, 108)))
    b1 = jnp.pad(p["conv1_b"], (0, 108)).reshape(1, 128)
    # conv2: (50,20,5,5) -> (25 taps, 128 padded cin, 128 padded cout)
    w2 = jnp.transpose(p["conv2_w"], (2, 3, 1, 0)).reshape(25, 20, 50)
    w2 = jnp.pad(w2, ((0, 0), (0, 108), (0, 78)))
    b2 = jnp.pad(p["conv2_b"], (0, 78)).reshape(1, 128)
    # fc1: (500, 800=50*4*4), PyTorch NCHW flatten index c*16 + ph*4 + pw
    #      -> (16 pooled pixels, 128 padded cin, 512 padded cout)
    wfc1 = jnp.transpose(p["fc1_w"].reshape(500, 50, 4, 4), (2, 3, 1, 0))
    wfc1 = jnp.pad(wfc1.reshape(16, 50, 500), ((0, 0), (0, 78), (0, 12)))
    bfc1 = jnp.pad(p["fc1_b"], (0, 12)).reshape(1, 512)
    # classifier: (10, 500) -> (512, 128)
    wcls = jnp.pad(p["cls_w"].T, ((0, 12), (0, 118)))
    bcls = jnp.pad(p["cls_b"], (0, 118)).reshape(1, 128)
    return {
        "w1": w1.astype(bf16), "b1": b1.astype(f32),
        "w2": w2.astype(bf16), "b2": b2.astype(f32),
        "wfc1": wfc1.astype(bf16), "bfc1": bfc1.astype(f32),
        "wcls": wcls.astype(bf16), "bcls": bcls.astype(f32),
    }


def _conv1_patches(x):
    """conv1 im2col (single input channel; ~38 KB/image as bf16, done at XLA
    level).  Rows are ordered as 4 pool-parity groups (dh, dw) over a
    zero-padded (12 x 16) pooled grid so MaxPool2d(2) is a max of 4 contiguous
    192-row blocks in the kernel:
      patches[b, g*192 + h*16 + w, 5*i + j] = x[b, 2h+dh+i, 2w+dw+j]
    (zero for the 4 pad columns w >= 12)."""
    B = x.shape[0]
    groups = []
    for dh in (0, 1):
        for dw in (0, 1):
            taps = [x[:, dh + i:dh + i + 24:2, dw + j:dw + j + 24:2]
                    for i in range(5) for j in range(5)]        # 25 x (B,12,12)
            g = jnp.stack(taps, axis=-1)                        # (B,12,12,25)
            g = jnp.pad(g, ((0, 0), (0, 0), (0, 4), (0, 0)))    # (B,12,16,25)
            groups.append(g.reshape(B, 192, 25))
    return jnp.concatenate(groups, axis=1).astype(jnp.bfloat16)  # (B,768,25)


# --------------------------------- forward --------------------------------- #

def numnet_forward(packed, source_nchw, target_nchw=None):
    """Eval-mode NUMNet.forward(source, target) -> (logits, loss)."""
    B = source_nchw.shape[0]
    patches = _conv1_patches(source_nchw[:, 0])                  # (B,768,25)
    out = _numnet_pallas_call(B)(
        patches, packed["w1"], packed["b1"], packed["w2"], packed["b2"],
        packed["wfc1"], packed["bfc1"], packed["wcls"], packed["bcls"])
    logits = out[:, 0, :10]
    # TODO(synk): training-mode MMD loss (mmd.mmd_rbf_accelerate) comes from an
    # external module not provided; eval path returns loss = 0 like PyTorch.
    loss = jnp.float32(0.0)
    return logits, loss


def reference_forward(p, x_nchw):
    """Pure-XLA f32 reference of the PyTorch eval-mode forward."""
    def conv(x, w, b):
        y = jax.lax.conv_general_dilated(
            x, w, (1, 1), "VALID", dimension_numbers=("NCHW", "OIHW", "NCHW"))
        return y + b[None, :, None, None]

    def pool_relu(x):
        B, C, H, W = x.shape
        x = x.reshape(B, C, H // 2, 2, W // 2, 2).max(axis=(3, 5))
        return jnp.maximum(x, 0.0)

    y = pool_relu(conv(x_nchw, p["conv1_w"], p["conv1_b"]))
    z = pool_relu(conv(y, p["conv2_w"], p["conv2_b"]))
    flat = z.reshape(x_nchw.shape[0], -1)
    h = jnp.maximum(flat @ p["fc1_w"].T + p["fc1_b"], 0.0)
    return h @ p["cls_w"].T + p["cls_b"]


if __name__ == "__main__":
    key = jax.random.PRNGKey(0)
    k_params, k_src, k_tgt = jax.random.split(key, 3)

    params = init_params(k_params)
    packed = pack_params(params)           # hoisted, done once
    # The architecture requires 28x28 inputs (50*4*4 = 800 flatten size).
    source = jax.random.normal(k_src, (2, 1, 28, 28), jnp.float32)
    target = jax.random.normal(k_tgt, (2, 1, 28, 28), jnp.float32)

    fwd = jax.jit(numnet_forward)
    logits, loss = fwd(packed, source, target)
    logits = jax.block_until_ready(logits)
    loss = jax.block_until_ready(loss)

    assert logits.shape == (2, 10), logits.shape
    assert logits.dtype == jnp.float32
    assert float(loss) == 0.0
    assert bool(jnp.all(jnp.isfinite(logits)))

    ref = reference_forward(params, source)
    err = float(jnp.max(jnp.abs(logits - ref)))
    assert err < 0.1, f"max |pallas - reference| = {err}"
    print("KERNEL_OK")
</pallas_src>

<mosaic_0001>
module attributes {stable_mosaic.version = 11 : i64} {
  func.func @_numnet_kernel(%arg0: i32, %arg1: memref<1x768x25xbf16, #tpu.memory_space<vmem>>, %arg2: memref<25x128xbf16, #tpu.memory_space<vmem>>, %arg3: memref<1x128xf32, #tpu.memory_space<vmem>>, %arg4: memref<25x128x128xbf16, #tpu.memory_space<vmem>>, %arg5: memref<1x128xf32, #tpu.memory_space<vmem>>, %arg6: memref<16x128x512xbf16, #tpu.memory_space<vmem>>, %arg7: memref<1x512xf32, #tpu.memory_space<vmem>>, %arg8: memref<512x128xbf16, #tpu.memory_space<vmem>>, %arg9: memref<1x128xf32, #tpu.memory_space<vmem>>, %arg10: memref<1x8x128xf32, #tpu.memory_space<vmem>>, %arg11: memref<12x16x128xf32, #tpu.memory_space<vmem>>) attributes {dimension_semantics = [#tpu.dimension_semantics<parallel>], iteration_bounds = array<i64: 2>, scalar_prefetch = 0 : i64, scratch_operands = 1 : i64, tpu.core_type = #tpu.core_type<tc>, window_params = [{transform_indices = @transform_0, window_bounds = array<i64: 1, 768, 25>}, {pipeline_mode = #tpu.pipeline_mode<synchronous>, transform_indices = @transform_1, window_bounds = array<i64: 25, 128>}, {pipeline_mode = #tpu.pipeline_mode<synchronous>, transform_indices = @transform_2, window_bounds = array<i64: 1, 128>}, {pipeline_mode = #tpu.pipeline_mode<synchronous>, transform_indices = @transform_3, window_bounds = array<i64: 25, 128, 128>}, {pipeline_mode = #tpu.pipeline_mode<synchronous>, transform_indices = @transform_4, window_bounds = array<i64: 1, 128>}, {pipeline_mode = #tpu.pipeline_mode<synchronous>, transform_indices = @transform_5, window_bounds = array<i64: 16, 128, 512>}, {pipeline_mode = #tpu.pipeline_mode<synchronous>, transform_indices = @transform_6, window_bounds = array<i64: 1, 512>}, {pipeline_mode = #tpu.pipeline_mode<synchronous>, transform_indices = @transform_7, window_bounds = array<i64: 512, 128>}, {pipeline_mode = #tpu.pipeline_mode<synchronous>, transform_indices = @transform_8, window_bounds = array<i64: 1, 128>}, {transform_indices = @transform_9, window_bounds = array<i64: 1, 8, 128>}]} {
    %c0 = arith.constant 0 : index
    %c0_0 = arith.constant 0 : index
    %0 = vector.load %arg2[%c0, %c0_0] : memref<25x128xbf16, #tpu.memory_space<vmem>>, vector<25x128xbf16>
    %c0_1 = arith.constant 0 : index
    %c0_2 = arith.constant 0 : index
    %c0_3 = arith.constant 0 : index
    %1 = vector.load %arg1[%c0_1, %c0_2, %c0_3] : memref<1x768x25xbf16, #tpu.memory_space<vmem>>, vector<1x192x25xbf16>
    %2 = vector.shape_cast %1 : vector<1x192x25xbf16> to vector<192x25xbf16>
    %cst = arith.constant dense<0.000000e+00> : vector<192x128xf32>
    %3 = tpu.matmul %2, %0, %cst {dimension_numbers = #tpu.dot_dimension_numbers<[1], [0], [0], [1], [0, 0, 1, 1], [], []>} : vector<192x25xbf16>, vector<25x128xbf16>, vector<192x128xf32> -> vector<192x128xf32>
    %c0_4 = arith.constant 0 : index
    %c192 = arith.constant 192 : index
    %c0_5 = arith.constant 0 : index
    %4 = vector.load %arg1[%c0_4, %c192, %c0_5] : memref<1x768x25xbf16, #tpu.memory_space<vmem>>, vector<1x192x25xbf16>
    %5 = vector.shape_cast %4 : vector<1x192x25xbf16> to vector<192x25xbf16>
    %cst_6 = arith.constant dense<0.000000e+00> : vector<192x128xf32>
    %6 = tpu.matmul %5, %0, %cst_6 {dimension_numbers = #tpu.dot_dimension_numbers<[1], [0], [0], [1], [0, 0, 1, 1], [], []>} : vector<192x25xbf16>, vector<25x128xbf16>, vector<192x128xf32> -> vector<192x128xf32>
    %7 = arith.maximumf %3, %6 : vector<192x128xf32>
    %c0_7 = arith.constant 0 : index
    %c384 = arith.constant 384 : index
    %c0_8 = arith.constant 0 : index
    %8 = vector.load %arg1[%c0_7, %c384, %c0_8] : memref<1x768x25xbf16, #tpu.memory_space<vmem>>, vector<1x192x25xbf16>
    %9 = vector.shape_cast %8 : vector<1x192x25xbf16> to vector<192x25xbf16>
    %cst_9 = arith.constant dense<0.000000e+00> : vector<192x128xf32>
    %10 = tpu.matmul %9, %0, %cst_9 {dimension_numbers = #tpu.dot_dimension_numbers<[1], [0], [0], [1], [0, 0, 1, 1], [], []>} : vector<192x25xbf16>, vector<25x128xbf16>, vector<192x128xf32> -> vector<192x128xf32>
    %11 = arith.maximumf %7, %10 : vector<192x128xf32>
    %c0_10 = arith.constant 0 : index
    %c576 = arith.constant 576 : index
    %c0_11 = arith.constant 0 : index
    %12 = vector.load %arg1[%c0_10, %c576, %c0_11] : memref<1x768x25xbf16, #tpu.memory_space<vmem>>, vector<1x192x25xbf16>
    %13 = vector.shape_cast %12 : vector<1x192x25xbf16> to vector<192x25xbf16>
    %cst_12 = arith.constant dense<0.000000e+00> : vector<192x128xf32>
    %14 = tpu.matmul %13, %0, %cst_12 {dimension_numbers = #tpu.dot_dimension_numbers<[1], [0], [0], [1], [0, 0, 1, 1], [], []>} : vector<192x25xbf16>, vector<25x128xbf16>, vector<192x128xf32> -> vector<192x128xf32>
    %15 = arith.maximumf %11, %14 : vector<192x128xf32>
    %c0_13 = arith.constant 0 : index
    %c0_14 = arith.constant 0 : index
    %16 = vector.load %arg3[%c0_13, %c0_14] : memref<1x128xf32, #tpu.memory_space<vmem>>, vector<1x128xf32>
    %17 = vector.broadcast %16 : vector<1x128xf32> to vector<192x128xf32>
    %18 = arith.addf %15, %17 : vector<192x128xf32>
    %cst_15 = arith.constant 0.000000e+00 : f32
    %19 = vector.broadcast %cst_15 : f32 to vector<192x128xf32>
    %20 = arith.maximumf %18, %19 : vector<192x128xf32>
    %21 = vector.shape_cast %20 : vector<192x128xf32> to vector<12x16x128xf32>
    %c0_16 = arith.constant 0 : index
    %c0_17 = arith.constant 0 : index
    %c0_18 = arith.constant 0 : index
    %22 = vector.load %arg11[%c0_16, %c0_17, %c0_18] : memref<12x16x128xf32, #tpu.memory_space<vmem>>, vector<12x16x128xf32>
    tpu.vector_store %arg11[%c0_16, %c0_17, %c0_18], %21 {strides = array<i32>} : memref<12x16x128xf32, #tpu.memory_space<vmem>>, vector<12x16x128xf32>,
    %cst_19 = arith.constant 0.000000e+00 : f32
    %23 = vector.broadcast %cst_19 : f32 to vector<64x128xf32>
    %c0_20 = arith.constant 0 : index
    %c0_21 = arith.constant 0 : index
    %c0_22 = arith.constant 0 : index
    %24 = vector.load %arg11[%c0_20, %c0_21, %c0_22] : memref<12x16x128xf32, #tpu.memory_space<vmem>>, vector<8x8x128xf32>
    %25 = vector.shape_cast %24 : vector<8x8x128xf32> to vector<64x128xf32>
    %26 = arith.truncf %25 : vector<64x128xf32> to vector<64x128xbf16>
    %c0_23 = arith.constant 0 : index
    %c0_24 = arith.constant 0 : index
    %c0_25 = arith.constant 0 : index
    %27 = vector.load %arg4[%c0_23, %c0_24, %c0_25] : memref<25x128x128xbf16, #tpu.memory_space<vmem>>, vector<1x128x128xbf16>
    %28 = vector.shape_cast %27 : vector<1x128x128xbf16> to vector<128x128xbf16>
    %cst_26 = arith.constant dense<0.000000e+00> : vector<64x128xf32>
    %29 = tpu.matmul %26, %28, %cst_26 {dimension_numbers = #tpu.dot_dimension_numbers<[1], [0], [0], [1], [0, 0, 1, 1], [], []>} : vector<64x128xbf16>, vector<128x128xbf16>, vector<64x128xf32> -> vector<64x128xf32>
    %30 = arith.addf %23, %29 : vector<64x128xf32>
    %c0_27 = arith.constant 0 : index
    %c1 = arith.constant 1 : index
    %c0_28 = arith.constant 0 : index
    %31 = vector.load %arg11[%c0_27, %c1, %c0_28] : memref<12x16x128xf32, #tpu.memory_space<vmem>>, vector<8x8x128xf32>
    %32 = vector.shape_cast %31 : vector<8x8x128xf32> to vector<64x128xf32>
    %33 = arith.truncf %32 : vector<64x128xf32> to vector<64x128xbf16>
    %c1_29 = arith.constant 1 : index
    %c0_30 = arith.constant 0 : index
    %c0_31 = arith.constant 0 : index
    %34 = vector.load %arg4[%c1_29, %c0_30, %c0_31] : memref<25x128x128xbf16, #tpu.memory_space<vmem>>, vector<1x128x128xbf16>
    %35 = vector.shape_cast %34 : vector<1x128x128xbf16> to vector<128x128xbf16>
    %cst_32 = arith.constant dense<0.000000e+00> : vector<64x128xf32>
    %36 = tpu.matmul %33, %35, %cst_32 {dimension_numbers = #tpu.dot_dimension_numbers<[1], [0], [0], [1], [0, 0, 1, 1], [], []>} : vector<64x128xbf16>, vector<128x128xbf16>, vector<64x128xf32> -> vector<64x128xf32>
    %37 = arith.addf %30, %36 : vector<64x128xf32>
    %c0_33 = arith.constant 0 : index
    %c2 = arith.constant 2 : index
    %c0_34 = arith.constant 0 : index
    %38 = vector.load %arg11[%c0_33, %c2, %c0_34] : memref<12x16x128xf32, #tpu.memory_space<vmem>>, vector<8x8x128xf32>
    %39 = vector.shape_cast %38 : vector<8x8x128xf32> to vector<64x128xf32>
    %40 = arith.truncf %39 : vector<64x128xf32> to vector<64x128xbf16>
    %c2_35 = arith.constant 2 : index
    %c0_36 = arith.constant 0 : index
    %c0_37 = arith.constant 0 : index
    %41 = vector.load %arg4[%c2_35, %c0_36, %c0_37] : memref<25x128x128xbf16, #tpu.memory_space<vmem>>, vector<1x128x128xbf16>
    %42 = vector.shape_cast %41 : vector<1x128x128xbf16> to vector<128x128xbf16>
    %cst_38 = arith.constant dense<0.000000e+00> : vector<64x128xf32>
    %43 = tpu.matmul %40, %42, %cst_38 {dimension_numbers = #tpu.dot_dimension_numbers<[1], [0], [0], [1], [0, 0, 1, 1], [], []>} : vector<64x128xbf16>, vector<128x128xbf16>, vector<64x128xf32> -> vector<64x128xf32>
    %44 = arith.addf %37, %43 : vector<64x128xf32>
    %c0_39 = arith.constant 0 : index
    %c3 = arith.constant 3 : index
    %c0_40 = arith.constant 0 : index
    %45 = vector.load %arg11[%c0_39, %c3, %c0_40] : memref<12x16x128xf32, #tpu.memory_space<vmem>>, vector<8x8x128xf32>
    %46 = vector.shape_cast %45 : vector<8x8x128xf32> to vector<64x128xf32>
    %47 = arith.truncf %46 : vector<64x128xf32> to vector<64x128xbf16>
    %c3_41 = arith.constant 3 : index
    %c0_42 = arith.constant 0 : index
    %c0_43 = arith.constant 0 : index
    %48 = vector.load %arg4[%c3_41, %c0_42, %c0_43] : memref<25x128x128xbf16, #tpu.memory_space<vmem>>, vector<1x128x128xbf16>
    %49 = vector.shape_cast %48 : vector<1x128x128xbf16> to vector<128x128xbf16>
    %cst_44 = arith.constant dense<0.000000e+00> : vector<64x128xf32>
    %50 = tpu.matmul %47, %49, %cst_44 {dimension_numbers = #tpu.dot_dimension_numbers<[1], [0], [0], [1], [0, 0, 1, 1], [], []>} : vector<64x128xbf16>, vector<128x128xbf16>, vector<64x128xf32> -> vector<64x128xf32>
    %51 = arith.addf %44, %50 : vector<64x128xf32>
    %c0_45 = arith.constant 0 : index
    %c4 = arith.constant 4 : index
    %c0_46 = arith.constant 0 : index
    %52 = vector.load %arg11[%c0_45, %c4, %c0_46] : memref<12x16x128xf32, #tpu.memory_space<vmem>>, vector<8x8x128xf32>
    %53 = vector.shape_cast %52 : vector<8x8x128xf32> to vector<64x128xf32>
    %54 = arith.truncf %53 : vector<64x128xf32> to vector<64x128xbf16>
    %c4_47 = arith.constant 4 : index
    %c0_48 = arith.constant 0 : index
    %c0_49 = arith.constant 0 : index
    %55 = vector.load %arg4[%c4_47, %c0_48, %c0_49] : memref<25x128x128xbf16, #tpu.memory_space<vmem>>, vector<1x128x128xbf16>
    %56 = vector.shape_cast %55 : vector<1x128x128xbf16> to vector<128x128xbf16>
    %cst_50 = arith.constant dense<0.000000e+00> : vector<64x128xf32>
    %57 = tpu.matmul %54, %56, %cst_50 {dimension_numbers = #tpu.dot_dimension_numbers<[1], [0], [0], [1], [0, 0, 1, 1], [], []>} : vector<64x128xbf16>, vector<128x128xbf16>, vector<64x128xf32> -> vector<64x128xf32>
    %58 = arith.addf %51, %57 : vector<64x128xf32>
    %c1_51 = arith.constant 1 : index
    %c0_52 = arith.constant 0 : index
    %c0_53 = arith.constant 0 : index
    %59 = vector.load %arg11[%c1_51, %c0_52, %c0_53] : memref<12x16x128xf32, #tpu.memory_space<vmem>>, vector<8x8x128xf32>
    %60 = vector.shape_cast %59 : vector<8x8x128xf32> to vector<64x128xf32>
    %61 = arith.truncf %60 : vector<64x128xf32> to vector<64x128xbf16>
    %c5 = arith.constant 5 : index
    %c0_54 = arith.constant 0 : index
    %c0_55 = arith.constant 0 : index
    %62 = vector.load %arg4[%c5, %c0_54, %c0_55] : memref<25x128x128xbf16, #tpu.memory_space<vmem>>, vector<1x128x128xbf16>
    %63 = vector.shape_cast %62 : vector<1x128x128xbf16> to vector<128x128xbf16>
    %cst_56 = arith.constant dense<0.000000e+00> : vector<64x128xf32>
    %64 = tpu.matmul %61, %63, %cst_56 {dimension_numbers = #tpu.dot_dimension_numbers<[1], [0], [0], [1], [0, 0, 1, 1], [], []>} : vector<64x128xbf16>, vector<128x128xbf16>, vector<64x128xf32> -> vector<64x128xf32>
    %65 = arith.addf %58, %64 : vector<64x128xf32>
    %c1_57 = arith.constant 1 : index
    %c1_58 = arith.constant 1 : index
    %c0_59 = arith.constant 0 : index
    %66 = vector.load %arg11[%c1_57, %c1_58, %c0_59] : memref<12x16x128xf32, #tpu.memory_space<vmem>>, vector<8x8x128xf32>
    %67 = vector.shape_cast %66 : vector<8x8x128xf32> to vector<64x128xf32>
    %68 = arith.truncf %67 : vector<64x128xf32> to vector<64x128xbf16>
    %c6 = arith.constant 6 : index
    %c0_60 = arith.constant 0 : index
    %c0_61 = arith.constant 0 : index
    %69 = vector.load %arg4[%c6, %c0_60, %c0_61] : memref<25x128x128xbf16, #tpu.memory_space<vmem>>, vector<1x128x128xbf16>
    %70 = vector.shape_cast %69 : vector<1x128x128xbf16> to vector<128x128xbf16>
    %cst_62 = arith.constant dense<0.000000e+00> : vector<64x128xf32>
    %71 = tpu.matmul %68, %70, %cst_62 {dimension_numbers = #tpu.dot_dimension_numbers<[1], [0], [0], [1], [0, 0, 1, 1], [], []>} : vector<64x128xbf16>, vector<128x128xbf16>, vector<64x128xf32> -> vector<64x128xf32>
    %72 = arith.addf %65, %71 : vector<64x128xf32>
    %c1_63 = arith.constant 1 : index
    %c2_64 = arith.constant 2 : index
    %c0_65 = arith.constant 0 : index
    %73 = vector.load %arg11[%c1_63, %c2_64, %c0_65] : memref<12x16x128xf32, #tpu.memory_space<vmem>>, vector<8x8x128xf32>
    %74 = vector.shape_cast %73 : vector<8x8x128xf32> to vector<64x128xf32>
    %75 = arith.truncf %74 : vector<64x128xf32> to vector<64x128xbf16>
    %c7 = arith.constant 7 : index
    %c0_66 = arith.constant 0 : index
    %c0_67 = arith.constant 0 : index
    %76 = vector.load %arg4[%c7, %c0_66, %c0_67] : memref<25x128x128xbf16, #tpu.memory_space<vmem>>, vector<1x128x128xbf16>
    %77 = vector.shape_cast %76 : vector<1x128x128xbf16> to vector<128x128xbf16>
    %cst_68 = arith.constant dense<0.000000e+00> : vector<64x128xf32>
    %78 = tpu.matmul %75, %77, %cst_68 {dimension_numbers = #tpu.dot_dimension_numbers<[1], [0], [0], [1], [0, 0, 1, 1], [], []>} : vector<64x128xbf16>, vector<128x128xbf16>, vector<64x128xf32> -> vector<64x128xf32>
    %79 = arith.addf %72, %78 : vector<64x128xf32>
    %c1_69 = arith.constant 1 : index
    %c3_70 = arith.constant 3 : index
    %c0_71 = arith.constant 0 : index
    %80 = vector.load %arg11[%c1_69, %c3_70, %c0_71] : memref<12x16x128xf32, #tpu.memory_space<vmem>>, vector<8x8x128xf32>
    %81 = vector.shape_cast %80 : vector<8x8x128xf32> to vector<64x128xf32>
    %82 = arith.truncf %81 : vector<64x128xf32> to vector<64x128xbf16>
    %c8 = arith.constant 8 : index
    %c0_72 = arith.constant 0 : index
    %c0_73 = arith.constant 0 : index
    %83 = vector.load %arg4[%c8, %c0_72, %c0_73] : memref<25x128x128xbf16, #tpu.memory_space<vmem>>, vector<1x128x128xbf16>
    %84 = vector.shape_cast %83 : vector<1x128x128xbf16> to vector<128x128xbf16>
    %cst_74 = arith.constant dense<0.000000e+00> : vector<64x128xf32>
    %85 = tpu.matmul %82, %84, %cst_74 {dimension_numbers = #tpu.dot_dimension_numbers<[1], [0], [0], [1], [0, 0, 1, 1], [], []>} : vector<64x128xbf16>, vector<128x128xbf16>, vector<64x128xf32> -> vector<64x128xf32>
    %86 = arith.addf %79, %85 : vector<64x128xf32>
    %c1_75 = arith.constant 1 : index
    %c4_76 = arith.constant 4 : index
    %c0_77 = arith.constant 0 : index
    %87 = vector.load %arg11[%c1_75, %c4_76, %c0_77] : memref<12x16x128xf32, #tpu.memory_space<vmem>>, vector<8x8x128xf32>
    %88 = vector.shape_cast %87 : vector<8x8x128xf32> to vector<64x128xf32>
    %89 = arith.truncf %88 : vector<64x128xf32> to vector<64x128xbf16>
    %c9 = arith.constant 9 : index
    %c0_78 = arith.constant 0 : index
    %c0_79 = arith.constant 0 : index
    %90 = vector.load %arg4[%c9, %c0_78, %c0_79] : memref<25x128x128xbf16, #tpu.memory_space<vmem>>, vector<1x128x128xbf16>
    %91 = vector.shape_cast %90 : vector<1x128x128xbf16> to vector<128x128xbf16>
    %cst_80 = arith.constant dense<0.000000e+00> : vector<64x128xf32>
    %92 = tpu.matmul %89, %91, %cst_80 {dimension_numbers = #tpu.dot_dimension_numbers<[1], [0], [0], [1], [0, 0, 1, 1], [], []>} : vector<64x128xbf16>, vector<128x128xbf16>, vector<64x128xf32> -> vector<64x128xf32>
    %93 = arith.addf %86, %92 : vector<64x128xf32>
    %c2_81 = arith.constant 2 : index
    %c0_82 = arith.constant 0 : index
    %c0_83 = arith.constant 0 : index
    %94 = vector.load %arg11[%c2_81, %c0_82, %c0_83] : memref<12x16x128xf32, #tpu.memory_space<vmem>>, vector<8x8x128xf32>
    %95 = vector.shape_cast %94 : vector<8x8x128xf32> to vector<64x128xf32>
    %96 = arith.truncf %95 : vector<64x128xf32> to vector<64x128xbf16>
    %c10 = arith.constant 10 : index
    %c0_84 = arith.constant 0 : index
    %c0_85 = arith.constant 0 : index
    %97 = vector.load %arg4[%c10, %c0_84, %c0_85] : memref<25x128x128xbf16, #tpu.memory_space<vmem>>, vector<1x128x128xbf16>
    %98 = vector.shape_cast %97 : vector<1x128x128xbf16> to vector<128x128xbf16>
    %cst_86 = arith.constant dense<0.000000e+00> : vector<64x128xf32>
    %99 = tpu.matmul %96, %98, %cst_86 {dimension_numbers = #tpu.dot_dimension_numbers<[1], [0], [0], [1], [0, 0, 1, 1], [], []>} : vector<64x128xbf16>, vector<128x128xbf16>, vector<64x128xf32> -> vector<64x128xf32>
    %100 = arith.addf %93, %99 : vector<64x128xf32>
    %c2_87 = arith.constant 2 : index
    %c1_88 = arith.constant 1 : index
    %c0_89 = arith.constant 0 : index
    %101 = vector.load %arg11[%c2_87, %c1_88, %c0_89] : memref<12x16x128xf32, #tpu.memory_space<vmem>>, vector<8x8x128xf32>
    %102 = vector.shape_cast %101 : vector<8x8x128xf32> to vector<64x128xf32>
    %103 = arith.truncf %102 : vector<64x128xf32> to vector<64x128xbf16>
    %c11 = arith.constant 11 : index
    %c0_90 = arith.constant 0 : index
    %c0_91 = arith.constant 0 : index
    %104 = vector.load %arg4[%c11, %c0_90, %c0_91] : memref<25x128x128xbf16, #tpu.memory_space<vmem>>, vector<1x128x128xbf16>
    %105 = vector.shape_cast %104 : vector<1x128x128xbf16> to vector<128x128xbf16>
    %cst_92 = arith.constant dense<0.000000e+00> : vector<64x128xf32>
    %106 = tpu.matmul %103, %105, %cst_92 {dimension_numbers = #tpu.dot_dimension_numbers<[1], [0], [0], [1], [0, 0, 1, 1], [], []>} : vector<64x128xbf16>, vector<128x128xbf16>, vector<64x128xf32> -> vector<64x128xf32>
    %107 = arith.addf %100, %106 : vector<64x128xf32>
    %c2_93 = arith.constant 2 : index
    %c2_94 = arith.constant 2 : index
    %c0_95 = arith.constant 0 : index
    %108 = vector.load %arg11[%c2_93, %c2_94, %c0_95] : memref<12x16x128xf32, #tpu.memory_space<vmem>>, vector<8x8x128xf32>
    %109 = vector.shape_cast %108 : vector<8x8x128xf32> to vector<64x128xf32>
    %110 = arith.truncf %109 : vector<64x128xf32> to vector<64x128xbf16>
    %c12 = arith.constant 12 : index
    %c0_96 = arith.constant 0 : index
    %c0_97 = arith.constant 0 : index
    %111 = vector.load %arg4[%c12, %c0_96, %c0_97] : memref<25x128x128xbf16, #tpu.memory_space<vmem>>, vector<1x128x128xbf16>
    %112 = vector.shape_cast %111 : vector<1x128x128xbf16> to vector<128x128xbf16>
    %cst_98 = arith.constant dense<0.000000e+00> : vector<64x128xf32>
    %113 = tpu.matmul %110, %112, %cst_98 {dimension_numbers = #tpu.dot_dimension_numbers<[1], [0], [0], [1], [0, 0, 1, 1], [], []>} : vector<64x128xbf16>, vector<128x128xbf16>, vector<64x128xf32> -> vector<64x128xf32>
    %114 = arith.addf %107, %113 : vector<64x128xf32>
    %c2_99 = arith.constant 2 : index
    %c3_100 = arith.constant 3 : index
    %c0_101 = arith.constant 0 : index
    %115 = vector.load %arg11[%c2_99, %c3_100, %c0_101] : memref<12x16x128xf32, #tpu.memory_space<vmem>>, vector<8x8x128xf32>
    %116 = vector.shape_cast %115 : vector<8x8x128xf32> to vector<64x128xf32>
    %117 = arith.truncf %116 : vector<64x128xf32> to vector<64x128xbf16>
    %c13 = arith.constant 13 : index
    %c0_102 = arith.constant 0 : index
    %c0_103 = arith.constant 0 : index
    %118 = vector.load %arg4[%c13, %c0_102, %c0_103] : memref<25x128x128xbf16, #tpu.memory_space<vmem>>, vector<1x128x128xbf16>
    %119 = vector.shape_cast %118 : vector<1x128x128xbf16> to vector<128x128xbf16>
    %cst_104 = arith.constant dense<0.000000e+00> : vector<64x128xf32>
    %120 = tpu.matmul %117, %119, %cst_104 {dimension_numbers = #tpu.dot_dimension_numbers<[1], [0], [0], [1], [0, 0, 1, 1], [], []>} : vector<64x128xbf16>, vector<128x128xbf16>, vector<64x128xf32> -> vector<64x128xf32>
    %121 = arith.addf %114, %120 : vector<64x128xf32>
    %c2_105 = arith.constant 2 : index
    %c4_106 = arith.constant 4 : index
    %c0_107 = arith.constant 0 : index
    %122 = vector.load %arg11[%c2_105, %c4_106, %c0_107] : memref<12x16x128xf32, #tpu.memory_space<vmem>>, vector<8x8x128xf32>
    %123 = vector.shape_cast %122 : vector<8x8x128xf32> to vector<64x128xf32>
    %124 = arith.truncf %123 : vector<64x128xf32> to vector<64x128xbf16>
    %c14 = arith.constant 14 : index
    %c0_108 = arith.constant 0 : index
    %c0_109 = arith.constant 0 : index
    %125 = vector.load %arg4[%c14, %c0_108, %c0_109] : memref<25x128x128xbf16, #tpu.memory_space<vmem>>, vector<1x128x128xbf16>
    %126 = vector.shape_cast %125 : vector<1x128x128xbf16> to vector<128x128xbf16>
    %cst_110 = arith.constant dense<0.000000e+00> : vector<64x128xf32>
    %127 = tpu.matmul %124, %126, %cst_110 {dimension_numbers = #tpu.dot_dimension_numbers<[1], [0], [0], [1], [0, 0, 1, 1], [], []>} : vector<64x128xbf16>, vector<128x128xbf16>, vector<64x128xf32> -> vector<64x128xf32>
    %128 = arith.addf %121, %127 : vector<64x128xf32>
    %c3_111 = arith.constant 3 : index
    %c0_112 = arith.constant 0 : index
    %c0_113 = arith.constant 0 : index
    %129 = vector.load %arg11[%c3_111, %c0_112, %c0_113] : memref<12x16x128xf32, #tpu.memory_space<vmem>>, vector<8x8x128xf32>
    %130 = vector.shape_cast %129 : vector<8x8x128xf32> to vector<64x128xf32>
    %131 = arith.truncf %130 : vector<64x128xf32> to vector<64x128xbf16>
    %c15 = arith.constant 15 : index
    %c0_114 = arith.constant 0 : index
    %c0_115 = arith.constant 0 : index
    %132 = vector.load %arg4[%c15, %c0_114, %c0_115] : memref<25x128x128xbf16, #tpu.memory_space<vmem>>, vector<1x128x128xbf16>
    %133 = vector.shape_cast %132 : vector<1x128x128xbf16> to vector<128x128xbf16>
    %cst_116 = arith.constant dense<0.000000e+00> : vector<64x128xf32>
    %134 = tpu.matmul %131, %133, %cst_116 {dimension_numbers = #tpu.dot_dimension_numbers<[1], [0], [0], [1], [0, 0, 1, 1], [], []>} : vector<64x128xbf16>, vector<128x128xbf16>, vector<64x128xf32> -> vector<64x128xf32>
    %135 = arith.addf %128, %134 : vector<64x128xf32>
    %c3_117 = arith.constant 3 : index
    %c1_118 = arith.constant 1 : index
    %c0_119 = arith.constant 0 : index
    %136 = vector.load %arg11[%c3_117, %c1_118, %c0_119] : memref<12x16x128xf32, #tpu.memory_space<vmem>>, vector<8x8x128xf32>
    %137 = vector.shape_cast %136 : vector<8x8x128xf32> to vector<64x128xf32>
    %138 = arith.truncf %137 : vector<64x128xf32> to vector<64x128xbf16>
    %c16 = arith.constant 16 : index
    %c0_120 = arith.constant 0 : index
    %c0_121 = arith.constant 0 : index
    %139 = vector.load %arg4[%c16, %c0_120, %c0_121] : memref<25x128x128xbf16, #tpu.memory_space<vmem>>, vector<1x128x128xbf16>
    %140 = vector.shape_cast %139 : vector<1x128x128xbf16> to vector<128x128xbf16>
    %cst_122 = arith.constant dense<0.000000e+00> : vector<64x128xf32>
    %141 = tpu.matmul %138, %140, %cst_122 {dimension_numbers = #tpu.dot_dimension_numbers<[1], [0], [0], [1], [0, 0, 1, 1], [], []>} : vector<64x128xbf16>, vector<128x128xbf16>, vector<64x128xf32> -> vector<64x128xf32>
    %142 = arith.addf %135, %141 : vector<64x128xf32>
    %c3_123 = arith.constant 3 : index
    %c2_124 = arith.constant 2 : index
    %c0_125 = arith.constant 0 : index
    %143 = vector.load %arg11[%c3_123, %c2_124, %c0_125] : memref<12x16x128xf32, #tpu.memory_space<vmem>>, vector<8x8x128xf32>
    %144 = vector.shape_cast %143 : vector<8x8x128xf32> to vector<64x128xf32>
    %145 = arith.truncf %144 : vector<64x128xf32> to vector<64x128xbf16>
    %c17 = arith.constant 17 : index
    %c0_126 = arith.constant 0 : index
    %c0_127 = arith.constant 0 : index
    %146 = vector.load %arg4[%c17, %c0_126, %c0_127] : memref<25x128x128xbf16, #tpu.memory_space<vmem>>, vector<1x128x128xbf16>
    %147 = vector.shape_cast %146 : vector<1x128x128xbf16> to vector<128x128xbf16>
    %cst_128 = arith.constant dense<0.000000e+00> : vector<64x128xf32>
    %148 = tpu.matmul %145, %147, %cst_128 {dimension_numbers = #tpu.dot_dimension_numbers<[1], [0], [0], [1], [0, 0, 1, 1], [], []>} : vector<64x128xbf16>, vector<128x128xbf16>, vector<64x128xf32> -> vector<64x128xf32>
    %149 = arith.addf %142, %148 : vector<64x128xf32>
    %c3_129 = arith.constant 3 : index
    %c3_130 = arith.constant 3 : index
    %c0_131 = arith.constant 0 : index
    %150 = vector.load %arg11[%c3_129, %c3_130, %c0_131] : memref<12x16x128xf32, #tpu.memory_space<vmem>>, vector<8x8x128xf32>
    %151 = vector.shape_cast %150 : vector<8x8x128xf32> to vector<64x128xf32>
    %152 = arith.truncf %151 : vector<64x128xf32> to vector<64x128xbf16>
    %c18 = arith.constant 18 : index
    %c0_132 = arith.constant 0 : index
    %c0_133 = arith.constant 0 : index
    %153 = vector.load %arg4[%c18, %c0_132, %c0_133] : memref<25x128x128xbf16, #tpu.memory_space<vmem>>, vector<1x128x128xbf16>
    %154 = vector.shape_cast %153 : vector<1x128x128xbf16> to vector<128x128xbf16>
    %cst_134 = arith.constant dense<0.000000e+00> : vector<64x128xf32>
    %155 = tpu.matmul %152, %154, %cst_134 {dimension_numbers = #tpu.dot_dimension_numbers<[1], [0], [0], [1], [0, 0, 1, 1], [], []>} : vector<64x128xbf16>, vector<128x128xbf16>, vector<64x128xf32> -> vector<64x128xf32>
    %156 = arith.addf %149, %155 : vector<64x128xf32>
    %c3_135 = arith.constant 3 : index
    %c4_136 = arith.constant 4 : index
    %c0_137 = arith.constant 0 : index
    %157 = vector.load %arg11[%c3_135, %c4_136, %c0_137] : memref<12x16x128xf32, #tpu.memory_space<vmem>>, vector<8x8x128xf32>
    %158 = vector.shape_cast %157 : vector<8x8x128xf32> to vector<64x128xf32>
    %159 = arith.truncf %158 : vector<64x128xf32> to vector<64x128xbf16>
    %c19 = arith.constant 19 : index
    %c0_138 = arith.constant 0 : index
    %c0_139 = arith.constant 0 : index
    %160 = vector.load %arg4[%c19, %c0_138, %c0_139] : memref<25x128x128xbf16, #tpu.memory_space<vmem>>, vector<1x128x128xbf16>
    %161 = vector.shape_cast %160 : vector<1x128x128xbf16> to vector<128x128xbf16>
    %cst_140 = arith.constant dense<0.000000e+00> : vector<64x128xf32>
    %162 = tpu.matmul %159, %161, %cst_140 {dimension_numbers = #tpu.dot_dimension_numbers<[1], [0], [0], [1], [0, 0, 1, 1], [], []>} : vector<64x128xbf16>, vector<128x128xbf16>, vector<64x128xf32> -> vector<64x128xf32>
    %163 = arith.addf %156, %162 : vector<64x128xf32>
    %c4_141 = arith.constant 4 : index
    %c0_142 = arith.constant 0 : index
    %c0_143 = arith.constant 0 : index
    %164 = vector.load %arg11[%c4_141, %c0_142, %c0_143] : memref<12x16x128xf32, #tpu.memory_space<vmem>>, vector<8x8x128xf32>
    %165 = vector.shape_cast %164 : vector<8x8x128xf32> to vector<64x128xf32>
    %166 = arith.truncf %165 : vector<64x128xf32> to vector<64x128xbf16>
    %c20 = arith.constant 20 : index
    %c0_144 = arith.constant 0 : index
    %c0_145 = arith.constant 0 : index
    %167 = vector.load %arg4[%c20, %c0_144, %c0_145] : memref<25x128x128xbf16, #tpu.memory_space<vmem>>, vector<1x128x128xbf16>
    %168 = vector.shape_cast %167 : vector<1x128x128xbf16> to vector<128x128xbf16>
    %cst_146 = arith.constant dense<0.000000e+00> : vector<64x128xf32>
    %169 = tpu.matmul %166, %168, %cst_146 {dimension_numbers = #tpu.dot_dimension_numbers<[1], [0], [0], [1], [0, 0, 1, 1], [], []>} : vector<64x128xbf16>, vector<128x128xbf16>, vector<64x128xf32> -> vector<64x128xf32>
    %170 = arith.addf %163, %169 : vector<64x128xf32>
    %c4_147 = arith.constant 4 : index
    %c1_148 = arith.constant 1 : index
    %c0_149 = arith.constant 0 : index
    %171 = vector.load %arg11[%c4_147, %c1_148, %c0_149] : memref<12x16x128xf32, #tpu.memory_space<vmem>>, vector<8x8x128xf32>
    %172 = vector.shape_cast %171 : vector<8x8x128xf32> to vector<64x128xf32>
    %173 = arith.truncf %172 : vector<64x128xf32> to vector<64x128xbf16>
    %c21 = arith.constant 21 : index
    %c0_150 = arith.constant 0 : index
    %c0_151 = arith.constant 0 : index
    %174 = vector.load %arg4[%c21, %c0_150, %c0_151] : memref<25x128x128xbf16, #tpu.memory_space<vmem>>, vector<1x128x128xbf16>
    %175 = vector.shape_cast %174 : vector<1x128x128xbf16> to vector<128x128xbf16>
    %cst_152 = arith.constant dense<0.000000e+00> : vector<64x128xf32>
    %176 = tpu.matmul %173, %175, %cst_152 {dimension_numbers = #tpu.dot_dimension_numbers<[1], [0], [0], [1], [0, 0, 1, 1], [], []>} : vector<64x128xbf16>, vector<128x128xbf16>, vector<64x128xf32> -> vector<64x128xf32>
    %177 = arith.addf %170, %176 : vector<64x128xf32>
    %c4_153 = arith.constant 4 : index
    %c2_154 = arith.constant 2 : index
    %c0_155 = arith.constant 0 : index
    %178 = vector.load %arg11[%c4_153, %c2_154, %c0_155] : memref<12x16x128xf32, #tpu.memory_space<vmem>>, vector<8x8x128xf32>
    %179 = vector.shape_cast %178 : vector<8x8x128xf32> to vector<64x128xf32>
    %180 = arith.truncf %179 : vector<64x128xf32> to vector<64x128xbf16>
    %c22 = arith.constant 22 : index
    %c0_156 = arith.constant 0 : index
    %c0_157 = arith.constant 0 : index
    %181 = vector.load %arg4[%c22, %c0_156, %c0_157] : memref<25x128x128xbf16, #tpu.memory_space<vmem>>, vector<1x128x128xbf16>
    %182 = vector.shape_cast %181 : vector<1x128x128xbf16> to vector<128x128xbf16>
    %cst_158 = arith.constant dense<0.000000e+00> : vector<64x128xf32>
    %183 = tpu.matmul %180, %182, %cst_158 {dimension_numbers = #tpu.dot_dimension_numbers<[1], [0], [0], [1], [0, 0, 1, 1], [], []>} : vector<64x128xbf16>, vector<128x128xbf16>, vector<64x128xf32> -> vector<64x128xf32>
    %184 = arith.addf %177, %183 : vector<64x128xf32>
    %c4_159 = arith.constant 4 : index
    %c3_160 = arith.constant 3 : index
    %c0_161 = arith.constant 0 : index
    %185 = vector.load %arg11[%c4_159, %c3_160, %c0_161] : memref<12x16x128xf32, #tpu.memory_space<vmem>>, vector<8x8x128xf32>
    %186 = vector.shape_cast %185 : vector<8x8x128xf32> to vector<64x128xf32>
    %187 = arith.truncf %186 : vector<64x128xf32> to vector<64x128xbf16>
    %c23 = arith.constant 23 : index
    %c0_162 = arith.constant 0 : index
    %c0_163 = arith.constant 0 : index
    %188 = vector.load %arg4[%c23, %c0_162, %c0_163] : memref<25x128x128xbf16, #tpu.memory_space<vmem>>, vector<1x128x128xbf16>
    %189 = vector.shape_cast %188 : vector<1x128x128xbf16> to vector<128x128xbf16>
    %cst_164 = arith.constant dense<0.000000e+00> : vector<64x128xf32>
    %190 = tpu.matmul %187, %189, %cst_164 {dimension_numbers = #tpu.dot_dimension_numbers<[1], [0], [0], [1], [0, 0, 1, 1], [], []>} : vector<64x128xbf16>, vector<128x128xbf16>, vector<64x128xf32> -> vector<64x128xf32>
    %191 = arith.addf %184, %190 : vector<64x128xf32>
    %c4_165 = arith.constant 4 : index
    %c4_166 = arith.constant 4 : index
    %c0_167 = arith.constant 0 : index
    %192 = vector.load %arg11[%c4_165, %c4_166, %c0_167] : memref<12x16x128xf32, #tpu.memory_space<vmem>>, vector<8x8x128xf32>
    %193 = vector.shape_cast %192 : vector<8x8x128xf32> to vector<64x128xf32>
    %194 = arith.truncf %193 : vector<64x128xf32> to vector<64x128xbf16>
    %c24 = arith.constant 24 : index
    %c0_168 = arith.constant 0 : index
    %c0_169 = arith.constant 0 : index
    %195 = vector.load %arg4[%c24, %c0_168, %c0_169] : memref<25x128x128xbf16, #tpu.memory_space<vmem>>, vector<1x128x128xbf16>
    %196 = vector.shape_cast %195 : vector<1x128x128xbf16> to vector<128x128xbf16>
    %cst_170 = arith.constant dense<0.000000e+00> : vector<64x128xf32>
    %197 = tpu.matmul %194, %196, %cst_170 {dimension_numbers = #tpu.dot_dimension_numbers<[1], [0], [0], [1], [0, 0, 1, 1], [], []>} : vector<64x128xbf16>, vector<128x128xbf16>, vector<64x128xf32> -> vector<64x128xf32>
    %198 = arith.addf %191, %197 : vector<64x128xf32>
    %c0_171 = arith.constant 0 : index
    %c0_172 = arith.constant 0 : index
    %199 = vector.load %arg5[%c0_171, %c0_172] : memref<1x128xf32, #tpu.memory_space<vmem>>, vector<1x128xf32>
    %200 = vector.broadcast %199 : vector<1x128xf32> to vector<64x128xf32>
    %201 = arith.addf %198, %200 : vector<64x128xf32>
    %202 = vector.shape_cast %201 : vector<64x128xf32> to vector<8x8x128xf32>
    %cst_173 = arith.constant 0.000000e+00 : f32
    %203 = vector.broadcast %cst_173 : f32 to vector<1x512xf32>
    %204 = vector.extract_strided_slice %202 {offsets = [0, 0, 0], sizes = [1, 8, 128], strides = [1, 1, 1]} : vector<8x8x128xf32> to vector<1x8x128xf32>
    %205 = vector.shape_cast %204 : vector<1x8x128xf32> to vector<8x128xf32>
    %206 = vector.extract_strided_slice %202 {offsets = [1, 0, 0], sizes = [1, 8, 128], strides = [1, 1, 1]} : vector<8x8x128xf32> to vector<1x8x128xf32>
    %207 = vector.shape_cast %206 : vector<1x8x128xf32> to vector<8x128xf32>
    %208 = arith.maximumf %205, %207 : vector<8x128xf32>
    %209 = vector.extract_strided_slice %208 {offsets = [0, 0], sizes = [1, 128], strides = [1, 1]} : vector<8x128xf32> to vector<1x128xf32>
    %210 = vector.extract_strided_slice %208 {offsets = [1, 0], sizes = [1, 128], strides = [1, 1]} : vector<8x128xf32> to vector<1x128xf32>
    %211 = arith.maximumf %209, %210 : vector<1x128xf32>
    %cst_174 = arith.constant 0.000000e+00 : f32
    %212 = vector.broadcast %cst_174 : f32 to vector<1x128xf32>
    %213 = arith.maximumf %211, %212 : vector<1x128xf32>
    %214 = arith.truncf %213 : vector<1x128xf32> to vector<1x128xbf16>
    %c0_175 = arith.constant 0 : index
    %c0_176 = arith.constant 0 : index
    %c0_177 = arith.constant 0 : index
    %215 = vector.load %arg6[%c0_175, %c0_176, %c0_177] : memref<16x128x512xbf16, #tpu.memory_space<vmem>>, vector<1x128x512xbf16>
    %216 = vector.shape_cast %215 : vector<1x128x512xbf16> to vector<128x512xbf16>
    %cst_178 = arith.constant dense<0.000000e+00> : vector<1x512xf32>
    %217 = tpu.matmul %214, %216, %cst_178 {dimension_numbers = #tpu.dot_dimension_numbers<[1], [0], [0], [1], [0, 0, 1, 1], [], []>} : vector<1x128xbf16>, vector<128x512xbf16>, vector<1x512xf32> -> vector<1x512xf32>
    %218 = arith.addf %203, %217 : vector<1x512xf32>
    %219 = vector.extract_strided_slice %208 {offsets = [2, 0], sizes = [1, 128], strides = [1, 1]} : vector<8x128xf32> to vector<1x128xf32>
    %220 = vector.extract_strided_slice %208 {offsets = [3, 0], sizes = [1, 128], strides = [1, 1]} : vector<8x128xf32> to vector<1x128xf32>
    %221 = arith.maximumf %219, %220 : vector<1x128xf32>
    %cst_179 = arith.constant 0.000000e+00 : f32
    %222 = vector.broadcast %cst_179 : f32 to vector<1x128xf32>
    %223 = arith.maximumf %221, %222 : vector<1x128xf32>
    %224 = arith.truncf %223 : vector<1x128xf32> to vector<1x128xbf16>
    %c1_180 = arith.constant 1 : index
    %c0_181 = arith.constant 0 : index
    %c0_182 = arith.constant 0 : index
    %225 = vector.load %arg6[%c1_180, %c0_181, %c0_182] : memref<16x128x512xbf16, #tpu.memory_space<vmem>>, vector<1x128x512xbf16>
    %226 = vector.shape_cast %225 : vector<1x128x512xbf16> to vector<128x512xbf16>
    %cst_183 = arith.constant dense<0.000000e+00> : vector<1x512xf32>
    %227 = tpu.matmul %224, %226, %cst_183 {dimension_numbers = #tpu.dot_dimension_numbers<[1], [0], [0], [1], [0, 0, 1, 1], [], []>} : vector<1x128xbf16>, vector<128x512xbf16>, vector<1x512xf32> -> vector<1x512xf32>
    %228 = arith.addf %218, %227 : vector<1x512xf32>
    %229 = vector.extract_strided_slice %208 {offsets = [4, 0], sizes = [1, 128], strides = [1, 1]} : vector<8x128xf32> to vector<1x128xf32>
    %230 = vector.extract_strided_slice %208 {offsets = [5, 0], sizes = [1, 128], strides = [1, 1]} : vector<8x128xf32> to vector<1x128xf32>
    %231 = arith.maximumf %229, %230 : vector<1x128xf32>
    %cst_184 = arith.constant 0.000000e+00 : f32
    %232 = vector.broadcast %cst_184 : f32 to vector<1x128xf32>
    %233 = arith.maximumf %231, %232 : vector<1x128xf32>
    %234 = arith.truncf %233 : vector<1x128xf32> to vector<1x128xbf16>
    %c2_185 = arith.constant 2 : index
    %c0_186 = arith.constant 0 : index
    %c0_187 = arith.constant 0 : index
    %235 = vector.load %arg6[%c2_185, %c0_186, %c0_187] : memref<16x128x512xbf16, #tpu.memory_space<vmem>>, vector<1x128x512xbf16>
    %236 = vector.shape_cast %235 : vector<1x128x512xbf16> to vector<128x512xbf16>
    %cst_188 = arith.constant dense<0.000000e+00> : vector<1x512xf32>
    %237 = tpu.matmul %234, %236, %cst_188 {dimension_numbers = #tpu.dot_dimension_numbers<[1], [0], [0], [1], [0, 0, 1, 1], [], []>} : vector<1x128xbf16>, vector<128x512xbf16>, vector<1x512xf32> -> vector<1x512xf32>
    %238 = arith.addf %228, %237 : vector<1x512xf32>
    %239 = vector.extract_strided_slice %208 {offsets = [6, 0], sizes = [1, 128], strides = [1, 1]} : vector<8x128xf32> to vector<1x128xf32>
    %240 = vector.extract_strided_slice %208 {offsets = [7, 0], sizes = [1, 128], strides = [1, 1]} : vector<8x128xf32> to vector<1x128xf32>
    %241 = arith.maximumf %239, %240 : vector<1x128xf32>
    %cst_189 = arith.constant 0.000000e+00 : f32
    %242 = vector.broadcast %cst_189 : f32 to vector<1x128xf32>
    %243 = arith.maximumf %241, %242 : vector<1x128xf32>
    %244 = arith.truncf %243 : vector<1x128xf32> to vector<1x128xbf16>
    %c3_190 = arith.constant 3 : index
    %c0_191 = arith.constant 0 : index
    %c0_192 = arith.constant 0 : index
    %245 = vector.load %arg6[%c3_190, %c0_191, %c0_192] : memref<16x128x512xbf16, #tpu.memory_space<vmem>>, vector<1x128x512xbf16>
    %246 = vector.shape_cast %245 : vector<1x128x512xbf16> to vector<128x512xbf16>
    %cst_193 = arith.constant dense<0.000000e+00> : vector<1x512xf32>
    %247 = tpu.matmul %244, %246, %cst_193 {dimension_numbers = #tpu.dot_dimension_numbers<[1], [0], [0], [1], [0, 0, 1, 1], [], []>} : vector<1x128xbf16>, vector<128x512xbf16>, vector<1x512xf32> -> vector<1x512xf32>
    %248 = arith.addf %238, %247 : vector<1x512xf32>
    %249 = vector.extract_strided_slice %202 {offsets = [2, 0, 0], sizes = [1, 8, 128], strides = [1, 1, 1]} : vector<8x8x128xf32> to vector<1x8x128xf32>
    %250 = vector.shape_cast %249 : vector<1x8x128xf32> to vector<8x128xf32>
    %251 = vector.extract_strided_slice %202 {offsets = [3, 0, 0], sizes = [1, 8, 128], strides = [1, 1, 1]} : vector<8x8x128xf32> to vector<1x8x128xf32>
    %252 = vector.shape_cast %251 : vector<1x8x128xf32> to vector<8x128xf32>
    %253 = arith.maximumf %250, %252 : vector<8x128xf32>
    %254 = vector.extract_strided_slice %253 {offsets = [0, 0], sizes = [1, 128], strides = [1, 1]} : vector<8x128xf32> to vector<1x128xf32>
    %255 = vector.extract_strided_slice %253 {offsets = [1, 0], sizes = [1, 128], strides = [1, 1]} : vector<8x128xf32> to vector<1x128xf32>
    %256 = arith.maximumf %254, %255 : vector<1x128xf32>
    %cst_194 = arith.constant 0.000000e+00 : f32
    %257 = vector.broadcast %cst_194 : f32 to vector<1x128xf32>
    %258 = arith.maximumf %256, %257 : vector<1x128xf32>
    %259 = arith.truncf %258 : vector<1x128xf32> to vector<1x128xbf16>
    %c4_195 = arith.constant 4 : index
    %c0_196 = arith.constant 0 : index
    %c0_197 = arith.constant 0 : index
    %260 = vector.load %arg6[%c4_195, %c0_196, %c0_197] : memref<16x128x512xbf16, #tpu.memory_space<vmem>>, vector<1x128x512xbf16>
    %261 = vector.shape_cast %260 : vector<1x128x512xbf16> to vector<128x512xbf16>
    %cst_198 = arith.constant dense<0.000000e+00> : vector<1x512xf32>
    %262 = tpu.matmul %259, %261, %cst_198 {dimension_numbers = #tpu.dot_dimension_numbers<[1], [0], [0], [1], [0, 0, 1, 1], [], []>} : vector<1x128xbf16>, vector<128x512xbf16>, vector<1x512xf32> -> vector<1x512xf32>
    %263 = arith.addf %248, %262 : vector<1x512xf32>
    %264 = vector.extract_strided_slice %253 {offsets = [2, 0], sizes = [1, 128], strides = [1, 1]} : vector<8x128xf32> to vector<1x128xf32>
    %265 = vector.extract_strided_slice %253 {offsets = [3, 0], sizes = [1, 128], strides = [1, 1]} : vector<8x128xf32> to vector<1x128xf32>
    %266 = arith.maximumf %264, %265 : vector<1x128xf32>
    %cst_199 = arith.constant 0.000000e+00 : f32
    %267 = vector.broadcast %cst_199 : f32 to vector<1x128xf32>
    %268 = arith.maximumf %266, %267 : vector<1x128xf32>
    %269 = arith.truncf %268 : vector<1x128xf32> to vector<1x128xbf16>
    %c5_200 = arith.constant 5 : index
    %c0_201 = arith.constant 0 : index
    %c0_202 = arith.constant 0 : index
    %270 = vector.load %arg6[%c5_200, %c0_201, %c0_202] : memref<16x128x512xbf16, #tpu.memory_space<vmem>>, vector<1x128x512xbf16>
    %271 = vector.shape_cast %270 : vector<1x128x512xbf16> to vector<128x512xbf16>
    %cst_203 = arith.constant dense<0.000000e+00> : vector<1x512xf32>
    %272 = tpu.matmul %269, %271, %cst_203 {dimension_numbers = #tpu.dot_dimension_numbers<[1], [0], [0], [1], [0, 0, 1, 1], [], []>} : vector<1x128xbf16>, vector<128x512xbf16>, vector<1x512xf32> -> vector<1x512xf32>
    %273 = arith.addf %263, %272 : vector<1x512xf32>
    %274 = vector.extract_strided_slice %253 {offsets = [4, 0], sizes = [1, 128], strides = [1, 1]} : vector<8x128xf32> to vector<1x128xf32>
    %275 = vector.extract_strided_slice %253 {offsets = [5, 0], sizes = [1, 128], strides = [1, 1]} : vector<8x128xf32> to vector<1x128xf32>
    %276 = arith.maximumf %274, %275 : vector<1x128xf32>
    %cst_204 = arith.constant 0.000000e+00 : f32
    %277 = vector.broadcast %cst_204 : f32 to vector<1x128xf32>
    %278 = arith.maximumf %276, %277 : vector<1x128xf32>
    %279 = arith.truncf %278 : vector<1x128xf32> to vector<1x128xbf16>
    %c6_205 = arith.constant 6 : index
    %c0_206 = arith.constant 0 : index
    %c0_207 = arith.constant 0 : index
    %280 = vector.load %arg6[%c6_205, %c0_206, %c0_207] : memref<16x128x512xbf16, #tpu.memory_space<vmem>>, vector<1x128x512xbf16>
    %281 = vector.shape_cast %280 : vector<1x128x512xbf16> to vector<128x512xbf16>
    %cst_208 = arith.constant dense<0.000000e+00> : vector<1x512xf32>
    %282 = tpu.matmul %279, %281, %cst_208 {dimension_numbers = #tpu.dot_dimension_numbers<[1], [0], [0], [1], [0, 0, 1, 1], [], []>} : vector<1x128xbf16>, vector<128x512xbf16>, vector<1x512xf32> -> vector<1x512xf32>
    %283 = arith.addf %273, %282 : vector<1x512xf32>
    %284 = vector.extract_strided_slice %253 {offsets = [6, 0], sizes = [1, 128], strides = [1, 1]} : vector<8x128xf32> to vector<1x128xf32>
    %285 = vector.extract_strided_slice %253 {offsets = [7, 0], sizes = [1, 128], strides = [1, 1]} : vector<8x128xf32> to vector<1x128xf32>
    %286 = arith.maximumf %284, %285 : vector<1x128xf32>
    %cst_209 = arith.constant 0.000000e+00 : f32
    %287 = vector.broadcast %cst_209 : f32 to vector<1x128xf32>
    %288 = arith.maximumf %286, %287 : vector<1x128xf32>
    %289 = arith.truncf %288 : vector<1x128xf32> to vector<1x128xbf16>
    %c7_210 = arith.constant 7 : index
    %c0_211 = arith.constant 0 : index
    %c0_212 = arith.constant 0 : index
    %290 = vector.load %arg6[%c7_210, %c0_211, %c0_212] : memref<16x128x512xbf16, #tpu.memory_space<vmem>>, vector<1x128x512xbf16>
    %291 = vector.shape_cast %290 : vector<1x128x512xbf16> to vector<128x512xbf16>
    %cst_213 = arith.constant dense<0.000000e+00> : vector<1x512xf32>
    %292 = tpu.matmul %289, %291, %cst_213 {dimension_numbers = #tpu.dot_dimension_numbers<[1], [0], [0], [1], [0, 0, 1, 1], [], []>} : vector<1x128xbf16>, vector<128x512xbf16>, vector<1x512xf32> -> vector<1x512xf32>
    %293 = arith.addf %283, %292 : vector<1x512xf32>
    %294 = vector.extract_strided_slice %202 {offsets = [4, 0, 0], sizes = [1, 8, 128], strides = [1, 1, 1]} : vector<8x8x128xf32> to vector<1x8x128xf32>
    %295 = vector.shape_cast %294 : vector<1x8x128xf32> to vector<8x128xf32>
    %296 = vector.extract_strided_slice %202 {offsets = [5, 0, 0], sizes = [1, 8, 128], strides = [1, 1, 1]} : vector<8x8x128xf32> to vector<1x8x128xf32>
    %297 = vector.shape_cast %296 : vector<1x8x128xf32> to vector<8x128xf32>
    %298 = arith.maximumf %295, %297 : vector<8x128xf32>
    %299 = vector.extract_strided_slice %298 {offsets = [0, 0], sizes = [1, 128], strides = [1, 1]} : vector<8x128xf32> to vector<1x128xf32>
    %300 = vector.extract_strided_slice %298 {offsets = [1, 0], sizes = [1, 128], strides = [1, 1]} : vector<8x128xf32> to vector<1x128xf32>
    %301 = arith.maximumf %299, %300 : vector<1x128xf32>
    %cst_214 = arith.constant 0.000000e+00 : f32
    %302 = vector.broadcast %cst_214 : f32 to vector<1x128xf32>
    %303 = arith.maximumf %301, %302 : vector<1x128xf32>
    %304 = arith.truncf %303 : vector<1x128xf32> to vector<1x128xbf16>
    %c8_215 = arith.constant 8 : index
    %c0_216 = arith.constant 0 : index
    %c0_217 = arith.constant 0 : index
    %305 = vector.load %arg6[%c8_215, %c0_216, %c0_217] : memref<16x128x512xbf16, #tpu.memory_space<vmem>>, vector<1x128x512xbf16>
    %306 = vector.shape_cast %305 : vector<1x128x512xbf16> to vector<128x512xbf16>
    %cst_218 = arith.constant dense<0.000000e+00> : vector<1x512xf32>
    %307 = tpu.matmul %304, %306, %cst_218 {dimension_numbers = #tpu.dot_dimension_numbers<[1], [0], [0], [1], [0, 0, 1, 1], [], []>} : vector<1x128xbf16>, vector<128x512xbf16>, vector<1x512xf32> -> vector<1x512xf32>
    %308 = arith.addf %293, %307 : vector<1x512xf32>
    %309 = vector.extract_strided_slice %298 {offsets = [2, 0], sizes = [1, 128], strides = [1, 1]} : vector<8x128xf32> to vector<1x128xf32>
    %310 = vector.extract_strided_slice %298 {offsets = [3, 0], sizes = [1, 128], strides = [1, 1]} : vector<8x128xf32> to vector<1x128xf32>
    %311 = arith.maximumf %309, %310 : vector<1x128xf32>
    %cst_219 = arith.constant 0.000000e+00 : f32
    %312 = vector.broadcast %cst_219 : f32 to vector<1x128xf32>
    %313 = arith.maximumf %311, %312 : vector<1x128xf32>
    %314 = arith.truncf %313 : vector<1x128xf32> to vector<1x128xbf16>
    %c9_220 = arith.constant 9 : index
    %c0_221 = arith.constant 0 : index
    %c0_222 = arith.constant 0 : index
    %315 = vector.load %arg6[%c9_220, %c0_221, %c0_222] : memref<16x128x512xbf16, #tpu.memory_space<vmem>>, vector<1x128x512xbf16>
    %316 = vector.shape_cast %315 : vector<1x128x512xbf16> to vector<128x512xbf16>
    %cst_223 = arith.constant dense<0.000000e+00> : vector<1x512xf32>
    %317 = tpu.matmul %314, %316, %cst_223 {dimension_numbers = #tpu.dot_dimension_numbers<[1], [0], [0], [1], [0, 0, 1, 1], [], []>} : vector<1x128xbf16>, vector<128x512xbf16>, vector<1x512xf32> -> vector<1x512xf32>
    %318 = arith.addf %308, %317 : vector<1x512xf32>
    %319 = vector.extract_strided_slice %298 {offsets = [4, 0], sizes = [1, 128], strides = [1, 1]} : vector<8x128xf32> to vector<1x128xf32>
    %320 = vector.extract_strided_slice %298 {offsets = [5, 0], sizes = [1, 128], strides = [1, 1]} : vector<8x128xf32> to vector<1x128xf32>
    %321 = arith.maximumf %319, %320 : vector<1x128xf32>
    %cst_224 = arith.constant 0.000000e+00 : f32
    %322 = vector.broadcast %cst_224 : f32 to vector<1x128xf32>
    %323 = arith.maximumf %321, %322 : vector<1x128xf32>
    %324 = arith.truncf %323 : vector<1x128xf32> to vector<1x128xbf16>
    %c10_225 = arith.constant 10 : index
    %c0_226 = arith.constant 0 : index
    %c0_227 = arith.constant 0 : index
    %325 = vector.load %arg6[%c10_225, %c0_226, %c0_227] : memref<16x128x512xbf16, #tpu.memory_space<vmem>>, vector<1x128x512xbf16>
    %326 = vector.shape_cast %325 : vector<1x128x512xbf16> to vector<128x512xbf16>
    %cst_228 = arith.constant dense<0.000000e+00> : vector<1x512xf32>
    %327 = tpu.matmul %324, %326, %cst_228 {dimension_numbers = #tpu.dot_dimension_numbers<[1], [0], [0], [1], [0, 0, 1, 1], [], []>} : vector<1x128xbf16>, vector<128x512xbf16>, vector<1x512xf32> -> vector<1x512xf32>
    %328 = arith.addf %318, %327 : vector<1x512xf32>
    %329 = vector.extract_strided_slice %298 {offsets = [6, 0], sizes = [1, 128], strides = [1, 1]} : vector<8x128xf32> to vector<1x128xf32>
    %330 = vector.extract_strided_slice %298 {offsets = [7, 0], sizes = [1, 128], strides = [1, 1]} : vector<8x128xf32> to vector<1x128xf32>
    %331 = arith.maximumf %329, %330 : vector<1x128xf32>
    %cst_229 = arith.constant 0.000000e+00 : f32
    %332 = vector.broadcast %cst_229 : f32 to vector<1x128xf32>
    %333 = arith.maximumf %331, %332 : vector<1x128xf32>
    %334 = arith.truncf %333 : vector<1x128xf32> to vector<1x128xbf16>
    %c11_230 = arith.constant 11 : index
    %c0_231 = arith.constant 0 : index
    %c0_232 = arith.constant 0 : index
    %335 = vector.load %arg6[%c11_230, %c0_231, %c0_232] : memref<16x128x512xbf16, #tpu.memory_space<vmem>>, vector<1x128x512xbf16>
    %336 = vector.shape_cast %335 : vector<1x128x512xbf16> to vector<128x512xbf16>
    %cst_233 = arith.constant dense<0.000000e+00> : vector<1x512xf32>
    %337 = tpu.matmul %334, %336, %cst_233 {dimension_numbers = #tpu.dot_dimension_numbers<[1], [0], [0], [1], [0, 0, 1, 1], [], []>} : vector<1x128xbf16>, vector<128x512xbf16>, vector<1x512xf32> -> vector<1x512xf32>
    %338 = arith.addf %328, %337 : vector<1x512xf32>
    %339 = vector.extract_strided_slice %202 {offsets = [6, 0, 0], sizes = [1, 8, 128], strides = [1, 1, 1]} : vector<8x8x128xf32> to vector<1x8x128xf32>
    %340 = vector.shape_cast %339 : vector<1x8x128xf32> to vector<8x128xf32>
    %341 = vector.extract_strided_slice %202 {offsets = [7, 0, 0], sizes = [1, 8, 128], strides = [1, 1, 1]} : vector<8x8x128xf32> to vector<1x8x128xf32>
    %342 = vector.shape_cast %341 : vector<1x8x128xf32> to vector<8x128xf32>
    %343 = arith.maximumf %340, %342 : vector<8x128xf32>
    %344 = vector.extract_strided_slice %343 {offsets = [0, 0], sizes = [1, 128], strides = [1, 1]} : vector<8x128xf32> to vector<1x128xf32>
    %345 = vector.extract_strided_slice %343 {offsets = [1, 0], sizes = [1, 128], strides = [1, 1]} : vector<8x128xf32> to vector<1x128xf32>
    %346 = arith.maximumf %344, %345 : vector<1x128xf32>
    %cst_234 = arith.constant 0.000000e+00 : f32
    %347 = vector.broadcast %cst_234 : f32 to vector<1x128xf32>
    %348 = arith.maximumf %346, %347 : vector<1x128xf32>
    %349 = arith.truncf %348 : vector<1x128xf32> to vector<1x128xbf16>
    %c12_235 = arith.constant 12 : index
    %c0_236 = arith.constant 0 : index
    %c0_237 = arith.constant 0 : index
    %350 = vector.load %arg6[%c12_235, %c0_236, %c0_237] : memref<16x128x512xbf16, #tpu.memory_space<vmem>>, vector<1x128x512xbf16>
    %351 = vector.shape_cast %350 : vector<1x128x512xbf16> to vector<128x512xbf16>
    %cst_238 = arith.constant dense<0.000000e+00> : vector<1x512xf32>
    %352 = tpu.matmul %349, %351, %cst_238 {dimension_numbers = #tpu.dot_dimension_numbers<[1], [0], [0], [1], [0, 0, 1, 1], [], []>} : vector<1x128xbf16>, vector<128x512xbf16>, vector<1x512xf32> -> vector<1x512xf32>
    %353 = arith.addf %338, %352 : vector<1x512xf32>
    %354 = vector.extract_strided_slice %343 {offsets = [2, 0], sizes = [1, 128], strides = [1, 1]} : vector<8x128xf32> to vector<1x128xf32>
    %355 = vector.extract_strided_slice %343 {offsets = [3, 0], sizes = [1, 128], strides = [1, 1]} : vector<8x128xf32> to vector<1x128xf32>
    %356 = arith.maximumf %354, %355 : vector<1x128xf32>
    %cst_239 = arith.constant 0.000000e+00 : f32
    %357 = vector.broadcast %cst_239 : f32 to vector<1x128xf32>
    %358 = arith.maximumf %356, %357 : vector<1x128xf32>
    %359 = arith.truncf %358 : vector<1x128xf32> to vector<1x128xbf16>
    %c13_240 = arith.constant 13 : index
    %c0_241 = arith.constant 0 : index
    %c0_242 = arith.constant 0 : index
    %360 = vector.load %arg6[%c13_240, %c0_241, %c0_242] : memref<16x128x512xbf16, #tpu.memory_space<vmem>>, vector<1x128x512xbf16>
    %361 = vector.shape_cast %360 : vector<1x128x512xbf16> to vector<128x512xbf16>
    %cst_243 = arith.constant dense<0.000000e+00> : vector<1x512xf32>
    %362 = tpu.matmul %359, %361, %cst_243 {dimension_numbers = #tpu.dot_dimension_numbers<[1], [0], [0], [1], [0, 0, 1, 1], [], []>} : vector<1x128xbf16>, vector<128x512xbf16>, vector<1x512xf32> -> vector<1x512xf32>
    %363 = arith.addf %353, %362 : vector<1x512xf32>
    %364 = vector.extract_strided_slice %343 {offsets = [4, 0], sizes = [1, 128], strides = [1, 1]} : vector<8x128xf32> to vector<1x128xf32>
    %365 = vector.extract_strided_slice %343 {offsets = [5, 0], sizes = [1, 128], strides = [1, 1]} : vector<8x128xf32> to vector<1x128xf32>
    %366 = arith.maximumf %364, %365 : vector<1x128xf32>
    %cst_244 = arith.constant 0.000000e+00 : f32
    %367 = vector.broadcast %cst_244 : f32 to vector<1x128xf32>
    %368 = arith.maximumf %366, %367 : vector<1x128xf32>
    %369 = arith.truncf %368 : vector<1x128xf32> to vector<1x128xbf16>
    %c14_245 = arith.constant 14 : index
    %c0_246 = arith.constant 0 : index
    %c0_247 = arith.constant 0 : index
    %370 = vector.load %arg6[%c14_245, %c0_246, %c0_247] : memref<16x128x512xbf16, #tpu.memory_space<vmem>>, vector<1x128x512xbf16>
    %371 = vector.shape_cast %370 : vector<1x128x512xbf16> to vector<128x512xbf16>
    %cst_248 = arith.constant dense<0.000000e+00> : vector<1x512xf32>
    %372 = tpu.matmul %369, %371, %cst_248 {dimension_numbers = #tpu.dot_dimension_numbers<[1], [0], [0], [1], [0, 0, 1, 1], [], []>} : vector<1x128xbf16>, vector<128x512xbf16>, vector<1x512xf32> -> vector<1x512xf32>
    %373 = arith.addf %363, %372 : vector<1x512xf32>
    %374 = vector.extract_strided_slice %343 {offsets = [6, 0], sizes = [1, 128], strides = [1, 1]} : vector<8x128xf32> to vector<1x128xf32>
    %375 = vector.extract_strided_slice %343 {offsets = [7, 0], sizes = [1, 128], strides = [1, 1]} : vector<8x128xf32> to vector<1x128xf32>
    %376 = arith.maximumf %374, %375 : vector<1x128xf32>
    %cst_249 = arith.constant 0.000000e+00 : f32
    %377 = vector.broadcast %cst_249 : f32 to vector<1x128xf32>
    %378 = arith.maximumf %376, %377 : vector<1x128xf32>
    %379 = arith.truncf %378 : vector<1x128xf32> to vector<1x128xbf16>
    %c15_250 = arith.constant 15 : index
    %c0_251 = arith.constant 0 : index
    %c0_252 = arith.constant 0 : index
    %380 = vector.load %arg6[%c15_250, %c0_251, %c0_252] : memref<16x128x512xbf16, #tpu.memory_space<vmem>>, vector<1x128x512xbf16>
    %381 = vector.shape_cast %380 : vector<1x128x512xbf16> to vector<128x512xbf16>
    %cst_253 = arith.constant dense<0.000000e+00> : vector<1x512xf32>
    %382 = tpu.matmul %379, %381, %cst_253 {dimension_numbers = #tpu.dot_dimension_numbers<[1], [0], [0], [1], [0, 0, 1, 1], [], []>} : vector<1x128xbf16>, vector<128x512xbf16>, vector<1x512xf32> -> vector<1x512xf32>
    %383 = arith.addf %373, %382 : vector<1x512xf32>
    %c0_254 = arith.constant 0 : index
    %c0_255 = arith.constant 0 : index
    %384 = vector.load %arg7[%c0_254, %c0_255] : memref<1x512xf32, #tpu.memory_space<vmem>>, vector<1x512xf32>
    %385 = arith.addf %383, %384 : vector<1x512xf32>
    %cst_256 = arith.constant 0.000000e+00 : f32
    %386 = vector.broadcast %cst_256 : f32 to vector<1x512xf32>
    %387 = arith.maximumf %385, %386 : vector<1x512xf32>
    %388 = arith.truncf %387 : vector<1x512xf32> to vector<1x512xbf16>
    %c0_257 = arith.constant 0 : index
    %c0_258 = arith.constant 0 : index
    %389 = vector.load %arg8[%c0_257, %c0_258] : memref<512x128xbf16, #tpu.memory_space<vmem>>, vector<512x128xbf16>
    %cst_259 = arith.constant dense<0.000000e+00> : vector<1x128xf32>
    %390 = tpu.matmul %388, %389, %cst_259 {dimension_numbers = #tpu.dot_dimension_numbers<[1], [0], [0], [1], [0, 0, 1, 1], [], []>} : vector<1x512xbf16>, vector<512x128xbf16>, vector<1x128xf32> -> vector<1x128xf32>
    %c0_260 = arith.constant 0 : index
    %c0_261 = arith.constant 0 : index
    %391 = vector.load %arg9[%c0_260, %c0_261] : memref<1x128xf32, #tpu.memory_space<vmem>>, vector<1x128xf32>
    %392 = arith.addf %390, %391 : vector<1x128xf32>
    %393 = vector.shape_cast %392 : vector<1x128xf32> to vector<1x128xf32>
    %394 = vector.broadcast %393 : vector<1x128xf32> to vector<8x128xf32>
    %c0_262 = arith.constant 0 : index
    %c0_263 = arith.constant 0 : index
    %c0_264 = arith.constant 0 : index
    %395 = vector.load %arg10[%c0_262, %c0_263, %c0_264] : memref<1x8x128xf32, #tpu.memory_space<vmem>>, vector<1x8x128xf32>
    %396 = vector.shape_cast %395 : vector<1x8x128xf32> to vector<8x128xf32>
    %397 = vector.shape_cast %394 : vector<8x128xf32> to vector<1x8x128xf32>
    tpu.vector_store %arg10[%c0_262, %c0_263, %c0_264], %397 {strides = array<i32>} : memref<1x8x128xf32, #tpu.memory_space<vmem>>, vector<1x8x128xf32>,
    return
  }
  func.func @transform_0(%arg0: i32) -> (i32, i32, i32) {
    %c0_i32 = arith.constant 0 : i32
    %c0_i32_0 = arith.constant 0 : i32
    %c0_i32_1 = arith.constant 0 : i32
    return %arg0, %c0_i32, %c0_i32_0 : i32, i32, i32
  }
  func.func @transform_1(%arg0: i32) -> (i32, i32) {
    %c0_i32 = arith.constant 0 : i32
    %c0_i32_0 = arith.constant 0 : i32
    %c0_i32_1 = arith.constant 0 : i32
    return %c0_i32, %c0_i32_0 : i32, i32
  }
  func.func @transform_2(%arg0: i32) -> (i32, i32) {
    %c0_i32 = arith.constant 0 : i32
    %c0_i32_0 = arith.constant 0 : i32
    %c0_i32_1 = arith.constant 0 : i32
    return %c0_i32, %c0_i32_0 : i32, i32
  }
  func.func @transform_3(%arg0: i32) -> (i32, i32, i32) {
    %c0_i32 = arith.constant 0 : i32
    %c0_i32_0 = arith.constant 0 : i32
    %c0_i32_1 = arith.constant 0 : i32
    %c0_i32_2 = arith.constant 0 : i32
    return %c0_i32, %c0_i32_0, %c0_i32_1 : i32, i32, i32
  }
  func.func @transform_4(%arg0: i32) -> (i32, i32) {
    %c0_i32 = arith.constant 0 : i32
    %c0_i32_0 = arith.constant 0 : i32
    %c0_i32_1 = arith.constant 0 : i32
    return %c0_i32, %c0_i32_0 : i32, i32
  }
  func.func @transform_5(%arg0: i32) -> (i32, i32, i32) {
    %c0_i32 = arith.constant 0 : i32
    %c0_i32_0 = arith.constant 0 : i32
    %c0_i32_1 = arith.constant 0 : i32
    %c0_i32_2 = arith.constant 0 : i32
    return %c0_i32, %c0_i32_0, %c0_i32_1 : i32, i32, i32
  }
  func.func @transform_6(%arg0: i32) -> (i32, i32) {
    %c0_i32 = arith.constant 0 : i32
    %c0_i32_0 = arith.constant 0 : i32
    %c0_i32_1 = arith.constant 0 : i32
    return %c0_i32, %c0_i32_0 : i32, i32
  }
  func.func @transform_7(%arg0: i32) -> (i32, i32) {
    %c0_i32 = arith.constant 0 : i32
    %c0_i32_0 = arith.constant 0 : i32
    %c0_i32_1 = arith.constant 0 : i32
    return %c0_i32, %c0_i32_0 : i32, i32
  }
  func.func @transform_8(%arg0: i32) -> (i32, i32) {
    %c0_i32 = arith.constant 0 : i32
    %c0_i32_0 = arith.constant 0 : i32
    %c0_i32_1 = arith.constant 0 : i32
    return %c0_i32, %c0_i32_0 : i32, i32
  }
  func.func @transform_9(%arg0: i32) -> (i32, i32, i32) {
    %c0_i32 = arith.constant 0 : i32
    %c0_i32_0 = arith.constant 0 : i32
    %c0_i32_1 = arith.constant 0 : i32
    return %arg0, %c0_i32, %c0_i32_0 : i32, i32, i32
  }
}

</mosaic_0001>

<bundles_post_ra>
// kernel: numnet_forward.1
= control target key start
LH: loop header
LB: loop body
LE: loop exit
PB: predicated region body
PF: predicated region fallthrough
CT: control target
= control target key end

     0   :  { %s14363_s30 = smov 0   ;;  %s17506_s0 = inlined_call_operand.vmem [shape: bf16[2,768,25], index: 0, kind: input, shape index: {}]   ;;  %s17507_s1 = inlined_call_operand.vmem [shape: bf16[25,128], index: 1, kind: input, shape index: {}]   ;;  %s17508_s2 = inlined_call_operand.vmem [shape: f32[1,128], index: 2, kind: input, shape index: {}]   ;;  %s17509_s3 = inlined_call_operand.vmem [shape: bf16[25,128,128], index: 3, kind: input, shape index: {}]   ;;  %s17510_s4 = inlined_call_operand.vmem [shape: f32[1,128], index: 4, kind: input, shape index: {}]   ;;  %s17511_s5 = inlined_call_operand.vmem [shape: bf16[16,128,512], index: 5, kind: input, shape index: {}]   ;;  %s17512_s6 = inlined_call_operand.vmem [shape: f32[1,512], index: 6, kind: input, shape index: {}]   ;;  %s17513_s7 = inlined_call_operand.vmem [shape: bf16[512,128], index: 7, kind: input, shape index: {}]   ;;  %s17514_s8 = inlined_call_operand.vmem [shape: f32[1,128], index: 8, kind: input, shape index: {}]   ;;  %s17515_s9 = inlined_call_operand.vmem [shape: f32[2,8,128], index: 9, kind: output, shape index: {}]  }
   0x1 LB: > { %s10194_s10 = sadd.s32 4294967295, %s14309_s30   ;;  %p10198_p0 = scmp.ge.s32.totalorder %s14309_s30, 1  ;;  %s14309_s30 = sphi %s14363_s30, %s19_s30  }
   0x2   : > { %p287_p1 = scmp.lt.s32.totalorder %s14309_s30, 3 }
   0x4   : > { %p288_p2 = pnand %p10198_p0, %p287_p1 }
   0x6   : > { %291 = sbr.rel (%p288_p2) target bundleno = 2631 (0xa47), region = 56 }
   0xd   : > { %v13230_v0 = vld [vmem:[%s17507_s1] sm:$0xff]   ;;  %vm468_vm0 = vcmask 1043456   ;;  %v13231_v1 = vld [vmem:[%s17507_s1 + $0x8] sm:$0x1f]   ;;  %vm469_vm1 = vcmask 1044480   ;;  %p322_p3 = scmp.lt.s32.totalorder %s10194_s10, 1 }
   0xe   : > { %12311 = vmatprep.subr.bf16.mxu0 %v13230_v0  ;;  %13023 = vmatprep.subr.bf16.mxu1 %v13230_v0  ;;  %vm431_vm2 = vcmask 203776   ;;  %v14311_v2 = vmov 65535   ;;  %v13280_v54 = vld [vmem:[%s17509_s3 + $0x40] sm:$0xff]   ;;  %v13281_v55 = vld [vmem:[%s17509_s3 + $0x48] sm:$0xff]   ;;  %v13282_v56 = vld [vmem:[%s17509_s3 + $0x50] sm:$0xff]  }
   0xf   : > { %12312 = vmatpush3.bf16.msra.mxu0 %v13230_v0  ;;  %13025 = vmatpush3.bf16.msra.mxu1 %v13230_v0  ;;  %v470_v3 = vsel %vm468_vm0, 4294967295, %v14311_v2  ;;  %s17550_s10 = smov (!%p322_p3, %s10194_s10), 1  ;;  %v13283_v57 = vld [vmem:[%s17509_s3 + $0x58] sm:$0xff]   ;;  %v13284_v58 = vld [vmem:[%s17509_s3 + $0x60] sm:$0xff]   ;;  %v13285_v59 = vld [vmem:[%s17509_s3 + $0x68] sm:$0xff]  }
  0x10   : > { %v471_v4 = vsel %vm469_vm1, %v470_v3, 0  ;;  %s13219_s15 = smul.u32 384, %s17550_s10  ;;  %v13286_v60 = vld [vmem:[%s17509_s3 + $0x70] sm:$0xff]   ;;  %v13287_v61 = vld [vmem:[%s17509_s3 + $0x78] sm:$0xff]   ;;  %v13288_v62 = vld [vmem:[%s17509_s3] sm:$0xff]   ;;  %s10200_s16 = sshll.u32 %s17550_s10, 3 }
  0x11   : > { %v473_v5 = vand.u32 %v13231_v1, %v471_v4  ;;  %s330_s19 = scalar_lea.vmem %s17515_s9, %s10200_s16 }
  0x12   : > { %s14383_s18 = scalar_lea.vmem %s17506_s0, %s13219_s15 }
  0x13   : > { %12313 = vmatprep.subr.bf16.mxu0 %v473_v5  ;;  %13024 = vmatprep.subr.bf16.mxu1 %v473_v5  ;;  %v13232_v6 = vld [vmem:[%s14383_s18] sm:$0xff]   ;;  %v13234_v8 = vld [vmem:[%s14383_s18 + $0x8] sm:$0xff]   ;;  %v13236_v10 = vld [vmem:[%s14383_s18 + $0x10] sm:$0xff]  }
  0x14   : > { %12314 = vmatpush3.bf16.msra.mxu0 %v473_v5  ;;  %13026 = vmatpush3.bf16.msra.mxu1 %v473_v5  ;;  %v13233_v7 = vld [vmem:[%s14383_s18 + $0x40] sm:$0xff]   ;;  %v13235_v9 = vld [vmem:[%s14383_s18 + $0x48] sm:$0xff]   ;;  %v13237_v11 = vld [vmem:[%s14383_s18 + $0x50] sm:$0xff]  }
  0x15   : > { %12339 = vmatprep.subr.bf16.mxu1 %v13230_v0  ;;  %12367 = vmatprep.subr.bf16.mxu0 %v13230_v0  ;;  %v13238_v12 = vld [vmem:[%s14383_s18 + $0x18] sm:$0xff]   ;;  %v13240_v14 = vld [vmem:[%s14383_s18 + $0x20] sm:$0xff]   ;;  %v13242_v16 = vld [vmem:[%s14383_s18 + $0x28] sm:$0xff]  }
  0x16   : > { %12315 = vmatprep.mubr.msk.bf16.mxu0 %vm431_vm2, %v13232_v6  ;;  %12331 = vmatprep.mubr.msk.bf16.mxu1 %vm431_vm2, %v13233_v7  ;;  %v13239_v13 = vld [vmem:[%s14383_s18 + $0x58] sm:$0xff]   ;;  %v13241_v15 = vld [vmem:[%s14383_s18 + $0x60] sm:$0xff]   ;;  %v13243_v17 = vld [vmem:[%s14383_s18 + $0x68] sm:$0xff]  }
  0x17   : > { %12316 = vmatmul.mubr.msk.bf16.vlgmr.msra.gmra.mrb[0].mxu0 %vm431_vm2, %v13234_v8  ;;  %12332 = vmatmul.mubr.msk.bf16.vlgmr.msra.gmra.mrb[0].mxu1 %vm431_vm2, %v13235_v9  ;;  %v13244_v18 = vld [vmem:[%s14383_s18 + $0x30] sm:$0xff]   ;;  %v13246_v20 = vld [vmem:[%s14383_s18 + $0x38] sm:$0xff]   ;;  %v13249_v22 = vld [vmem:[%s14383_s18 + $0xc0] sm:$0xff]  }
  0x18   : > { %12368 = vmatpush3.bf16.msra.mxu0 %v13230_v0  ;;  %12340 = vmatpush3.bf16.msra.mxu1 %v13230_v0  ;;  %v13245_v19 = vld [vmem:[%s14383_s18 + $0x70] sm:$0xff]   ;;  %v13247_v21 = vld [vmem:[%s14383_s18 + $0x78] sm:$0xff]   ;;  %v13248_v23 = vld [vmem:[%s14383_s18 + $0x80] sm:$0xff]  }
  0x19   : > { %12319 = vmatprep.mubr.msk.bf16.mxu0 %vm431_vm2, %v13236_v10  ;;  %12335 = vmatprep.mubr.msk.bf16.mxu1 %vm431_vm2, %v13237_v11  ;;  %v13250_v24 = vld [vmem:[%s14383_s18 + $0x88] sm:$0xff]   ;;  %v13253_v26 = vld [vmem:[%s14383_s18 + $0xd0] sm:$0xff]   ;;  %v13254_v28 = vld [vmem:[%s14383_s18 + $0x98] sm:$0xff]  }
  0x1a   : > { %12341 = vmatprep.subr.bf16.mxu1 %v473_v5  ;;  %12369 = vmatprep.subr.bf16.mxu0 %v473_v5  ;;  %v13251_v25 = vld [vmem:[%s14383_s18 + $0xc8] sm:$0xff]   ;;  %v13252_v27 = vld [vmem:[%s14383_s18 + $0x90] sm:$0xff]   ;;  %v13255_v29 = vld [vmem:[%s14383_s18 + $0xd8] sm:$0xff]  }
  0x1b   : > { %v13257_v30 = vld [vmem:[%s14383_s18 + $0xe0] sm:$0xff]   ;;  %v13259_v32 = vld [vmem:[%s14383_s18 + $0xe8] sm:$0xff]   ;;  %v13261_v34 = vld [vmem:[%s14383_s18 + $0xf0] sm:$0xff]  }
  0x1c   : > { %12370 = vmatpush3.bf16.msra.mxu0 %v473_v5  ;;  %12342 = vmatpush3.bf16.msra.mxu1 %v473_v5  ;;  %v13256_v31 = vld [vmem:[%s14383_s18 + $0xa0] sm:$0xff]   ;;  %v13258_v33 = vld [vmem:[%s14383_s18 + $0xa8] sm:$0xff]   ;;  %v13260_v35 = vld [vmem:[%s14383_s18 + $0xb0] sm:$0xff]  }
  0x1d   : > { %12395 = vmatprep.subr.bf16.mxu1 %v13230_v0  ;;  %v13263_v36 = vld [vmem:[%s14383_s18 + $0xf8] sm:$0xff]   ;;  %v13264_v38 = vld [vmem:[%s14383_s18 + $0x100] sm:$0xff]   ;;  %v13266_v40 = vld [vmem:[%s14383_s18 + $0x108] sm:$0xff]   ;;  %12423 = vmatprep.subr.bf16.mxu0 %v13280_v54 }
  0x1e   : > { %v13262_v37 = vld [vmem:[%s14383_s18 + $0xb8] sm:$0xff]   ;;  %v13265_v39 = vld [vmem:[%s14383_s18 + $0x120] sm:$0xff]   ;;  %v13267_v41 = vld [vmem:[%s14383_s18 + $0x128] sm:$0xff]  }
  0x1f   : > { %12320 = vmatmul.mubr.msk.bf16.gmra.mrb[4].mxu0 %vm431_vm2, %v13238_v12  ;;  %12336 = vmatmul.mubr.msk.bf16.gmra.mrb[4].mxu1 %vm431_vm2, %v13239_v13  ;;  %v13268_v42 = vld [vmem:[%s14383_s18 + $0x110] sm:$0xff]   ;;  %v13270_v44 = vld [vmem:[%s14383_s18 + $0x118] sm:$0xff]   ;;  %v13272_v46 = vld [vmem:[%s14383_s18 + $0x140] sm:$0xff]  }
  0x20   : > { %12323 = vmatprep.mubr.msk.bf16.mxu0 %vm431_vm2, %v13240_v14  ;;  %12343 = vmatprep.mubr.msk.bf16.mxu1 %vm431_vm2, %v13241_v15  ;;  %v13269_v43 = vld [vmem:[%s14383_s18 + $0x130] sm:$0xff]   ;;  %v13271_v45 = vld [vmem:[%s14383_s18 + $0x138] sm:$0xff]   ;;  %v13273_v47 = vld [vmem:[%s14383_s18 + $0x148] sm:$0xff]  }
  0x21   : > { %v13274_v48 = vld [vmem:[%s14383_s18 + $0x150] sm:$0xff]   ;;  %v13275_v49 = vld [vmem:[%s14383_s18 + $0x158] sm:$0xff]   ;;  %v13276_v50 = vld [vmem:[%s14383_s18 + $0x160] sm:$0xff]  }
  0x22   : > { %v13277_v51 = vld [vmem:[%s14383_s18 + $0x168] sm:$0xff]   ;;  %v13278_v52 = vld [vmem:[%s14383_s18 + $0x170] sm:$0xff]   ;;  %v13279_v53 = vld [vmem:[%s14383_s18 + $0x178] sm:$0xff]  }
  0x27   : > { %12324 = vmatmul.mubr.msk.bf16.gmra.mrb[8].mxu0 %vm431_vm2, %v13242_v16  ;;  %12344 = vmatmul.mubr.msk.bf16.vlgmr.msra.gmra.mrb[8].mxu1 %vm431_vm2, %v13243_v17 }
  0x28   : > { %12327 = vmatprep.mubr.msk.bf16.mxu0 %vm431_vm2, %v13244_v18  ;;  %12396 = vmatpush3.bf16.msra.mxu1 %v13230_v0 }
  0x29   : > { %12347 = vmatprep.mubr.msk.bf16.mxu1 %vm431_vm2, %v13245_v19  ;;  %12397 = vmatprep.subr.bf16.mxu1 %v473_v5 }
  0x2c   : > { %12398 = vmatpush3.bf16.msra.mxu1 %v473_v5 }
  0x2f   : > { %12328 = vmatmul.mubr.msk.bf16.gmra.mrb[12].mxu0 %vm431_vm2, %v13246_v20  ;;  %12348 = vmatmul.mubr.msk.bf16.gmra.mrb[12].mxu1 %vm431_vm2, %v13247_v21 }
  0x30   : > { %12371 = vmatprep.mubr.msk.bf16.mxu0 %vm431_vm2, %v13249_v22  ;;  %12351 = vmatprep.mubr.msk.bf16.mxu1 %vm431_vm2, %v13248_v23 }
  0x37   : > { %12372 = vmatmul.mubr.msk.bf16.vlgmr.msra.gmra.mrb[16].mxu0 %vm431_vm2, %v13251_v25  ;;  %12352 = vmatmul.mubr.msk.bf16.gmra.mrb[16].mxu1 %vm431_vm2, %v13250_v24 }
  0x38   : > { %12375 = vmatprep.mubr.msk.bf16.mxu0 %vm431_vm2, %v13253_v26  ;;  %12355 = vmatprep.mubr.msk.bf16.mxu1 %vm431_vm2, %v13252_v27 }
  0x39   : > { %12424 = vmatpush3.bf16.msra.mxu0 %v13280_v54 }
  0x3a   : > { %12425 = vmatprep.subr.bf16.mxu0 %v13281_v55 }
  0x3d   : > { %12426 = vmatpush3.bf16.msra.mxu0 %v13281_v55 }
  0x3e   : > { %12427 = vmatprep.subr.bf16.mxu0 %v13282_v56 }
  0x3f   : > { %12376 = vmatmul.mubr.msk.bf16.gmra.mrb[20].mxu0 %vm431_vm2, %v13255_v29  ;;  %12356 = vmatmul.mubr.msk.bf16.gmra.mrb[20].mxu1 %vm431_vm2, %v13254_v28 }
  0x40   : > { %12379 = vmatprep.mubr.msk.bf16.mxu0 %vm431_vm2, %v13257_v30  ;;  %12359 = vmatprep.mubr.msk.bf16.mxu1 %vm431_vm2, %v13256_v31 }
  0x41   : > { %12428 = vmatpush3.bf16.msra.mxu0 %v13282_v56 }
  0x42   : > { %12429 = vmatprep.subr.bf16.mxu0 %v13283_v57 }
  0x45   : > { %12430 = vmatpush3.bf16.msra.mxu0 %v13283_v57 }
  0x46   : > { %12431 = vmatprep.subr.bf16.mxu0 %v13284_v58 }
  0x47   : > { %12380 = vmatmul.mubr.msk.bf16.gmra.mrb[24].mxu0 %vm431_vm2, %v13259_v32  ;;  %12360 = vmatmul.mubr.msk.bf16.gmra.mrb[24].mxu1 %vm431_vm2, %v13258_v33 }
  0x48   : > { %12383 = vmatprep.mubr.msk.bf16.mxu0 %vm431_vm2, %v13261_v34  ;;  %12363 = vmatprep.mubr.msk.bf16.mxu1 %vm431_vm2, %v13260_v35 }
  0x49   : > { %12432 = vmatpush3.bf16.msra.mxu0 %v13284_v58 }
  0x4a   : > { %12433 = vmatprep.subr.bf16.mxu0 %v13285_v59 }
  0x4d   : > { %12434 = vmatpush3.bf16.msra.mxu0 %v13285_v59 }
  0x4e   : > { %12435 = vmatprep.subr.bf16.mxu0 %v13286_v60 }
  0x4f   : > { %12384 = vmatmul.mubr.msk.bf16.gmra.mrb[28].mxu0 %vm431_vm2, %v13263_v36  ;;  %12364 = vmatmul.mubr.msk.bf16.gmra.mrb[28].mxu1 %vm431_vm2, %v13262_v37 }
  0x50   : > { %12387 = vmatprep.mubr.msk.bf16.mxu0 %vm431_vm2, %v13264_v38  ;;  %12399 = vmatprep.mubr.msk.bf16.mxu1 %vm431_vm2, %v13265_v39 }
  0x51   : > { %12436 = vmatpush3.bf16.msra.mxu0 %v13286_v60 }
  0x52   : > { %12437 = vmatprep.subr.bf16.mxu0 %v13287_v61 }
  0x55   : > { %12438 = vmatpush3.bf16.msra.mxu0 %v13287_v61 }
  0x56   : > { %12447 = vmatprep.subr.bf16.mxu0 %v13288_v62 }
  0x57   : > { %12388 = vmatmul.mubr.msk.bf16.gmra.mrb[32].mxu0 %vm431_vm2, %v13266_v40  ;;  %12400 = vmatmul.mubr.msk.bf16.vlgmr.msra.gmra.mrb[32].mxu1 %vm431_vm2, %v13267_v41 }
  0x58   : > { %12391 = vmatprep.mubr.msk.bf16.mxu0 %vm431_vm2, %v13268_v42  ;;  %12403 = vmatprep.mubr.msk.bf16.mxu1 %vm431_vm2, %v13269_v43 }
  0x5f   : > { %12392 = vmatmul.mubr.msk.bf16.gmra.mrb[36].mxu0 %vm431_vm2, %v13270_v44  ;;  %12404 = vmatmul.mubr.msk.bf16.gmra.mrb[36].mxu1 %vm431_vm2, %v13271_v45 }
  0x60   : > { %12407 = vmatprep.mubr.msk.bf16.mxu1 %vm431_vm2, %v13272_v46 }
  0x67   : > { %12408 = vmatmul.mubr.msk.bf16.gmra.mrb[40].mxu1 %vm431_vm2, %v13273_v47 }
  0x68   : > { %12411 = vmatprep.mubr.msk.bf16.mxu1 %vm431_vm2, %v13274_v48 }
  0x6f   : > { %12412 = vmatmul.mubr.msk.bf16.gmra.mrb[44].mxu1 %vm431_vm2, %v13275_v49 }
  0x70   : > { %12415 = vmatprep.mubr.msk.bf16.mxu1 %vm431_vm2, %v13276_v50 }
  0x77   : > { %12416 = vmatmul.mubr.msk.bf16.gmra.mrb[48].mxu1 %vm431_vm2, %v13277_v51 }
  0x78   : > { %12419 = vmatprep.mubr.msk.bf16.mxu1 %vm431_vm2, %v13278_v52 }
  0x7f   : > { %12420 = vmatmul.mubr.msk.bf16.gmra.mrb[52].mxu1 %vm431_vm2, %v13279_v53 }
  0xea   : > { %v12317_v63 = vpop.f32.mrb[0].mxu0  ;;  %v14508_v0 = vpop.f32.mrb[0].mxu1 }
  0xeb   : > { %v509_v1 = vpop.f32.mrb[1].mxu0  ;;  %v14510_v2 = vpop.f32.mrb[1].mxu1 }
  0xec   : > { %v12318_v3 = vpop.f32.mrb[2].mxu0  ;;  %v14512_v4 = vpop.f32.mrb[2].mxu1 }
  0xed   : > { %v512_v5 = vpop.f32.mrb[3].mxu0  ;;  %v14514_v6 = vpop.f32.mrb[3].mxu1 }
  0xf2   : > { %v12321_v7 = vpop.f32.mrb[4].mxu0  ;;  %v14516_v8 = vpop.f32.mrb[4].mxu1 }
  0xf3   : > { %v525_v9 = vpop.f32.mrb[5].mxu0  ;;  %v14518_v10 = vpop.f32.mrb[5].mxu1 }
  0xf4   : > { %v12322_v11 = vpop.f32.mrb[6].mxu0  ;;  %v14520_v12 = vpop.f32.mrb[6].mxu1 }
  0xf5   : > { %v528_v13 = vpop.f32.mrb[7].mxu0  ;;  %v14522_v14 = vpop.f32.mrb[7].mxu1 }
  0xfa   : > { %v12325_v15 = vpop.f32.mrb[8].mxu0  ;;  %v12345_v16 = vpop.f32.mrb[8].mxu1 }
  0xfb   : > { %v541_v17 = vpop.f32.mrb[9].mxu0  ;;  %v855_v18 = vmax.f32 %v12317_v63, %v12345_v16  ;;  %v758_v19 = vpop.f32.mrb[9].mxu1 }
  0xfc   : > { %v12326_v20 = vpop.f32.mrb[10].mxu0  ;;  %v853_v21 = vmax.f32 %v509_v1, %v758_v19  ;;  %v12346_v22 = vpop.f32.mrb[10].mxu1 }
  0xfd   : > { %v14524_v23 = vpop.f32.mrb[11].mxu0  ;;  %v856_v24 = vmax.f32 %v12318_v3, %v12346_v22  ;;  %v761_v25 = vpop.f32.mrb[11].mxu1 }
  0xfe   : > { %v854_v26 = vmax.f32 %v512_v5, %v761_v25 }
 0x102   : > { %v14526_v27 = vpop.f32.mrb[12].mxu0  ;;  %v12349_v28 = vpop.f32.mrb[12].mxu1 }
 0x103   : > { %v14528_v29 = vpop.f32.mrb[13].mxu0  ;;  %v859_v30 = vmax.f32 %v12321_v7, %v12349_v28  ;;  %v774_v31 = vpop.f32.mrb[13].mxu1 }
 0x104   : > { %v14530_v32 = vpop.f32.mrb[14].mxu0  ;;  %v857_v33 = vmax.f32 %v525_v9, %v774_v31  ;;  %v12350_v34 = vpop.f32.mrb[14].mxu1 }
 0x105   : > { %v14532_v35 = vpop.f32.mrb[15].mxu0  ;;  %v860_v36 = vmax.f32 %v12322_v11, %v12350_v34  ;;  %v777_v37 = vpop.f32.mrb[15].mxu1 }
 0x106   : > { %v858_v38 = vmax.f32 %v528_v13, %v777_v37 }
 0x10a   : > { %v12373_v39 = vpop.f32.mrb[16].mxu0  ;;  %v12353_v40 = vpop.f32.mrb[16].mxu1 }
 0x10b   : > { %v14534_v41 = vmax.f32 %v855_v18, %v12373_v39  ;;  %v1031_v42 = vpop.f32.mrb[17].mxu0  ;;  %v863_v43 = vmax.f32 %v12325_v15, %v12353_v40  ;;  %v790_v44 = vpop.f32.mrb[17].mxu1 }
 0x10c   : > { %v14536_v45 = vmax.f32 %v853_v21, %v1031_v42  ;;  %v12374_v46 = vpop.f32.mrb[18].mxu0  ;;  %v861_v47 = vmax.f32 %v541_v17, %v790_v44  ;;  %v12354_v48 = vpop.f32.mrb[18].mxu1 }
 0x10d   : > { %v14538_v49 = vmax.f32 %v856_v24, %v12374_v46  ;;  %v1034_v50 = vpop.f32.mrb[19].mxu0  ;;  %v864_v51 = vmax.f32 %v12326_v20, %v12354_v48  ;;  %v793_v52 = vpop.f32.mrb[19].mxu1 }
 0x10e   : > { %v14540_v53 = vmax.f32 %v854_v26, %v1034_v50  ;;  %v862_v54 = vmax.f32 %v14524_v23, %v793_v52 }
 0x112   : > { %v12377_v55 = vpop.f32.mrb[20].mxu0  ;;  %v12357_v56 = vpop.f32.mrb[20].mxu1 }
 0x113   : > { %v14543_v57 = vmax.f32 %v859_v30, %v12377_v55  ;;  %v1047_v58 = vpop.f32.mrb[21].mxu0  ;;  %v867_v59 = vmax.f32 %v14526_v27, %v12357_v56  ;;  %v806_v60 = vpop.f32.mrb[21].mxu1 }
 0x114   : > { %v14546_v61 = vmax.f32 %v857_v33, %v1047_v58  ;;  %v12378_v62 = vpop.f32.mrb[22].mxu0  ;;  %v865_v63 = vmax.f32 %v14528_v29, %v806_v60  ;;  %v12358_v1 = vpop.f32.mrb[22].mxu1 }
 0x115   : > { %v14549_v3 = vmax.f32 %v860_v36, %v12378_v62  ;;  %v1050_v5 = vpop.f32.mrb[23].mxu0  ;;  %v868_v7 = vmax.f32 %v14530_v32, %v12358_v1  ;;  %v809_v9 = vpop.f32.mrb[23].mxu1 }
 0x116   : > { %v14552_v11 = vmax.f32 %v858_v38, %v1050_v5  ;;  %v866_v13 = vmax.f32 %v14532_v35, %v809_v9 }
 0x11a   : > { %v12381_v15 = vpop.f32.mrb[24].mxu0  ;;  %v12361_v16 = vpop.f32.mrb[24].mxu1 }
 0x11b   : > { %v14555_v17 = vmax.f32 %v863_v43, %v12381_v15  ;;  %v1063_v18 = vpop.f32.mrb[25].mxu0  ;;  %v871_v19 = vmax.f32 %v14508_v0, %v12361_v16  ;;  %v822_v20 = vpop.f32.mrb[25].mxu1 }
 0x11c   : > { %v14558_v21 = vmax.f32 %v861_v47, %v1063_v18  ;;  %v12382_v22 = vpop.f32.mrb[26].mxu0  ;;  %v869_v23 = vmax.f32 %v14510_v2, %v822_v20  ;;  %v12362_v24 = vpop.f32.mrb[26].mxu1 }
 0x11d   : > { %v14561_v25 = vmax.f32 %v864_v51, %v12382_v22  ;;  %v1066_v26 = vpop.f32.mrb[27].mxu0  ;;  %v872_v27 = vmax.f32 %v14512_v4, %v12362_v24  ;;  %v825_v28 = vpop.f32.mrb[27].mxu1 }
 0x11e   : > { %v14564_v29 = vmax.f32 %v862_v54, %v1066_v26  ;;  %v870_v30 = vmax.f32 %v14514_v6, %v825_v28 }
 0x122   : > { %v12385_v31 = vpop.f32.mrb[28].mxu0  ;;  %v12365_v32 = vpop.f32.mrb[28].mxu1 }
 0x123   : > { %v14567_v0 = vmax.f32 %v867_v59, %v12385_v31  ;;  %v1079_v33 = vpop.f32.mrb[29].mxu0  ;;  %v875_v34 = vmax.f32 %v14516_v8, %v12365_v32  ;;  %v838_v35 = vpop.f32.mrb[29].mxu1  ;;  %v14582_v8 = vld [vmem:[%s17508_s2] ss:$0 sm:$0xff] }
 0x124   : > { %v14570_v2 = vmax.f32 %v865_v63, %v1079_v33  ;;  %v12386_v36 = vpop.f32.mrb[30].mxu0  ;;  %v873_v37 = vmax.f32 %v14518_v10, %v838_v35  ;;  %v12366_v38 = vpop.f32.mrb[30].mxu1 }
 0x125   : > { %v14573_v4 = vmax.f32 %v868_v7, %v12386_v36  ;;  %v1082_v39 = vpop.f32.mrb[31].mxu0  ;;  %v876_v40 = vmax.f32 %v14520_v12, %v12366_v38  ;;  %v841_v6 = vpop.f32.mrb[31].mxu1 }
 0x126   : > { %v14576_v42 = vmax.f32 %v866_v13, %v1082_v39  ;;  %v874_v43 = vmax.f32 %v14522_v14, %v841_v6 }
 0x12a   : > { %v12389_v44 = vpop.f32.mrb[32].mxu0  ;;  %v12401_v10 = vpop.f32.mrb[32].mxu1 }
 0x12b   : > { %v14584_v46 = vmax.f32 %v871_v19, %v12389_v44  ;;  %v1095_v47 = vpop.f32.mrb[33].mxu0  ;;  %v1401_v48 = vmax.f32 %v14534_v41, %v12401_v10  ;;  %v1304_v12 = vpop.f32.mrb[33].mxu1 }
 0x12c   : > { %v14587_v50 = vmax.f32 %v869_v23, %v1095_v47  ;;  %v12390_v51 = vpop.f32.mrb[34].mxu0  ;;  %v1399_v52 = vmax.f32 %v14536_v45, %v1304_v12  ;;  %v12402_v14 = vpop.f32.mrb[34].mxu1 }
 0x12d   : > { %v14590_v54 = vmax.f32 %v872_v27, %v12390_v51  ;;  %v1098_v55 = vpop.f32.mrb[35].mxu0  ;;  %v1432_v56 = vadd.f32 %v14582_v8, %v1401_v48  ;;  %v1402_v58 = vmax.f32 %v14538_v49, %v12402_v14  ;;  %v1307_v60 = vpop.f32.mrb[35].mxu1 }
 0x12e   : > { %v14594_v59 = vmax.f32 %v870_v30, %v1098_v55  ;;  %v1430_v62 = vadd.f32 %v14582_v8, %v1399_v52  ;;  %v1400_v41 = vmax.f32 %v14540_v53, %v1307_v60 }
 0x12f   : > { %v14598_v63 = vmax.f32 %v1432_v56, 0.0  ;;  %v1433_v1 = vadd.f32 %v14582_v8, %v1402_v58 }
 0x130   : > { %v1454_v45 = vmax.f32 %v1430_v62, 0.0  ;;  %v1431_v5 = vadd.f32 %v14582_v8, %v1400_v41 }
 0x131   : > { %1480 = vst [vmem:[#allocation2 + $0x10] sm:$0xff] %v14598_v63  ;;  %v1457_v7 = vmax.f32 %v1433_v1, 0.0 }
 0x132   : > { %v12393_v9 = vpop.f32.mrb[36].mxu0  ;;  %1478 = vst [vmem:[#allocation2] sm:$0xff] %v1454_v45  ;;  %v1455_v49 = vmax.f32 %v1431_v5, 0.0  ;;  %v12405_v15 = vpop.f32.mrb[36].mxu1  ;;  %v14606_v18 = vpack.c.bf16 %v14598_v63, %v1454_v45 }
 0x133   : > { %v14603_v13 = vmax.f32 %v875_v34, %v12393_v9  ;;  %v1111_v16 = vpop.f32.mrb[37].mxu0  ;;  %1481 = vst [vmem:[#allocation2 + $0x18] sm:$0xff] %v1457_v7  ;;  %v1405_v53 = vmax.f32 %v14543_v57, %v12405_v15  ;;  %v1320_v20 = vpop.f32.mrb[37].mxu1 }
 0x134   : > { %v14609_v19 = vmax.f32 %v873_v37, %v1111_v16  ;;  %v12394_v22 = vpop.f32.mrb[38].mxu0  ;;  %1479 = vst [vmem:[#allocation2 + $0x8] sm:$0xff] %v1455_v49  ;;  %v1403_v23 = vmax.f32 %v14546_v61, %v1320_v20  ;;  %v12406_v26 = vpop.f32.mrb[38].mxu1  ;;  %v13289_v20 = vld [vmem:[%s17509_s3 + $0x8] sm:$0xff]  }
 0x135   : > { %v14612_v24 = vmax.f32 %v876_v40, %v12394_v22  ;;  %v1114_v27 = vpop.f32.mrb[39].mxu0  ;;  %v1436_v28 = vadd.f32 %v14582_v8, %v1405_v53  ;;  %v1406_v30 = vmax.f32 %v14549_v3, %v12406_v26  ;;  %v1323_v32 = vpop.f32.mrb[39].mxu1 }
 0x136   : > { %v14616_v31 = vmax.f32 %v874_v43, %v1114_v27  ;;  %v1434_v57 = vadd.f32 %v14582_v8, %v1403_v23  ;;  %v1404_v33 = vmax.f32 %v14552_v11, %v1323_v32 }
 0x137   : > { %v14620_v34 = vmax.f32 %v1436_v28, 0.0  ;;  %v1437_v35 = vadd.f32 %v14582_v8, %v1406_v30 }
 0x138   : > { %v14623_v61 = vmax.f32 %v1434_v57, 0.0  ;;  %v1435_v36 = vadd.f32 %v14582_v8, %v1404_v33 }
 0x139   : > { %1484 = vst [vmem:[#allocation2 + $0x30] sm:$0xff] %v14620_v34  ;;  %v1461_v37 = vmax.f32 %v1437_v35, 0.0 }
 0x13a   : > { %1482 = vst [vmem:[#allocation2 + $0x20] sm:$0xff] %v14623_v61  ;;  %v1459_v3 = vmax.f32 %v1435_v36, 0.0  ;;  %v12409_v38 = vpop.f32.mrb[40].mxu1  ;;  %v14628_v39 = vld [vmem:[#allocation2 + $0x11] sm:$0xff] }
 0x13b   : > { %1485 = vst [vmem:[#allocation2 + $0x38] sm:$0xff] %v1461_v37  ;;  %v1409_v6 = vmax.f32 %v14555_v17, %v12409_v38  ;;  %v1336_v43 = vpop.f32.mrb[41].mxu1  ;;  %v1530_v44 = vld [vmem:[#allocation2 + $0x1] sm:$0xff]  ;;  %v14672_v27 = vld [vmem:[#allocation2 + $0x12] sm:$0xff] }
 0x13c   : > { %1483 = vst [vmem:[#allocation2 + $0x28] sm:$0xff] %v1459_v3  ;;  %v1407_v10 = vmax.f32 %v14558_v21, %v1336_v43  ;;  %v12410_v47 = vpop.f32.mrb[42].mxu1  ;;  %v1538_v48 = vpack.c.bf16 %v14628_v39, %v1530_v44  ;;  %v14674_v28 = vld [vmem:[#allocation2 + $0x13] sm:$0xff]  ;;  %v14280_v37 = vld [vmem:[%s17509_s3] sm:$0xff]  }
 0x13d   : > { %v1440_v12 = vadd.f32 %v14582_v8, %v1409_v6  ;;  %v1410_v51 = vmax.f32 %v14561_v25, %v12410_v47  ;;  %v1339_v52 = vpop.f32.mrb[43].mxu1  ;;  %v14680_v57 = vld [vmem:[#allocation2 + $0x14] sm:$0xff] }
 0x13e   : > { %v1438_v14 = vadd.f32 %v14582_v8, %v1407_v10  ;;  %v1408_v55 = vmax.f32 %v14564_v29, %v1339_v52  ;;  %12439 = vmatprep.mubr.bf16.mxu0 %v1538_v48  ;;  %v13290_v6 = vld [vmem:[%s17509_s3 + $0x10] sm:$0xff]  }
 0x13f   : > { %v14641_v56 = vmax.f32 %v1440_v12, 0.0  ;;  %v1441_v17 = vadd.f32 %v14582_v8, %v1410_v51 }
 0x140   : > { %v14644_v58 = vmax.f32 %v1438_v14, 0.0  ;;  %v1439_v21 = vadd.f32 %v14582_v8, %v1408_v55  ;;  %v14710_v52 = vld [vmem:[#allocation2 + $0x30] sm:$0xff] }
 0x141   : > { %1488 = vst [vmem:[#allocation2 + $0x50] sm:$0xff] %v14641_v56  ;;  %v1465_v60 = vmax.f32 %v1441_v17, 0.0 }
 0x142   : > { %1486 = vst [vmem:[#allocation2 + $0x40] sm:$0xff] %v14644_v58  ;;  %v1463_v25 = vmax.f32 %v1439_v21, 0.0  ;;  %v12413_v62 = vpop.f32.mrb[44].mxu1  ;;  %v14649_v41 = vld [vmem:[#allocation2 + $0x31] sm:$0xff] }
 0x143   : > { %1489 = vst [vmem:[#allocation2 + $0x58] sm:$0xff] %v1465_v60  ;;  %v1413_v45 = vmax.f32 %v14567_v0, %v12413_v62  ;;  %v1352_v5 = vpop.f32.mrb[45].mxu1  ;;  %v14656_v7 = vld [vmem:[#allocation2 + $0x21] sm:$0xff] }
 0x144   : > { %v14658_v9 = vld [vmem:[#allocation2 + $0x22] sm:$0xff]  ;;  %1487 = vst [vmem:[#allocation2 + $0x48] sm:$0xff] %v1463_v25  ;;  %v1411_v15 = vmax.f32 %v14570_v2, %v1352_v5  ;;  %v12414_v16 = vpop.f32.mrb[46].mxu1  ;;  %v1539_v53 = vpack.c.bf16 %v14649_v41, %v14656_v7 }
 0x145   : > { %v14660_v49 = vld [vmem:[#allocation2 + $0x23] sm:$0xff]  ;;  %v1444_v0 = vadd.f32 %v14582_v8, %v1413_v45  ;;  %v1414_v23 = vmax.f32 %v14573_v4, %v12414_v16  ;;  %v1355_v26 = vpop.f32.mrb[47].mxu1 }
 0x146   : > { %v14668_v22 = vld [vmem:[#allocation2 + $0x24] sm:$0xff]  ;;  %v1442_v30 = vadd.f32 %v14582_v8, %v1411_v15  ;;  %v1412_v32 = vmax.f32 %v14576_v42, %v1355_v26  ;;  %12440 = vmatmul.mubr.bf16.vlgmr.msra.gmra.mrb[40].mxu0 %v1539_v53 }
 0x147   : > { %v14686_v35 = vmax.f32 %v1444_v0, 0.0  ;;  %v1445_v36 = vadd.f32 %v14582_v8, %v1414_v23  ;;  %12448 = vmatpush3.bf16.msra.mxu0 %v14280_v37  ;;  %v14731_v0 = vld [vmem:[#allocation2 + $0x32] sm:$0xff] }
 0x148   : > { %v14694_v3 = vmax.f32 %v1442_v30, 0.0  ;;  %v1443_v38 = vadd.f32 %v14582_v8, %v1412_v32  ;;  %12449 = vmatprep.subr.bf16.mxu0 %v13289_v20  ;;  %v14733_v23 = vld [vmem:[#allocation2 + $0x33] sm:$0xff] }
 0x149   : > { %1492 = vst [vmem:[#allocation2 + $0x70] sm:$0xff] %v14686_v35  ;;  %v1469_v43 = vmax.f32 %v1445_v36, 0.0  ;;  %v14701_v44 = vld [vmem:[#allocation2 + $0x40] sm:$0xff]  ;;  %v14739_v32 = vld [vmem:[#allocation2 + $0x34] sm:$0xff] }
 0x14a   : > { %1490 = vst [vmem:[#allocation2 + $0x60] sm:$0xff] %v14694_v3  ;;  %v1467_v10 = vmax.f32 %v1443_v38, 0.0  ;;  %v12417_v47 = vpop.f32.mrb[48].mxu1  ;;  %v14704_v48 = vld [vmem:[#allocation2 + $0x51] sm:$0xff] }
 0x14b   : > { %1493 = vst [vmem:[#allocation2 + $0x78] sm:$0xff] %v1469_v43  ;;  %v1417_v14 = vmax.f32 %v14584_v46, %v12417_v47  ;;  %12450 = vmatpush3.bf16.msra.mxu0 %v13289_v20  ;;  %v1368_v55 = vpop.f32.mrb[49].mxu1  ;;  %v14713_v17 = vld [vmem:[#allocation2 + $0x41] sm:$0xff]  ;;  %v13291_v46 = vld [vmem:[%s17509_s3 + $0x18] sm:$0xff]  }
 0x14c   : > { %v14715_v21 = vld [vmem:[#allocation2 + $0x42] sm:$0xff]  ;;  %1491 = vst [vmem:[#allocation2 + $0x68] sm:$0xff] %v1467_v10  ;;  %v1415_v62 = vmax.f32 %v14587_v50, %v1368_v55  ;;  %v12418_v45 = vpop.f32.mrb[50].mxu1  ;;  %12451 = vmatprep.subr.bf16.mxu0 %v13290_v6  ;;  %v1540_v5 = vpack.c.bf16 %v14704_v48, %v14713_v17  ;;  %v14804_v50 = vld [vmem:[#allocation2 + $0x52] sm:$0xff] }
 0x14d   : > { %v14717_v60 = vld [vmem:[#allocation2 + $0x43] sm:$0xff]  ;;  %v1448_v16 = vadd.f32 %v14582_v8, %v1417_v14  ;;  %v1418_v53 = vmax.f32 %v14590_v54, %v12418_v45  ;;  %v1371_v20 = vpop.f32.mrb[51].mxu1  ;;  %v14755_v14 = vld [vmem:[#allocation2 + $0x31] sm:$0xff] }
 0x14e   : > { %v14727_v15 = vld [vmem:[#allocation2 + $0x44] sm:$0xff]  ;;  %v1446_v26 = vadd.f32 %v14582_v8, %v1415_v62  ;;  %v1416_v30 = vmax.f32 %v14594_v59, %v1371_v20  ;;  %12443 = vmatprep.mubr.bf16.mxu0 %v1540_v5  ;;  %v14758_v45 = vld [vmem:[#allocation2 + $0x32] sm:$0xff] }
 0x14f   : > { %v14745_v37 = vld [vmem:[#allocation2 + $0x41] sm:$0xff]  ;;  %v1472_v43 = vmax.f32 %v1448_v16, 0.0  ;;  %v1449_v10 = vadd.f32 %v14582_v8, %v1418_v53  ;;  %12452 = vmatpush3.bf16.msra.mxu0 %v13290_v6  ;;  %v14764_v53 = vld [vmem:[#allocation2 + $0x50] sm:$0xff] }
 0x150   : > { %v14747_v38 = vld [vmem:[#allocation2 + $0x42] sm:$0xff]  ;;  %v1470_v55 = vmax.f32 %v1446_v26, 0.0  ;;  %v1447_v62 = vadd.f32 %v14582_v8, %v1416_v30  ;;  %12453 = vmatprep.subr.bf16.mxu0 %v13291_v46  ;;  %v14812_v40 = vld [vmem:[#allocation2 + $0x54] sm:$0xff] }
 0x151   : > { %v13292_v59 = vld [vmem:[%s17509_s3 + $0x20] sm:$0xff]   ;;  %1496 = vst [vmem:[#allocation2 + $0x90] sm:$0xff] %v1472_v43  ;;  %v1473_v6 = vmax.f32 %v1449_v10, 0.0  ;;  %v14777_v43 = vld [vmem:[#allocation2 + $0x33] sm:$0xff] }
 0x152   : > { %v14760_v5 = vld [vmem:[#allocation2 + $0x43] sm:$0xff]  ;;  %1494 = vst [vmem:[#allocation2 + $0x80] sm:$0xff] %v1470_v55  ;;  %v1471_v30 = vmax.f32 %v1447_v62, 0.0  ;;  %v12421_v47 = vpop.f32.mrb[52].mxu1  ;;  %v14772_v42 = vld [vmem:[#allocation2 + $0x71] sm:$0xff]  ;;  %v14775_v54 = vpack.c.bf16 %v1470_v55, %v14686_v35 }
 0x153   : > { %v14762_v16 = vld [vmem:[#allocation2 + $0x44] sm:$0xff]  ;;  %v14779_v10 = vld [vmem:[#allocation2 + $0x34] sm:$0xff]  ;;  %1497 = vst [vmem:[#allocation2 + $0x98] sm:$0xff] %v1473_v6  ;;  %v1421_v25 = vmax.f32 %v14603_v13, %v12421_v47  ;;  %12454 = vmatpush3.bf16.msra.mxu0 %v13291_v46  ;;  %v1384_v26 = vpop.f32.mrb[53].mxu1 }
 0x154   : > { %17518 = vst [vmem:[#allocation3_spill] sm:$0xff] %v14762_v16  ;;  %v14766_v20 = vld [vmem:[#allocation2 + $0x60] sm:$0xff]  ;;  %17519 = vst [vmem:[#allocation4_spill] sm:$0xff] %v14779_v10  ;;  %v1419_v4 = vmax.f32 %v14609_v19, %v1384_v26  ;;  %v12422_v6 = vpop.f32.mrb[54].mxu1  ;;  %12455 = vmatprep.subr.bf16.mxu0 %v13292_v59  ;;  %v13293_v46 = vld [vmem:[%s17509_s3 + $0x28] sm:$0xff]  }
 0x155   : > { %v14784_v36 = vld [vmem:[#allocation2 + $0x61] sm:$0xff]  ;;  %1495 = vst [vmem:[#allocation2 + $0x88] sm:$0xff] %v1471_v30  ;;  %v1452_v2 = vadd.f32 %v14582_v8, %v1421_v25  ;;  %v1422_v55 = vmax.f32 %v14612_v24, %v12422_v6  ;;  %v1387_v51 = vpop.f32.mrb[55].mxu1  ;;  %v14806_v30 = vld [vmem:[#allocation2 + $0x53] sm:$0xff] }
 0x156   : > { %v14786_v62 = vld [vmem:[#allocation2 + $0x62] sm:$0xff]  ;;  %v1541_v13 = vpack.c.bf16 %v14772_v42, %v14784_v36  ;;  %v1450_v26 = vadd.f32 %v14582_v8, %v1419_v4  ;;  %v1420_v1 = vmax.f32 %v14616_v31, %v1387_v51  ;;  %v13294_v31 = vld [vmem:[%s17509_s3 + $0x30] sm:$0xff]   ;;  %v13299_v16 = vld [vmem:[%s17509_s3 + $0x98] sm:$0xff]  }
 0x157   : > { %v14788_v33 = vld [vmem:[#allocation2 + $0x63] sm:$0xff]  ;;  %v1476_v29 = vmax.f32 %v1452_v2, 0.0  ;;  %v1453_v19 = vadd.f32 %v14582_v8, %v1422_v55  ;;  %12456 = vmatpush3.bf16.msra.mxu0 %v13292_v59  ;;  %v14832_v25 = vld [vmem:[#allocation2 + $0x51] sm:$0xff] }
 0x158   : > { %v14800_v47 = vld [vmem:[#allocation2 + $0x64] sm:$0xff]  ;;  %12444 = vmatmul.mubr.bf16.gmra.mrb[44].mxu0 %v1541_v13  ;;  %v1474_v13 = vmax.f32 %v1450_v26, 0.0  ;;  %v1451_v24 = vadd.f32 %v14582_v8, %v1420_v1  ;;  %12457 = vmatprep.subr.bf16.mxu0 %v13293_v46  ;;  %v14834_v2 = vld [vmem:[#allocation2 + $0x52] sm:$0xff] }
 0x159   : > { %v14818_v6 = vld [vmem:[#allocation2 + $0x61] sm:$0xff]  ;;  %12463 = vmatprep.mubr.bf16.mxu0 %v14606_v18  ;;  %1500 = vst [vmem:[#allocation2 + $0xb0] sm:$0xff] %v1476_v29  ;;  %v1477_v18 = vmax.f32 %v1453_v19, 0.0  ;;  %v14838_v55 = vld [vmem:[#allocation2 + $0x70] sm:$0xff] }
 0x15a   : > { %v14820_v12 = vld [vmem:[#allocation2 + $0x62] sm:$0xff]  ;;  %v14842_v10 = vld [vmem:[#allocation2 + $0x53] sm:$0xff]  ;;  %v3897_v26 = vpack.c.bf16 %v14818_v6, %v14832_v25  ;;  %1498 = vst [vmem:[#allocation2 + $0xa0] sm:$0xff] %v1474_v13  ;;  %v1475_v1 = vmax.f32 %v1451_v24, 0.0  ;;  %v17541_v25 = vpack.c.bf16 %v14747_v38, %v14758_v45 }
 0x15b   : > { %v14829_v51 = vld [vmem:[#allocation2 + $0x63] sm:$0xff]  ;;  %v14848_v4 = vld [vmem:[#allocation2 + $0x54] sm:$0xff]  ;;  %1501 = vst [vmem:[#allocation2 + $0xb8] sm:$0xff] %v1477_v18  ;;  %12458 = vmatpush3.bf16.msra.mxu0 %v13293_v46  ;;  %v17520_v18 = vpack.c.bf16 %v14620_v34, %v14623_v61 }
 0x15c   : > { %v14836_v59 = vld [vmem:[#allocation2 + $0x64] sm:$0xff]  ;;  %1499 = vst [vmem:[#allocation2 + $0xa8] sm:$0xff] %v1475_v1  ;;  %12459 = vmatprep.subr.bf16.mxu0 %v13294_v31  ;;  %v13295_v13 = vld [vmem:[%s17509_s3 + $0x38] sm:$0xff]   ;;  %v17521_v1 = vpack.c.bf16 %v14641_v56, %v14644_v58 }
 0x15d   : > { %v14840_v11 = vld [vmem:[#allocation2 + $0x80] sm:$0xff]  ;;  %v13297_v46 = vld [vmem:[%s17509_s3 + $0x88] sm:$0xff]   ;;  %v13423_v38 = vld [vmem:[%s17509_s3 + $0x478] sm:$0xff]  }
 0x15e   : > { %v3748_v29 = vpack.c.bf16 %v14840_v11, %v14838_v55  ;;  %v13296_v24 = vld [vmem:[%s17509_s3 + $0x80] sm:$0xff]   ;;  %v17540_v11 = vpack.c.bf16 %v14745_v37, %v14755_v14  ;;  %v13413_v55 = vld [vmem:[%s17509_s3 + $0x428] sm:$0xff]   ;;  %v13415_v37 = vld [vmem:[%s17509_s3 + $0x438] sm:$0xff]  }
 0x15f   : > { %12460 = vmatpush3.bf16.msra.mxu0 %v13294_v31  ;;  %v13298_v31 = vld [vmem:[%s17509_s3 + $0x90] sm:$0xff]   ;;  %v13416_v14 = vld [vmem:[%s17509_s3 + $0x440] sm:$0xff]  }
 0x160   : > { %12461 = vmatprep.subr.bf16.mxu0 %v13295_v13  ;;  %v13420_v6 = vld [vmem:[%s17509_s3 + $0x460] sm:$0xff]  }
 0x161   : > { %v13424_v45 = vld [vmem:[%s17509_s3 + $0x480] sm:$0xff]  }
 0x163   : > { %12462 = vmatpush3.bf16.msra.mxu0 %v13295_v13  ;;  %v1785_v13 = vld [vmem:[#allocation2 + $0x2] sm:$0xff] }
 0x164   : > { %12471 = vmatprep.subr.bf16.mxu0 %v13296_v24  ;;  %v1793_v19 = vpack.c.bf16 %v14672_v27, %v1785_v13  ;;  %v1795_v13 = vpack.c.bf16 %v14804_v50, %v14715_v21 }
 0x166   : > { %12464 = vmatmul.mubr.bf16.vlgmr.msra.gmra.mrb[40].mxu0 %v17520_v18  ;;  %v17522_v18 = vpack.c.bf16 %v14686_v35, %v14694_v3  ;;  %v13303_v35 = vld [vmem:[%s17509_s3 + $0xb8] sm:$0xff]  }
 0x167   : > { %12467 = vmatprep.mubr.bf16.mxu0 %v17521_v1  ;;  %12472 = vmatpush3.bf16.msra.mxu0 %v13296_v24  ;;  %v13300_v24 = vld [vmem:[%s17509_s3 + $0xa0] sm:$0xff]   ;;  %v13301_v1 = vld [vmem:[%s17509_s3 + $0xa8] sm:$0xff]  }
 0x168   : > { %12473 = vmatprep.subr.bf16.mxu0 %v13297_v46 }
 0x16b   : > { %12474 = vmatpush3.bf16.msra.mxu0 %v13297_v46  ;;  %v13302_v46 = vld [vmem:[%s17509_s3 + $0xb0] sm:$0xff]  }
 0x16c   : > { %12475 = vmatprep.subr.bf16.mxu0 %v13298_v31 }
 0x16e   : > { %12468 = vmatmul.mubr.bf16.gmra.mrb[44].mxu0 %v17522_v18  ;;  %v13306_v18 = vld [vmem:[%s17509_s3 + $0xd0] sm:$0xff]  }
 0x16f   : > { %12476 = vmatpush3.bf16.msra.mxu0 %v13298_v31  ;;  %12487 = vmatprep.mubr.bf16.mxu0 %v1793_v19  ;;  %v13305_v19 = vld [vmem:[%s17509_s3 + $0xc8] sm:$0xff]   ;;  %v1794_v31 = vpack.c.bf16 %v14731_v0, %v14658_v9 }
 0x170   : > { %12477 = vmatprep.subr.bf16.mxu0 %v13299_v16 }
 0x173   : > { %12478 = vmatpush3.bf16.msra.mxu0 %v13299_v16  ;;  %v13304_v16 = vld [vmem:[%s17509_s3 + $0xc0] sm:$0xff]  }
 0x174   : > { %12479 = vmatprep.subr.bf16.mxu0 %v13300_v24 }
 0x177   : > { %12480 = vmatpush3.bf16.msra.mxu0 %v13300_v24  ;;  %v14906_v24 = vld [vmem:[#allocation2 + $0x72] sm:$0xff] }
 0x178   : > { %12481 = vmatprep.subr.bf16.mxu0 %v13301_v1 }
 0x17b   : > { %12482 = vmatpush3.bf16.msra.mxu0 %v13301_v1  ;;  %v1935_v1 = vld [vmem:[#allocation2 + $0x3] sm:$0xff] }
 0x17c   : > { %12483 = vmatprep.subr.bf16.mxu0 %v13302_v46 }
 0x17f   : > { %12484 = vmatpush3.bf16.msra.mxu0 %v13302_v46  ;;  %v13307_v46 = vld [vmem:[%s17509_s3 + $0xd8] sm:$0xff]  }
 0x180   : > { %12485 = vmatprep.subr.bf16.mxu0 %v13303_v35 }
 0x183   : > { %12486 = vmatpush3.bf16.msra.mxu0 %v13303_v35  ;;  %v1796_v35 = vpack.c.bf16 %v14906_v24, %v14786_v62 }
 0x184   : > { %12495 = vmatprep.subr.bf16.mxu0 %v13304_v16 }
 0x186   : > { %12488 = vmatmul.mubr.bf16.vlgmr.msra.gmra.mrb[40].mxu0 %v1794_v31  ;;  %v1943_v31 = vpack.c.bf16 %v14674_v28, %v1935_v1  ;;  %v13312_v1 = vld [vmem:[%s17509_s3 + $0x100] sm:$0xff]  }
 0x187   : > { %12491 = vmatprep.mubr.bf16.mxu0 %v1795_v13  ;;  %12496 = vmatpush3.bf16.msra.mxu0 %v13304_v16  ;;  %v13308_v16 = vld [vmem:[%s17509_s3 + $0xe0] sm:$0xff]   ;;  %v13309_v13 = vld [vmem:[%s17509_s3 + $0xe8] sm:$0xff]  }
 0x188   : > { %12497 = vmatprep.subr.bf16.mxu0 %v13305_v19 }
 0x18b   : > { %12498 = vmatpush3.bf16.msra.mxu0 %v13305_v19  ;;  %v13310_v19 = vld [vmem:[%s17509_s3 + $0xf0] sm:$0xff]  }
 0x18c   : > { %12499 = vmatprep.subr.bf16.mxu0 %v13306_v18 }
 0x18e   : > { %12492 = vmatmul.mubr.bf16.gmra.mrb[44].mxu0 %v1796_v35  ;;  %v1944_v35 = vpack.c.bf16 %v14733_v23, %v14660_v49 }
 0x18f   : > { %12500 = vmatpush3.bf16.msra.mxu0 %v13306_v18  ;;  %12511 = vmatprep.mubr.bf16.mxu0 %v1943_v31  ;;  %v13311_v18 = vld [vmem:[%s17509_s3 + $0xf8] sm:$0xff]   ;;  %v1945_v31 = vpack.c.bf16 %v14806_v30, %v14717_v60 }
 0x190   : > { %12501 = vmatprep.subr.bf16.mxu0 %v13307_v46 }
 0x193   : > { %12502 = vmatpush3.bf16.msra.mxu0 %v13307_v46  ;;  %v13313_v46 = vld [vmem:[%s17509_s3 + $0x108] sm:$0xff]  }
 0x194   : > { %12503 = vmatprep.subr.bf16.mxu0 %v13308_v16 }
 0x197   : > { %12504 = vmatpush3.bf16.msra.mxu0 %v13308_v16  ;;  %v13314_v16 = vld [vmem:[%s17509_s3 + $0x110] sm:$0xff]  }
 0x198   : > { %12505 = vmatprep.subr.bf16.mxu0 %v13309_v13 }
 0x19b   : > { %12506 = vmatpush3.bf16.msra.mxu0 %v13309_v13  ;;  %v14939_v13 = vld [vmem:[#allocation2 + $0x73] sm:$0xff] }
 0x19c   : > { %12507 = vmatprep.subr.bf16.mxu0 %v13310_v19  ;;  %v1946_v8 = vpack.c.bf16 %v14939_v13, %v14788_v33 }
 0x19f   : > { %12508 = vmatpush3.bf16.msra.mxu0 %v13310_v19  ;;  %v2085_v19 = vld [vmem:[#allocation2 + $0x4] sm:$0xff] }
 0x1a0   : > { %12509 = vmatprep.subr.bf16.mxu0 %v13311_v18 }
 0x1a3   : > { %12510 = vmatpush3.bf16.msra.mxu0 %v13311_v18  ;;  %v13315_v18 = vld [vmem:[%s17509_s3 + $0x118] sm:$0xff]  }
 0x1a4   : > { %12519 = vmatprep.subr.bf16.mxu0 %v13312_v1 }
 0x1a6   : > { %12512 = vmatmul.mubr.bf16.vlgmr.msra.gmra.mrb[40].mxu0 %v1944_v35  ;;  %v2093_v35 = vpack.c.bf16 %v14680_v57, %v2085_v19  ;;  %v2094_v19 = vpack.c.bf16 %v14739_v32, %v14668_v22 }
 0x1a7   : > { %12515 = vmatprep.mubr.bf16.mxu0 %v1945_v31  ;;  %12520 = vmatpush3.bf16.msra.mxu0 %v13312_v1  ;;  %v13316_v1 = vld [vmem:[%s17509_s3 + $0x120] sm:$0xff]   ;;  %v13317_v31 = vld [vmem:[%s17509_s3 + $0x128] sm:$0xff]  }
 0x1a8   : > { %12521 = vmatprep.subr.bf16.mxu0 %v13313_v46 }
 0x1ab   : > { %12522 = vmatpush3.bf16.msra.mxu0 %v13313_v46  ;;  %v13318_v46 = vld [vmem:[%s17509_s3 + $0x130] sm:$0xff]  }
 0x1ac   : > { %12523 = vmatprep.subr.bf16.mxu0 %v13314_v16 }
 0x1ae   : > { %12516 = vmatmul.mubr.bf16.gmra.mrb[44].mxu0 %v1946_v8  ;;  %v13319_v8 = vld [vmem:[%s17509_s3 + $0x138] sm:$0xff]  }
 0x1af   : > { %12524 = vmatpush3.bf16.msra.mxu0 %v13314_v16  ;;  %12535 = vmatprep.mubr.bf16.mxu0 %v2093_v35  ;;  %v13320_v16 = vld [vmem:[%s17509_s3 + $0x140] sm:$0xff]   ;;  %v2095_v35 = vpack.c.bf16 %v14812_v40, %v14727_v15 }
 0x1b0   : > { %12525 = vmatprep.subr.bf16.mxu0 %v13315_v18 }
 0x1b3   : > { %12526 = vmatpush3.bf16.msra.mxu0 %v13315_v18  ;;  %v13321_v18 = vld [vmem:[%s17509_s3 + $0x148] sm:$0xff]  }
 0x1b4   : > { %12527 = vmatprep.subr.bf16.mxu0 %v13316_v1 }
 0x1b7   : > { %12528 = vmatpush3.bf16.msra.mxu0 %v13316_v1  ;;  %v13322_v1 = vld [vmem:[%s17509_s3 + $0x150] sm:$0xff]  }
 0x1b8   : > { %12529 = vmatprep.subr.bf16.mxu0 %v13317_v31 }
 0x1bb   : > { %12530 = vmatpush3.bf16.msra.mxu0 %v13317_v31  ;;  %v14972_v31 = vld [vmem:[#allocation2 + $0x74] sm:$0xff] }
 0x1bc   : > { %12531 = vmatprep.subr.bf16.mxu0 %v13318_v46 }
 0x1bf   : > { %12532 = vmatpush3.bf16.msra.mxu0 %v13318_v46  ;;  %v2096_v46 = vpack.c.bf16 %v14972_v31, %v14800_v47 }
 0x1c0   : > { %12533 = vmatprep.subr.bf16.mxu0 %v13319_v8 }
 0x1c3   : > { %12534 = vmatpush3.bf16.msra.mxu0 %v13319_v8  ;;  %v13323_v8 = vld [vmem:[%s17509_s3 + $0x158] sm:$0xff]  }
 0x1c4   : > { %12543 = vmatprep.subr.bf16.mxu0 %v13320_v16 }
 0x1c6   : > { %12536 = vmatmul.mubr.bf16.vlgmr.msra.gmra.mrb[40].mxu0 %v2094_v19  ;;  %v13324_v19 = vld [vmem:[%s17509_s3 + $0x160] sm:$0xff]  }
 0x1c7   : > { %12539 = vmatprep.mubr.bf16.mxu0 %v2095_v35  ;;  %12544 = vmatpush3.bf16.msra.mxu0 %v13320_v16  ;;  %v17523_v16 = vpack.c.bf16 %v14623_v61, %v14598_v63  ;;  %v13326_v35 = vld [vmem:[%s17509_s3 + $0x170] sm:$0xff]   ;;  %v13327_v63 = vld [vmem:[%s17509_s3 + $0x178] sm:$0xff]   ;;  %v13328_v61 = vld [vmem:[%s17509_s3 + $0x180] sm:$0xff]  }
 0x1c8   : > { %12545 = vmatprep.subr.bf16.mxu0 %v13321_v18 }
 0x1cb   : > { %12546 = vmatpush3.bf16.msra.mxu0 %v13321_v18  ;;  %v13325_v18 = vld [vmem:[%s17509_s3 + $0x168] sm:$0xff]  }
 0x1cc   : > { %12547 = vmatprep.subr.bf16.mxu0 %v13322_v1 }
 0x1ce   : > { %12540 = vmatmul.mubr.bf16.gmra.mrb[44].mxu0 %v2096_v46  ;;  %v17524_v46 = vpack.c.bf16 %v14644_v58, %v14620_v34  ;;  %v17526_v34 = vpack.c.bf16 %v14656_v7, %v14628_v39  ;;  %v13333_v58 = vld [vmem:[%s17509_s3 + $0x1a8] sm:$0xff]   ;;  %v13335_v39 = vld [vmem:[%s17509_s3 + $0x1b8] sm:$0xff]   ;;  %v13336_v7 = vld [vmem:[%s17509_s3 + $0x1c0] sm:$0xff]  }
 0x1cf   : > { %12548 = vmatpush3.bf16.msra.mxu0 %v13322_v1  ;;  %12559 = vmatprep.mubr.bf16.mxu0 %v17523_v16  ;;  %v13329_v1 = vld [vmem:[%s17509_s3 + $0x188] sm:$0xff]   ;;  %v13330_v16 = vld [vmem:[%s17509_s3 + $0x190] sm:$0xff]  }
 0x1d0   : > { %12549 = vmatprep.subr.bf16.mxu0 %v13323_v8 }
 0x1d3   : > { %12550 = vmatpush3.bf16.msra.mxu0 %v13323_v8  ;;  %v17525_v8 = vpack.c.bf16 %v14694_v3, %v14641_v56  ;;  %v13332_v56 = vld [vmem:[%s17509_s3 + $0x1a0] sm:$0xff]   ;;  %v13334_v3 = vld [vmem:[%s17509_s3 + $0x1b0] sm:$0xff]  }
 0x1d4   : > { %12551 = vmatprep.subr.bf16.mxu0 %v13324_v19 }
 0x1d7   : > { %12552 = vmatpush3.bf16.msra.mxu0 %v13324_v19  ;;  %v13331_v19 = vld [vmem:[%s17509_s3 + $0x198] sm:$0xff]  }
 0x1d8   : > { %12553 = vmatprep.subr.bf16.mxu0 %v13325_v18 }
 0x1db   : > { %12554 = vmatpush3.bf16.msra.mxu0 %v13325_v18  ;;  %v17527_v18 = vpack.c.bf16 %v14713_v17, %v14649_v41  ;;  %v13339_v41 = vld [vmem:[%s17509_s3 + $0x1d8] sm:$0xff]   ;;  %v13340_v17 = vld [vmem:[%s17509_s3 + $0x1e0] sm:$0xff]  }
 0x1dc   : > { %12555 = vmatprep.subr.bf16.mxu0 %v13326_v35 }
 0x1df   : > { %12556 = vmatpush3.bf16.msra.mxu0 %v13326_v35  ;;  %v17528_v35 = vpack.c.bf16 %v14784_v36, %v14704_v48  ;;  %v17529_v48 = vpack.c.bf16 %v14658_v9, %v14672_v27  ;;  %v13342_v36 = vld [vmem:[%s17509_s3 + $0x1f0] sm:$0xff]   ;;  %v13343_v9 = vld [vmem:[%s17509_s3 + $0x1f8] sm:$0xff]   ;;  %v13344_v27 = vld [vmem:[%s17509_s3 + $0x200] sm:$0xff]  }
 0x1e0   : > { %12557 = vmatprep.subr.bf16.mxu0 %v13327_v63 }
 0x1e3   : > { %12558 = vmatpush3.bf16.msra.mxu0 %v13327_v63  ;;  %v13338_v63 = vld [vmem:[%s17509_s3 + $0x1d0] sm:$0xff]  }
 0x1e4   : > { %12567 = vmatprep.subr.bf16.mxu0 %v13328_v61 }
 0x1e6   : > { %12560 = vmatmul.mubr.bf16.vlgmr.msra.gmra.mrb[40].mxu0 %v17524_v46  ;;  %v13345_v46 = vld [vmem:[%s17509_s3 + $0x208] sm:$0xff]  }
 0x1e7   : > { %12563 = vmatprep.mubr.bf16.mxu0 %v17525_v8  ;;  %12568 = vmatpush3.bf16.msra.mxu0 %v13328_v61  ;;  %v15043_v61 = vld [vmem:[#allocation2 + $0x81] sm:$0xff]  ;;  %v17530_v8 = vpack.c.bf16 %v14715_v21, %v14731_v0  ;;  %v13347_v21 = vld [vmem:[%s17509_s3 + $0x218] sm:$0xff]   ;;  %v17532_v0 = vpack.c.bf16 %v14660_v49, %v14674_v28 }
 0x1e8   : > { %12569 = vmatprep.subr.bf16.mxu0 %v13329_v1  ;;  %v13351_v49 = vld [vmem:[%s17509_s3 + $0x238] sm:$0xff]   ;;  %v13352_v28 = vld [vmem:[%s17509_s3 + $0x240] sm:$0xff]  }
 0x1eb   : > { %12570 = vmatpush3.bf16.msra.mxu0 %v13329_v1  ;;  %v2397_v1 = vpack.c.bf16 %v15043_v61, %v14772_v42  ;;  %v13341_v42 = vld [vmem:[%s17509_s3 + $0x1e8] sm:$0xff]  }
 0x1ec   : > { %12571 = vmatprep.subr.bf16.mxu0 %v13330_v16 }
 0x1ee   : > { %12564 = vmatmul.mubr.bf16.gmra.mrb[44].mxu0 %v14775_v54  ;;  %v13337_v54 = vld [vmem:[%s17509_s3 + $0x1c8] sm:$0xff]  }
 0x1ef   : > { %12572 = vmatpush3.bf16.msra.mxu0 %v13330_v16  ;;  %12583 = vmatprep.mubr.bf16.mxu0 %v17526_v34  ;;  %v17531_v16 = vpack.c.bf16 %v14786_v62, %v14804_v50  ;;  %v15080_v34 = vld [vmem:[#allocation2 + $0x82] sm:$0xff] }
 0x1f0   : > { %12573 = vmatprep.subr.bf16.mxu0 %v13331_v19  ;;  %v13348_v50 = vld [vmem:[%s17509_s3 + $0x220] sm:$0xff]   ;;  %v13349_v62 = vld [vmem:[%s17509_s3 + $0x228] sm:$0xff]  }
 0x1f3   : > { %12574 = vmatpush3.bf16.msra.mxu0 %v13331_v19  ;;  %v13346_v19 = vld [vmem:[%s17509_s3 + $0x210] sm:$0xff]  }
 0x1f4   : > { %12575 = vmatprep.subr.bf16.mxu0 %v13332_v56 }
 0x1f7   : > { %12576 = vmatpush3.bf16.msra.mxu0 %v13332_v56  ;;  %v2547_v56 = vpack.c.bf16 %v15080_v34, %v14906_v24  ;;  %v13350_v24 = vld [vmem:[%s17509_s3 + $0x230] sm:$0xff]  }
 0x1f8   : > { %12577 = vmatprep.subr.bf16.mxu0 %v13333_v58 }
 0x1fb   : > { %12578 = vmatpush3.bf16.msra.mxu0 %v13333_v58  ;;  %v13353_v58 = vld [vmem:[%s17509_s3 + $0x248] sm:$0xff]  }
 0x1fc   : > { %12579 = vmatprep.subr.bf16.mxu0 %v13334_v3 }
 0x1ff   : > { %12580 = vmatpush3.bf16.msra.mxu0 %v13334_v3  ;;  %v17533_v3 = vpack.c.bf16 %v14717_v60, %v14733_v23  ;;  %v13355_v60 = vld [vmem:[%s17509_s3 + $0x258] sm:$0xff]   ;;  %v13356_v23 = vld [vmem:[%s17509_s3 + $0x260] sm:$0xff]  }
 0x200   : > { %12581 = vmatprep.subr.bf16.mxu0 %v13335_v39 }
 0x203   : > { %12582 = vmatpush3.bf16.msra.mxu0 %v13335_v39  ;;  %v17534_v39 = vpack.c.bf16 %v14788_v33, %v14806_v30  ;;  %v17535_v33 = vpack.c.bf16 %v14668_v22, %v14680_v57  ;;  %v13357_v30 = vld [vmem:[%s17509_s3 + $0x268] sm:$0xff]   ;;  %v13359_v22 = vld [vmem:[%s17509_s3 + $0x278] sm:$0xff]   ;;  %v13360_v57 = vld [vmem:[%s17509_s3 + $0x280] sm:$0xff]  }
 0x204   : > { %12591 = vmatprep.subr.bf16.mxu0 %v13336_v7 }
 0x206   : > { %12584 = vmatmul.mubr.bf16.vlgmr.msra.gmra.mrb[40].mxu0 %v17527_v18 }
 0x207   : > { %12587 = vmatprep.mubr.bf16.mxu0 %v17528_v35  ;;  %12592 = vmatpush3.bf16.msra.mxu0 %v13336_v7  ;;  %v13354_v7 = vld [vmem:[%s17509_s3 + $0x250] sm:$0xff]   ;;  %v13361_v35 = vld [vmem:[%s17509_s3 + $0x288] sm:$0xff]  }
 0x208   : > { %12593 = vmatprep.subr.bf16.mxu0 %v13337_v54 }
 0x20b   : > { %12594 = vmatpush3.bf16.msra.mxu0 %v13337_v54  ;;  %v15117_v54 = vld [vmem:[#allocation2 + $0x83] sm:$0xff] }
 0x20c   : > { %12595 = vmatprep.subr.bf16.mxu0 %v13338_v63  ;;  %v2697_v18 = vpack.c.bf16 %v15117_v54, %v14939_v13  ;;  %v13358_v13 = vld [vmem:[%s17509_s3 + $0x270] sm:$0xff]  }
 0x20e   : > { %12588 = vmatmul.mubr.bf16.gmra.mrb[44].mxu0 %v2397_v1  ;;  %v17537_v1 = vpack.c.bf16 %v14800_v47, %v14812_v40  ;;  %v14281_v40 = vld [vmem:[#allocation2 + $0x30] sm:$0xff]  ;;  %v13364_v47 = vld [vmem:[%s17509_s3 + $0x2a0] sm:$0xff]  }
 0x20f   : > { %12596 = vmatpush3.bf16.msra.mxu0 %v13338_v63  ;;  %12607 = vmatprep.mubr.bf16.mxu0 %v17529_v48  ;;  %v17536_v63 = vpack.c.bf16 %v14727_v15, %v14739_v32  ;;  %v15154_v48 = vld [vmem:[#allocation2 + $0x84] sm:$0xff]  ;;  %v13363_v15 = vld [vmem:[%s17509_s3 + $0x298] sm:$0xff]  }
 0x210   : > { %12597 = vmatprep.subr.bf16.mxu0 %v13339_v41 }
 0x213   : > { %12598 = vmatpush3.bf16.msra.mxu0 %v13339_v41  ;;  %v13362_v41 = vld [vmem:[%s17509_s3 + $0x290] sm:$0xff]  }
 0x214   : > { %12599 = vmatprep.subr.bf16.mxu0 %v13340_v17 }
 0x217   : > { %12600 = vmatpush3.bf16.msra.mxu0 %v13340_v17  ;;  %v2987_v17 = vld [vmem:[#allocation2 + $0x20] sm:$0xff] }
 0x218   : > { %12601 = vmatprep.subr.bf16.mxu0 %v13341_v42  ;;  %v2995_v32 = vpack.c.bf16 %v14281_v40, %v2987_v17  ;;  %v15212_v17 = vld [vmem:[#allocation2 + $0x91] sm:$0xff] }
 0x219   : > { %v13379_v40 = vld [vmem:[%s17509_s3 + $0x318] sm:$0xff]  }
 0x21b   : > { %12602 = vmatpush3.bf16.msra.mxu0 %v13341_v42  ;;  %v2847_v42 = vpack.c.bf16 %v15154_v48, %v14972_v31  ;;  %v13365_v31 = vld [vmem:[%s17509_s3 + $0x2a8] sm:$0xff]  }
 0x21c   : > { %12603 = vmatprep.subr.bf16.mxu0 %v13342_v36 }
 0x21f   : > { %12604 = vmatpush3.bf16.msra.mxu0 %v13342_v36  ;;  %v13366_v36 = vld [vmem:[%s17509_s3 + $0x2b0] sm:$0xff]  }
 0x220   : > { %12605 = vmatprep.subr.bf16.mxu0 %v13343_v9 }
 0x223   : > { %12606 = vmatpush3.bf16.msra.mxu0 %v13343_v9  ;;  %v13367_v9 = vld [vmem:[%s17509_s3 + $0x2b8] sm:$0xff]  }
 0x224   : > { %12615 = vmatprep.subr.bf16.mxu0 %v13344_v27 }
 0x226   : > { %12608 = vmatmul.mubr.bf16.vlgmr.msra.gmra.mrb[40].mxu0 %v17530_v8  ;;  %v14283_v8 = vld [vmem:[#allocation2 + $0x50] sm:$0xff] }
 0x227   : > { %12611 = vmatprep.mubr.bf16.mxu0 %v17531_v16  ;;  %12616 = vmatpush3.bf16.msra.mxu0 %v13344_v27  ;;  %v13368_v27 = vld [vmem:[%s17509_s3 + $0x2c0] sm:$0xff]  }
 0x228   : > { %12617 = vmatprep.subr.bf16.mxu0 %v13345_v46 }
 0x22b   : > { %12618 = vmatpush3.bf16.msra.mxu0 %v13345_v46  ;;  %v14282_v46 = vld [vmem:[#allocation2 + $0x40] sm:$0xff] }
 0x22c   : > { %12619 = vmatprep.subr.bf16.mxu0 %v13346_v19  ;;  %v2996_v16 = vpack.c.bf16 %v14283_v8, %v14282_v46  ;;  %v15234_v46 = vld [vmem:[#allocation2 + $0x72] sm:$0xff]  ;;  %v14292_v8 = vld [vmem:[#allocation2 + $0x42] sm:$0xff] }
 0x22e   : > { %12612 = vmatmul.mubr.bf16.gmra.mrb[44].mxu0 %v2547_v56  ;;  %v14284_v56 = vld [vmem:[#allocation2 + $0x60] sm:$0xff] }
 0x22f   : > { %12620 = vmatpush3.bf16.msra.mxu0 %v13346_v19  ;;  %12631 = vmatprep.mubr.bf16.mxu0 %v17532_v0  ;;  %v13369_v19 = vld [vmem:[%s17509_s3 + $0x2c8] sm:$0xff]  }
 0x230   : > { %12621 = vmatprep.subr.bf16.mxu0 %v13347_v21 }
 0x233   : > { %12622 = vmatpush3.bf16.msra.mxu0 %v13347_v21  ;;  %v14285_v21 = vld [vmem:[#allocation2 + $0x70] sm:$0xff] }
 0x234   : > { %12623 = vmatprep.subr.bf16.mxu0 %v13348_v50  ;;  %v2997_v0 = vpack.c.bf16 %v14285_v21, %v14284_v56  ;;  %v13385_v56 = vld [vmem:[%s17509_s3 + $0x348] sm:$0xff]  }
 0x235   : > { %v14294_v21 = vld [vmem:[#allocation2 + $0x62] sm:$0xff] }
 0x237   : > { %12624 = vmatpush3.bf16.msra.mxu0 %v13348_v50  ;;  %v13370_v50 = vld [vmem:[%s17509_s3 + $0x2d0] sm:$0xff]  }
 0x238   : > { %12625 = vmatprep.subr.bf16.mxu0 %v13349_v62 }
 0x23b   : > { %12626 = vmatpush3.bf16.msra.mxu0 %v13349_v62  ;;  %v15182_v62 = vld [vmem:[#allocation2 + $0x90] sm:$0xff] }
 0x23c   : > { %12627 = vmatprep.subr.bf16.mxu0 %v13350_v24 }
 0x23f   : > { %12628 = vmatpush3.bf16.msra.mxu0 %v13350_v24  ;;  %v3137_v24 = vld [vmem:[#allocation2 + $0x21] sm:$0xff] }
 0x240   : > { %12629 = vmatprep.subr.bf16.mxu0 %v13351_v49 }
 0x243   : > { %12630 = vmatpush3.bf16.msra.mxu0 %v13351_v49  ;;  %v14286_v49 = vld [vmem:[#allocation2 + $0x80] sm:$0xff] }
 0x244   : > { %12639 = vmatprep.subr.bf16.mxu0 %v13352_v28 }
 0x246   : > { %12632 = vmatmul.mubr.bf16.vlgmr.msra.gmra.mrb[40].mxu0 %v17533_v3  ;;  %v14287_v3 = vld [vmem:[#allocation2 + $0x31] sm:$0xff] }
 0x247   : > { %12635 = vmatprep.mubr.bf16.mxu0 %v17534_v39  ;;  %12640 = vmatpush3.bf16.msra.mxu0 %v13352_v28  ;;  %v2998_v28 = vpack.c.bf16 %v15182_v62, %v14286_v49  ;;  %v3145_v39 = vpack.c.bf16 %v14287_v3, %v3137_v24  ;;  %v15243_v24 = vld [vmem:[#allocation2 + $0x92] sm:$0xff]  ;;  %v3437_v49 = vld [vmem:[#allocation2 + $0x23] sm:$0xff] }
 0x248   : > { %12641 = vmatprep.subr.bf16.mxu0 %v13353_v58  ;;  %v14295_v3 = vld [vmem:[#allocation2 + $0x33] sm:$0xff] }
 0x24b   : > { %12642 = vmatpush3.bf16.msra.mxu0 %v13353_v58  ;;  %v13371_v58 = vld [vmem:[%s17509_s3 + $0x2d8] sm:$0xff]  }
 0x24c   : > { %12643 = vmatprep.subr.bf16.mxu0 %v13354_v7 }
 0x24e   : > { %12636 = vmatmul.mubr.bf16.gmra.mrb[44].mxu0 %v2697_v18  ;;  %v13373_v18 = vld [vmem:[%s17509_s3 + $0x2e8] sm:$0xff]  }
 0x24f   : > { %12644 = vmatpush3.bf16.msra.mxu0 %v13354_v7  ;;  %12655 = vmatprep.mubr.bf16.mxu0 %v17535_v33  ;;  %v13372_v7 = vld [vmem:[%s17509_s3 + $0x2e0] sm:$0xff]   ;;  %v13375_v33 = vld [vmem:[%s17509_s3 + $0x2f8] sm:$0xff]  }
 0x250   : > { %12645 = vmatprep.subr.bf16.mxu0 %v13355_v60 }
 0x253   : > { %12646 = vmatpush3.bf16.msra.mxu0 %v13355_v60  ;;  %v13374_v60 = vld [vmem:[%s17509_s3 + $0x2f0] sm:$0xff]  }
 0x254   : > { %12647 = vmatprep.subr.bf16.mxu0 %v13356_v23 }
 0x257   : > { %12648 = vmatpush3.bf16.msra.mxu0 %v13356_v23  ;;  %v13376_v23 = vld [vmem:[%s17509_s3 + $0x300] sm:$0xff]  }
 0x258   : > { %12649 = vmatprep.subr.bf16.mxu0 %v13357_v30 }
 0x25b   : > { %12650 = vmatpush3.bf16.msra.mxu0 %v13357_v30  ;;  %v15203_v30 = vld [vmem:[#allocation2 + $0x71] sm:$0xff] }
 0x25c   : > { %12651 = vmatprep.subr.bf16.mxu0 %v13358_v13 }
 0x25f   : > { %12652 = vmatpush3.bf16.msra.mxu0 %v13358_v13  ;;  %v14288_v13 = vld [vmem:[#allocation2 + $0x41] sm:$0xff] }
 0x260   : > { %12653 = vmatprep.subr.bf16.mxu0 %v13359_v22 }
 0x263   : > { %12654 = vmatpush3.bf16.msra.mxu0 %v13359_v22  ;;  %v14289_v22 = vld [vmem:[#allocation2 + $0x51] sm:$0xff] }
 0x264   : > { %12663 = vmatprep.subr.bf16.mxu0 %v13360_v57 }
 0x266   : > { %12656 = vmatmul.mubr.bf16.vlgmr.msra.gmra.mrb[40].mxu0 %v17536_v63  ;;  %v14290_v63 = vld [vmem:[#allocation2 + $0x61] sm:$0xff] }
 0x267   : > { %12659 = vmatprep.mubr.bf16.mxu0 %v17537_v1  ;;  %12664 = vmatpush3.bf16.msra.mxu0 %v13360_v57  ;;  %v3146_v57 = vpack.c.bf16 %v14289_v22, %v14288_v13  ;;  %v3147_v1 = vpack.c.bf16 %v15203_v30, %v14290_v63  ;;  %v14296_v13 = vld [vmem:[#allocation2 + $0x43] sm:$0xff]  ;;  %v14297_v22 = vld [vmem:[#allocation2 + $0x53] sm:$0xff] }
 0x268   : > { %12665 = vmatprep.subr.bf16.mxu0 %v13361_v35  ;;  %v14298_v63 = vld [vmem:[#allocation2 + $0x63] sm:$0xff] }
 0x26b   : > { %12666 = vmatpush3.bf16.msra.mxu0 %v13361_v35  ;;  %v13377_v35 = vld [vmem:[%s17509_s3 + $0x308] sm:$0xff]  }
 0x26c   : > { %12667 = vmatprep.subr.bf16.mxu0 %v13362_v41 }
 0x26e   : > { %12660 = vmatmul.mubr.bf16.gmra.mrb[44].mxu0 %v2847_v42  ;;  %v3287_v42 = vld [vmem:[#allocation2 + $0x22] sm:$0xff] }
 0x26f   : > { %12668 = vmatpush3.bf16.msra.mxu0 %v13362_v41  ;;  %12679 = vmatprep.mubr.bf16.mxu0 %v2995_v32  ;;  %v13378_v41 = vld [vmem:[%s17509_s3 + $0x310] sm:$0xff]  }
 0x270   : > { %12669 = vmatprep.subr.bf16.mxu0 %v13363_v15  ;;  %v14291_v32 = vld [vmem:[#allocation2 + $0x32] sm:$0xff] }
 0x273   : > { %12670 = vmatpush3.bf16.msra.mxu0 %v13363_v15  ;;  %v3148_v15 = vpack.c.bf16 %v15212_v17, %v15043_v61  ;;  %v13381_v61 = vld [vmem:[%s17509_s3 + $0x328] sm:$0xff]  }
 0x274   : > { %12671 = vmatprep.subr.bf16.mxu0 %v13364_v47 }
 0x277   : > { %12672 = vmatpush3.bf16.msra.mxu0 %v13364_v47  ;;  %v3295_v47 = vpack.c.bf16 %v14291_v32, %v3287_v42  ;;  %v15274_v42 = vld [vmem:[#allocation2 + $0x93] sm:$0xff] }
 0x278   : > { %12673 = vmatprep.subr.bf16.mxu0 %v13365_v31  ;;  %v13395_v32 = vld [vmem:[%s17509_s3 + $0x398] sm:$0xff]  }
 0x27b   : > { %12674 = vmatpush3.bf16.msra.mxu0 %v13365_v31  ;;  %v13380_v31 = vld [vmem:[%s17509_s3 + $0x320] sm:$0xff]  }
 0x27c   : > { %12675 = vmatprep.subr.bf16.mxu0 %v13366_v36 }
 0x27f   : > { %12676 = vmatpush3.bf16.msra.mxu0 %v13366_v36  ;;  %v13382_v36 = vld [vmem:[%s17509_s3 + $0x330] sm:$0xff]  }
 0x280   : > { %12677 = vmatprep.subr.bf16.mxu0 %v13367_v9 }
 0x283   : > { %12678 = vmatpush3.bf16.msra.mxu0 %v13367_v9  ;;  %v13383_v9 = vld [vmem:[%s17509_s3 + $0x338] sm:$0xff]  }
 0x284   : > { %12687 = vmatprep.subr.bf16.mxu0 %v13368_v27 }
 0x286   : > { %12680 = vmatmul.mubr.bf16.vlgmr.msra.gmra.mrb[40].mxu0 %v2996_v16  ;;  %v14293_v16 = vld [vmem:[#allocation2 + $0x52] sm:$0xff] }
 0x287   : > { %12683 = vmatprep.mubr.bf16.mxu0 %v2997_v0  ;;  %12688 = vmatpush3.bf16.msra.mxu0 %v13368_v27  ;;  %v13384_v27 = vld [vmem:[%s17509_s3 + $0x340] sm:$0xff]   ;;  %v3297_v0 = vpack.c.bf16 %v15234_v46, %v14294_v21  ;;  %v13401_v21 = vld [vmem:[%s17509_s3 + $0x3c8] sm:$0xff]  }
 0x288   : > { %12689 = vmatprep.subr.bf16.mxu0 %v13369_v19 }
 0x28b   : > { %12690 = vmatpush3.bf16.msra.mxu0 %v13369_v19  ;;  %v3296_v19 = vpack.c.bf16 %v14293_v16, %v14292_v8  ;;  %v15296_v8 = vld [vmem:[#allocation2 + $0x74] sm:$0xff]  ;;  %v14300_v16 = vld [vmem:[#allocation2 + $0x44] sm:$0xff] }
 0x28c   : > { %12691 = vmatprep.subr.bf16.mxu0 %v13370_v50 }
 0x28e   : > { %12684 = vmatmul.mubr.bf16.gmra.mrb[44].mxu0 %v2998_v28  ;;  %v3298_v28 = vpack.c.bf16 %v15243_v24, %v15080_v34  ;;  %v13389_v34 = vld [vmem:[%s17509_s3 + $0x368] sm:$0xff]  }
 0x28f   : > { %12692 = vmatpush3.bf16.msra.mxu0 %v13370_v50  ;;  %12703 = vmatprep.mubr.bf16.mxu0 %v3145_v39  ;;  %v13386_v50 = vld [vmem:[%s17509_s3 + $0x350] sm:$0xff]   ;;  %v3445_v39 = vpack.c.bf16 %v14295_v3, %v3437_v49  ;;  %v13403_v3 = vld [vmem:[%s17509_s3 + $0x3d8] sm:$0xff]  }
 0x290   : > { %12693 = vmatprep.subr.bf16.mxu0 %v13371_v58  ;;  %v13402_v49 = vld [vmem:[%s17509_s3 + $0x3d0] sm:$0xff]  }
 0x293   : > { %12694 = vmatpush3.bf16.msra.mxu0 %v13371_v58  ;;  %v13387_v58 = vld [vmem:[%s17509_s3 + $0x358] sm:$0xff]  }
 0x294   : > { %12695 = vmatprep.subr.bf16.mxu0 %v13372_v7 }
 0x297   : > { %12696 = vmatpush3.bf16.msra.mxu0 %v13372_v7  ;;  %v13388_v7 = vld [vmem:[%s17509_s3 + $0x360] sm:$0xff]  }
 0x298   : > { %12697 = vmatprep.subr.bf16.mxu0 %v13373_v18 }
 0x29b   : > { %12698 = vmatpush3.bf16.msra.mxu0 %v13373_v18  ;;  %v13390_v18 = vld [vmem:[%s17509_s3 + $0x370] sm:$0xff]  }
 0x29c   : > { %12699 = vmatprep.subr.bf16.mxu0 %v13374_v60 }
 0x29f   : > { %12700 = vmatpush3.bf16.msra.mxu0 %v13374_v60  ;;  %v13391_v60 = vld [vmem:[%s17509_s3 + $0x378] sm:$0xff]  }
 0x2a0   : > { %12701 = vmatprep.subr.bf16.mxu0 %v13375_v33 }
 0x2a3   : > { %12702 = vmatpush3.bf16.msra.mxu0 %v13375_v33  ;;  %v13392_v33 = vld [vmem:[%s17509_s3 + $0x380] sm:$0xff]  }
 0x2a4   : > { %12711 = vmatprep.subr.bf16.mxu0 %v13376_v23 }
 0x2a6   : > { %12704 = vmatmul.mubr.bf16.vlgmr.msra.gmra.mrb[40].mxu0 %v3146_v57  ;;  %v3446_v57 = vpack.c.bf16 %v14297_v22, %v14296_v13  ;;  %v15342_v13 = vld [vmem:[#allocation2 + $0xa0] sm:$0xff] }
 0x2a7   : > { %12707 = vmatprep.mubr.bf16.mxu0 %v3147_v1  ;;  %12712 = vmatpush3.bf16.msra.mxu0 %v13376_v23  ;;  %v15265_v23 = vld [vmem:[#allocation2 + $0x73] sm:$0xff]  ;;  %v3749_v22 = vpack.c.bf16 %v15342_v13, %v15182_v62  ;;  %v15367_v62 = vld [vmem:[#allocation2 + $0x81] sm:$0xff] }
 0x2a8   : > { %12713 = vmatprep.subr.bf16.mxu0 %v13377_v35  ;;  %v3447_v1 = vpack.c.bf16 %v15265_v23, %v14298_v63  ;;  %v13418_v63 = vld [vmem:[%s17509_s3 + $0x450] sm:$0xff]  }
 0x2ab   : > { %12714 = vmatpush3.bf16.msra.mxu0 %v13377_v35  ;;  %v13393_v35 = vld [vmem:[%s17509_s3 + $0x388] sm:$0xff]  }
 0x2ac   : > { %12715 = vmatprep.subr.bf16.mxu0 %v13378_v41 }
 0x2ae   : > { %12708 = vmatmul.mubr.bf16.gmra.mrb[44].mxu0 %v3148_v15  ;;  %v3587_v15 = vld [vmem:[#allocation2 + $0x24] sm:$0xff] }
 0x2af   : > { %12716 = vmatpush3.bf16.msra.mxu0 %v13378_v41  ;;  %12727 = vmatprep.mubr.bf16.mxu0 %v3295_v47  ;;  %v13394_v41 = vld [vmem:[%s17509_s3 + $0x390] sm:$0xff]  }
 0x2b0   : > { %12717 = vmatprep.subr.bf16.mxu0 %v13379_v40  ;;  %v14299_v47 = vld [vmem:[#allocation2 + $0x34] sm:$0xff] }
 0x2b3   : > { %12718 = vmatpush3.bf16.msra.mxu0 %v13379_v40  ;;  %v3448_v40 = vpack.c.bf16 %v15274_v42, %v15117_v54  ;;  %v13397_v54 = vld [vmem:[%s17509_s3 + $0x3a8] sm:$0xff]  }
 0x2b4   : > { %12719 = vmatprep.subr.bf16.mxu0 %v13380_v31 }
 0x2b7   : > { %12720 = vmatpush3.bf16.msra.mxu0 %v13380_v31  ;;  %v3595_v31 = vpack.c.bf16 %v14299_v47, %v3587_v15  ;;  %v15405_v15 = vld [vmem:[#allocation2 + $0x82] sm:$0xff]  ;;  %v17542_v47 = vpack.c.bf16 %v14820_v12, %v14834_v2  ;;  %v17543_v12 = vpack.c.bf16 %v14760_v5, %v14777_v43  ;;  %v13431_v5 = vld [vmem:[%s17509_s3 + $0x4b8] sm:$0xff]  }
 0x2b8   : > { %12721 = vmatprep.subr.bf16.mxu0 %v13381_v61  ;;  %v13428_v2 = vld [vmem:[%s17509_s3 + $0x4a0] sm:$0xff]  }
 0x2b9   : > { %v13432_v43 = vld [vmem:[%s17509_s3 + $0x4c0] sm:$0xff]  }
 0x2bb   : > { %12722 = vmatpush3.bf16.msra.mxu0 %v13381_v61  ;;  %v13396_v61 = vld [vmem:[%s17509_s3 + $0x3a0] sm:$0xff]  }
 0x2bc   : > { %12723 = vmatprep.subr.bf16.mxu0 %v13382_v36 }
 0x2bf   : > { %12724 = vmatpush3.bf16.msra.mxu0 %v13382_v36  ;;  %v13398_v36 = vld [vmem:[%s17509_s3 + $0x3b0] sm:$0xff]  }
 0x2c0   : > { %12725 = vmatprep.subr.bf16.mxu0 %v13383_v9 }
 0x2c3   : > { %12726 = vmatpush3.bf16.msra.mxu0 %v13383_v9  ;;  %v13399_v9 = vld [vmem:[%s17509_s3 + $0x3b8] sm:$0xff]  }
 0x2c4   : > { %12735 = vmatprep.subr.bf16.mxu0 %v13384_v27 }
 0x2c6   : > { %12728 = vmatmul.mubr.bf16.vlgmr.msra.gmra.mrb[40].mxu0 %v3296_v19  ;;  %v14301_v19 = vld [vmem:[#allocation2 + $0x54] sm:$0xff] }
 0x2c7   : > { %12731 = vmatprep.mubr.bf16.mxu0 %v3297_v0  ;;  %12736 = vmatpush3.bf16.msra.mxu0 %v13384_v27  ;;  %v13400_v27 = vld [vmem:[%s17509_s3 + $0x3c0] sm:$0xff]  }
 0x2c8   : > { %12737 = vmatprep.subr.bf16.mxu0 %v13385_v56  ;;  %v14302_v0 = vld [vmem:[#allocation2 + $0x64] sm:$0xff] }
 0x2cb   : > { %12738 = vmatpush3.bf16.msra.mxu0 %v13385_v56  ;;  %v3596_v56 = vpack.c.bf16 %v14301_v19, %v14300_v16  ;;  %v17544_v19 = vpack.c.bf16 %v14829_v51, %v14842_v10  ;;  %v17545_v10 = vld [vmem:[#allocation3_spill] sm:$0xff]  ;;  %v17546_v51 = vld [vmem:[#allocation4_spill] sm:$0xff] }
 0x2cc   : > { %12739 = vmatprep.subr.bf16.mxu0 %v13386_v50 }
 0x2ce   : > { %12732 = vmatmul.mubr.bf16.gmra.mrb[44].mxu0 %v3298_v28  ;;  %v15305_v28 = vld [vmem:[#allocation2 + $0x94] sm:$0xff] }
 0x2cf   : > { %12740 = vmatpush3.bf16.msra.mxu0 %v13386_v50  ;;  %12751 = vmatprep.mubr.bf16.mxu0 %v3445_v39  ;;  %v3597_v50 = vpack.c.bf16 %v15296_v8, %v14302_v0  ;;  %v17538_v39 = vpack.c.bf16 %v14701_v44, %v14710_v52  ;;  %v13407_v44 = vld [vmem:[%s17509_s3 + $0x3f8] sm:$0xff]   ;;  %v13408_v52 = vld [vmem:[%s17509_s3 + $0x400] sm:$0xff]  }
 0x2d0   : > { %12741 = vmatprep.subr.bf16.mxu0 %v13387_v58 }
 0x2d3   : > { %12742 = vmatpush3.bf16.msra.mxu0 %v13387_v58  ;;  %v3598_v58 = vpack.c.bf16 %v15305_v28, %v15154_v48  ;;  %v13405_v48 = vld [vmem:[%s17509_s3 + $0x3e8] sm:$0xff]  }
 0x2d4   : > { %12743 = vmatprep.subr.bf16.mxu0 %v13388_v7 }
 0x2d7   : > { %12744 = vmatpush3.bf16.msra.mxu0 %v13388_v7  ;;  %v13404_v7 = vld [vmem:[%s17509_s3 + $0x3e0] sm:$0xff]  }
 0x2d8   : > { %12745 = vmatprep.subr.bf16.mxu0 %v13389_v34 }
 0x2db   : > { %12746 = vmatpush3.bf16.msra.mxu0 %v13389_v34  ;;  %v13406_v34 = vld [vmem:[%s17509_s3 + $0x3f0] sm:$0xff]  }
 0x2dc   : > { %12747 = vmatprep.subr.bf16.mxu0 %v13390_v18 }
 0x2df   : > { %12748 = vmatpush3.bf16.msra.mxu0 %v13390_v18  ;;  %v13409_v18 = vld [vmem:[%s17509_s3 + $0x408] sm:$0xff]  }
 0x2e0   : > { %12749 = vmatprep.subr.bf16.mxu0 %v13391_v60 }
 0x2e3   : > { %12750 = vmatpush3.bf16.msra.mxu0 %v13391_v60  ;;  %v17539_v60 = vpack.c.bf16 %v14766_v20, %v14764_v53  ;;  %v13411_v53 = vld [vmem:[%s17509_s3 + $0x418] sm:$0xff]   ;;  %v13412_v20 = vld [vmem:[%s17509_s3 + $0x420] sm:$0xff]  }
 0x2e4   : > { %12759 = vmatprep.subr.bf16.mxu0 %v13392_v33 }
 0x2e6   : > { %12752 = vmatmul.mubr.bf16.vlgmr.msra.gmra.mrb[40].mxu0 %v3446_v57  ;;  %v13417_v57 = vld [vmem:[%s17509_s3 + $0x448] sm:$0xff]  }
 0x2e7   : > { %12755 = vmatprep.mubr.bf16.mxu0 %v3447_v1  ;;  %12760 = vmatpush3.bf16.msra.mxu0 %v13392_v33  ;;  %v13410_v33 = vld [vmem:[%s17509_s3 + $0x410] sm:$0xff]   ;;  %v15380_v1 = vld [vmem:[#allocation2 + $0xa1] sm:$0xff] }
 0x2e8   : > { %12761 = vmatprep.subr.bf16.mxu0 %v13393_v35 }
 0x2eb   : > { %12762 = vmatpush3.bf16.msra.mxu0 %v13393_v35  ;;  %v3898_v35 = vpack.c.bf16 %v15367_v62, %v15203_v30  ;;  %v13419_v30 = vld [vmem:[%s17509_s3 + $0x458] sm:$0xff]  }
 0x2ec   : > { %12763 = vmatprep.subr.bf16.mxu0 %v13394_v41 }
 0x2ee   : > { %12756 = vmatmul.mubr.bf16.gmra.mrb[44].mxu0 %v3448_v40  ;;  %v13425_v40 = vld [vmem:[%s17509_s3 + $0x488] sm:$0xff]  }
 0x2ef   : > { %12764 = vmatpush3.bf16.msra.mxu0 %v13394_v41  ;;  %12775 = vmatprep.mubr.bf16.mxu0 %v3595_v31  ;;  %v3899_v41 = vpack.c.bf16 %v15380_v1, %v15212_v17  ;;  %v13422_v17 = vld [vmem:[%s17509_s3 + $0x470] sm:$0xff]  }
 0x2f0   : > { %12765 = vmatprep.subr.bf16.mxu0 %v13395_v32  ;;  %v13426_v31 = vld [vmem:[%s17509_s3 + $0x490] sm:$0xff]  }
 0x2f3   : > { %12766 = vmatpush3.bf16.msra.mxu0 %v13395_v32  ;;  %v4048_v32 = vpack.c.bf16 %v15405_v15, %v15234_v46  ;;  %v13427_v46 = vld [vmem:[%s17509_s3 + $0x498] sm:$0xff]  }
 0x2f4   : > { %12767 = vmatprep.subr.bf16.mxu0 %v13396_v61 }
 0x2f7   : > { %12768 = vmatpush3.bf16.msra.mxu0 %v13396_v61  ;;  %v15418_v61 = vld [vmem:[#allocation2 + $0xa2] sm:$0xff] }
 0x2f8   : > { %12769 = vmatprep.subr.bf16.mxu0 %v13397_v54 }
 0x2fb   : > { %12770 = vmatpush3.bf16.msra.mxu0 %v13397_v54  ;;  %v4049_v54 = vpack.c.bf16 %v15418_v61, %v15243_v24  ;;  %v13429_v24 = vld [vmem:[%s17509_s3 + $0x4a8] sm:$0xff]  }
 0x2fc   : > { %12771 = vmatprep.subr.bf16.mxu0 %v13398_v36 }
 0x2ff   : > { %12772 = vmatpush3.bf16.msra.mxu0 %v13398_v36  ;;  %v13430_v36 = vld [vmem:[%s17509_s3 + $0x4b0] sm:$0xff]  }
 0x300   : > { %12773 = vmatprep.subr.bf16.mxu0 %v13399_v9 }
 0x303   : > { %12774 = vmatpush3.bf16.msra.mxu0 %v13399_v9  ;;  %v15443_v9 = vld [vmem:[#allocation2 + $0x83] sm:$0xff] }
 0x304   : > { %12783 = vmatprep.subr.bf16.mxu0 %v13400_v27  ;;  %v4198_v16 = vpack.c.bf16 %v15443_v9, %v15265_v23  ;;  %v13435_v23 = vld [vmem:[%s17509_s3 + $0x4d8] sm:$0xff]  }
 0x306   : > { %12776 = vmatmul.mubr.bf16.vlgmr.msra.gmra.mrb[40].mxu0 %v3596_v56  ;;  %v13434_v56 = vld [vmem:[%s17509_s3 + $0x4d0] sm:$0xff]  }
 0x307   : > { %12779 = vmatprep.mubr.bf16.mxu0 %v3597_v50  ;;  %12784 = vmatpush3.bf16.msra.mxu0 %v13400_v27  ;;  %v13433_v27 = vld [vmem:[%s17509_s3 + $0x4c8] sm:$0xff]   ;;  %v17547_v50 = vpack.c.bf16 %v17545_v10, %v17546_v51  ;;  %v13458_v51 = vld [vmem:[%s17509_s3 + $0x590] sm:$0xff]  }
 0x308   : > { %12785 = vmatprep.subr.bf16.mxu0 %v13401_v21 }
 0x30b   : > { %12786 = vmatpush3.bf16.msra.mxu0 %v13401_v21  ;;  %v15456_v21 = vld [vmem:[#allocation2 + $0xa3] sm:$0xff] }
 0x30c   : > { %12787 = vmatprep.subr.bf16.mxu0 %v13402_v49  ;;  %v4199_v0 = vpack.c.bf16 %v15456_v21, %v15274_v42  ;;  %v13437_v42 = vld [vmem:[%s17509_s3 + $0x4e8] sm:$0xff]  }
 0x30e   : > { %12780 = vmatmul.mubr.bf16.gmra.mrb[44].mxu0 %v3598_v58  ;;  %v13438_v58 = vld [vmem:[%s17509_s3 + $0x4f0] sm:$0xff]  }
 0x30f   : > { %12788 = vmatpush3.bf16.msra.mxu0 %v13402_v49  ;;  %12799 = vmatprep.mubr.bf16.mxu0 %v17538_v39  ;;  %v13436_v49 = vld [vmem:[%s17509_s3 + $0x4e0] sm:$0xff]  }
 0x310   : > { %12789 = vmatprep.subr.bf16.mxu0 %v13403_v3  ;;  %v13440_v39 = vld [vmem:[%s17509_s3 + $0x500] sm:$0xff]  }
 0x313   : > { %12790 = vmatpush3.bf16.msra.mxu0 %v13403_v3  ;;  %v13439_v3 = vld [vmem:[%s17509_s3 + $0x4f8] sm:$0xff]  }
 0x314   : > { %12791 = vmatprep.subr.bf16.mxu0 %v13404_v7 }
 0x317   : > { %12792 = vmatpush3.bf16.msra.mxu0 %v13404_v7  ;;  %v15481_v7 = vld [vmem:[#allocation2 + $0x84] sm:$0xff] }
 0x318   : > { %12793 = vmatprep.subr.bf16.mxu0 %v13405_v48 }
 0x31b   : > { %12794 = vmatpush3.bf16.msra.mxu0 %v13405_v48  ;;  %v13441_v48 = vld [vmem:[%s17509_s3 + $0x508] sm:$0xff]  }
 0x31c   : > { %12795 = vmatprep.subr.bf16.mxu0 %v13406_v34 }
 0x31f   : > { %12796 = vmatpush3.bf16.msra.mxu0 %v13406_v34  ;;  %v4348_v34 = vpack.c.bf16 %v15481_v7, %v15296_v8  ;;  %v13444_v8 = vld [vmem:[%s17509_s3 + $0x520] sm:$0xff]  }
 0x320   : > { %12797 = vmatprep.subr.bf16.mxu0 %v13407_v44 }
 0x323   : > { %12798 = vmatpush3.bf16.msra.mxu0 %v13407_v44  ;;  %v17548_v44 = vpack.c.bf16 %v14836_v59, %v14848_v4  ;;  %v13443_v4 = vld [vmem:[%s17509_s3 + $0x518] sm:$0xff]  }
 0x324   : > { %12807 = vmatprep.subr.bf16.mxu0 %v13408_v52 }
 0x326   : > { %12800 = vmatmul.mubr.bf16.vlgmr.msra.gmra.mrb[40].mxu0 %v17539_v60  ;;  %v4489_v60 = vld [vmem:[#allocation2 + $0x40] sm:$0xff] }
 0x327   : > { %12803 = vmatprep.mubr.bf16.mxu0 %v3748_v29  ;;  %12808 = vmatpush3.bf16.msra.mxu0 %v13408_v52  ;;  %v13414_v29 = vld [vmem:[%s17509_s3 + $0x430] sm:$0xff]  }
 0x328   : > { %12809 = vmatprep.subr.bf16.mxu0 %v13409_v18  ;;  %v13442_v52 = vld [vmem:[%s17509_s3 + $0x510] sm:$0xff]  }
 0x32b   : > { %12810 = vmatpush3.bf16.msra.mxu0 %v13409_v18  ;;  %v15494_v18 = vld [vmem:[#allocation2 + $0xa4] sm:$0xff] }
 0x32c   : > { %12811 = vmatprep.subr.bf16.mxu0 %v13410_v33 }
 0x32e   : > { %12804 = vmatmul.mubr.bf16.gmra.mrb[44].mxu0 %v3749_v22  ;;  %v4349_v22 = vpack.c.bf16 %v15494_v18, %v15305_v28  ;;  %v13445_v28 = vld [vmem:[%s17509_s3 + $0x528] sm:$0xff]  }
 0x32f   : > { %12812 = vmatpush3.bf16.msra.mxu0 %v13410_v33  ;;  %12823 = vmatprep.mubr.bf16.mxu0 %v17540_v11  ;;  %v4490_v33 = vld [vmem:[#allocation2 + $0x50] sm:$0xff]  ;;  %v13447_v11 = vld [vmem:[%s17509_s3 + $0x538] sm:$0xff]  }
 0x330   : > { %12813 = vmatprep.subr.bf16.mxu0 %v13411_v53  ;;  %v4497_v59 = vpack.c.bf16 %v4490_v33, %v4489_v60  ;;  %v4792_v60 = vld [vmem:[#allocation2 + $0x72] sm:$0xff] }
 0x331   : > { %v4794_v33 = vld [vmem:[#allocation2 + $0x92] sm:$0xff] }
 0x333   : > { %12814 = vmatpush3.bf16.msra.mxu0 %v13411_v53  ;;  %v13446_v53 = vld [vmem:[%s17509_s3 + $0x530] sm:$0xff]  }
 0x334   : > { %12815 = vmatprep.subr.bf16.mxu0 %v13412_v20 }
 0x337   : > { %12816 = vmatpush3.bf16.msra.mxu0 %v13412_v20  ;;  %v13448_v20 = vld [vmem:[%s17509_s3 + $0x540] sm:$0xff]  }
 0x338   : > { %12817 = vmatprep.subr.bf16.mxu0 %v13413_v55 }
 0x33b   : > { %12818 = vmatpush3.bf16.msra.mxu0 %v13413_v55  ;;  %v4491_v55 = vld [vmem:[#allocation2 + $0x60] sm:$0xff] }
 0x33c   : > { %12819 = vmatprep.subr.bf16.mxu0 %v13414_v29 }
 0x33f   : > { %12820 = vmatpush3.bf16.msra.mxu0 %v13414_v29  ;;  %v4492_v29 = vld [vmem:[#allocation2 + $0x70] sm:$0xff] }
 0x340   : > { %12821 = vmatprep.subr.bf16.mxu0 %v13415_v37 }
 0x343   : > { %12822 = vmatpush3.bf16.msra.mxu0 %v13415_v37  ;;  %v4493_v37 = vld [vmem:[#allocation2 + $0x80] sm:$0xff] }
 0x344   : > { %12831 = vmatprep.subr.bf16.mxu0 %v13416_v14 }
 0x346   : > { %12824 = vmatmul.mubr.bf16.vlgmr.msra.gmra.mrb[40].mxu0 %v3897_v26  ;;  %v13421_v26 = vld [vmem:[%s17509_s3 + $0x468] sm:$0xff]  }
 0x347   : > { %12827 = vmatprep.mubr.bf16.mxu0 %v3898_v35  ;;  %12832 = vmatpush3.bf16.msra.mxu0 %v13416_v14  ;;  %v4494_v14 = vld [vmem:[#allocation2 + $0x90] sm:$0xff]  ;;  %v13449_v35 = vld [vmem:[%s17509_s3 + $0x548] sm:$0xff]  }
 0x348   : > { %12833 = vmatprep.subr.bf16.mxu0 %v13417_v57 }
 0x34b   : > { %12834 = vmatpush3.bf16.msra.mxu0 %v13417_v57  ;;  %v4498_v57 = vpack.c.bf16 %v4492_v29, %v4491_v55  ;;  %v13467_v55 = vld [vmem:[%s17509_s3 + $0x5d8] sm:$0xff]   ;;  %v13468_v29 = vld [vmem:[%s17509_s3 + $0x5e0] sm:$0xff]  }
 0x34c   : > { %12835 = vmatprep.subr.bf16.mxu0 %v13418_v63 }
 0x34e   : > { %12828 = vmatmul.mubr.bf16.gmra.mrb[44].mxu0 %v3899_v41  ;;  %v13450_v41 = vld [vmem:[%s17509_s3 + $0x550] sm:$0xff]  }
 0x34f   : > { %12836 = vmatpush3.bf16.msra.mxu0 %v13418_v63  ;;  %12847 = vmatprep.mubr.bf16.mxu0 %v17541_v25  ;;  %v4499_v63 = vpack.c.bf16 %v4494_v14, %v4493_v37  ;;  %v4639_v25 = vld [vmem:[#allocation2 + $0x41] sm:$0xff]  ;;  %v13470_v37 = vld [vmem:[%s17509_s3 + $0x5f0] sm:$0xff]   ;;  %v13471_v14 = vld [vmem:[%s17509_s3 + $0x5f8] sm:$0xff]  }
 0x350   : > { %12837 = vmatprep.subr.bf16.mxu0 %v13419_v30 }
 0x353   : > { %12838 = vmatpush3.bf16.msra.mxu0 %v13419_v30  ;;  %v4496_v30 = vld [vmem:[#allocation2 + $0xb0] sm:$0xff] }
 0x354   : > { %12839 = vmatprep.subr.bf16.mxu0 %v13420_v6 }
 0x357   : > { %12840 = vmatpush3.bf16.msra.mxu0 %v13420_v6  ;;  %v4640_v6 = vld [vmem:[#allocation2 + $0x51] sm:$0xff] }
 0x358   : > { %12841 = vmatprep.subr.bf16.mxu0 %v13421_v26 }
 0x35b   : > { %12842 = vmatpush3.bf16.msra.mxu0 %v13421_v26  ;;  %v4500_v26 = vpack.c.bf16 %v4496_v30, %v15342_v13  ;;  %v13485_v13 = vld [vmem:[%s17511_s5 + $0x124] ss:$16 sps:$4 sm:$0xff]  }
 0x35c   : > { %12843 = vmatprep.subr.bf16.mxu0 %v13422_v17 }
 0x35f   : > { %12844 = vmatpush3.bf16.msra.mxu0 %v13422_v17  ;;  %v13451_v17 = vld [vmem:[%s17509_s3 + $0x558] sm:$0xff]  }
 0x360   : > { %12845 = vmatprep.subr.bf16.mxu0 %v13423_v38 }
 0x363   : > { %12846 = vmatpush3.bf16.msra.mxu0 %v13423_v38  ;;  %v4647_v38 = vpack.c.bf16 %v4640_v6, %v4639_v25  ;;  %v13473_v25 = vld [vmem:[%s17509_s3 + $0x608] sm:$0xff]  }
 0x364   : > { %12855 = vmatprep.subr.bf16.mxu0 %v13424_v45 }
 0x366   : > { %12848 = vmatmul.mubr.bf16.vlgmr.msra.gmra.mrb[40].mxu0 %v17542_v47  ;;  %v13483_v47 = vld [vmem:[%s17511_s5 + $0x120] ss:$16 sps:$4 sm:$0xff]  }
 0x367   : > { %12851 = vmatprep.mubr.bf16.mxu0 %v4048_v32  ;;  %12856 = vmatpush3.bf16.msra.mxu0 %v13424_v45  ;;  %v13480_v45 = vld [vmem:[%s17511_s5 + $0x100] ss:$16 sps:$4 sm:$0xff]  }
 0x368   : > { %12857 = vmatprep.subr.bf16.mxu0 %v13425_v40  ;;  %v13452_v32 = vld [vmem:[%s17509_s3 + $0x560] sm:$0xff]  }
 0x36b   : > { %12858 = vmatpush3.bf16.msra.mxu0 %v13425_v40  ;;  %v13482_v40 = vld [vmem:[%s17511_s5 + $0x104] ss:$16 sps:$4 sm:$0xff]  }
 0x36c   : > { %12859 = vmatprep.subr.bf16.mxu0 %v13426_v31  ;;  %5489 = vmatprep.subr.bf16.mxu1 %v13482_v40 }
 0x36d   : > { %5490 = vmatpush1.bf16.msra.mxu1 %v13480_v45  ;;  %v5090_v45 = vld [vmem:[#allocation2 + $0x54] sm:$0xff] }
 0x36e   : > { %12852 = vmatmul.mubr.bf16.gmra.mrb[44].mxu0 %v4049_v54  ;;  %5491 = vmatprep.subr.bf16.mxu1 %v13485_v13  ;;  %v13453_v54 = vld [vmem:[%s17509_s3 + $0x568] sm:$0xff]   ;;  %v13475_v13 = vld [vmem:[%s17509_s3 + $0x618] sm:$0xff]  }
 0x36f   : > { %12860 = vmatpush3.bf16.msra.mxu0 %v13426_v31  ;;  %12871 = vmatprep.mubr.bf16.mxu0 %v17543_v12  ;;  %v13488_v31 = vld [vmem:[%s17511_s5 + $0x144] ss:$16 sps:$4 sm:$0xff]  }
 0x370   : > { %12861 = vmatprep.subr.bf16.mxu0 %v13427_v46  ;;  %v13491_v12 = vld [vmem:[%s17511_s5 + $0x164] ss:$16 sps:$4 sm:$0xff]  }
 0x371   : > { %5492 = vmatpush1.bf16.msra.mxu1 %v13483_v47  ;;  %v13478_v47 = vld [vmem:[%s17509_s3 + $0x630] sm:$0xff]  }
 0x372   : > { %5493 = vmatprep.subr.bf16.mxu1 %v13488_v31  ;;  %v13479_v31 = vld [vmem:[%s17509_s3 + $0x638] sm:$0xff]  }
 0x373   : > { %12862 = vmatpush3.bf16.msra.mxu0 %v13427_v46  ;;  %v13486_v46 = vld [vmem:[%s17511_s5 + $0x140] ss:$16 sps:$4 sm:$0xff]  }
 0x374   : > { %12863 = vmatprep.subr.bf16.mxu0 %v13428_v2 }
 0x375   : > { %5494 = vmatpush1.bf16.msra.mxu1 %v13486_v46  ;;  %v5091_v46 = vld [vmem:[#allocation2 + $0x64] sm:$0xff] }
 0x376   : > { %5495 = vmatprep.subr.bf16.mxu1 %v13491_v12  ;;  %v5092_v12 = vld [vmem:[#allocation2 + $0x74] sm:$0xff] }
 0x377   : > { %12864 = vmatpush3.bf16.msra.mxu0 %v13428_v2  ;;  %v13454_v2 = vld [vmem:[%s17509_s3 + $0x570] sm:$0xff]  }
 0x378   : > { %12865 = vmatprep.subr.bf16.mxu0 %v13429_v24 }
 0x37b   : > { %12866 = vmatpush3.bf16.msra.mxu0 %v13429_v24  ;;  %v13489_v24 = vld [vmem:[%s17511_s5 + $0x160] ss:$16 sps:$4 sm:$0xff]  }
 0x37c   : > { %12867 = vmatprep.subr.bf16.mxu0 %v13430_v36  ;;  %5496 = vmatpush1.bf16.msra.mxu1 %v13489_v24  ;;  %v13492_v24 = vld [vmem:[%s17511_s5 + $0xc08] ss:$16 sps:$4 sm:$0xff]  }
 0x37f   : > { %12868 = vmatpush3.bf16.msra.mxu0 %v13430_v36  ;;  %v13497_v36 = vld [vmem:[%s17511_s5 + $0x184] ss:$16 sps:$4 sm:$0xff]  }
 0x380   : > { %12869 = vmatprep.subr.bf16.mxu0 %v13431_v5  ;;  %5497 = vmatprep.subr.bf16.mxu1 %v13497_v36  ;;  %v5098_v36 = vpack.c.bf16 %v5092_v12, %v5091_v46  ;;  %v13539_v46 = vld [vmem:[%s17511_s5 + $0x14c] ss:$16 sps:$4 sm:$0xff]  }
 0x383   : > { %12870 = vmatpush3.bf16.msra.mxu0 %v13431_v5  ;;  %v13455_v5 = vld [vmem:[%s17509_s3 + $0x578] sm:$0xff]  }
 0x384   : > { %12879 = vmatprep.subr.bf16.mxu0 %v13432_v43 }
 0x386   : > { %12872 = vmatmul.mubr.bf16.vlgmr.msra.gmra.mrb[40].mxu0 %v17544_v19  ;;  %v4642_v19 = vld [vmem:[#allocation2 + $0x71] sm:$0xff] }
 0x387   : > { %12875 = vmatprep.mubr.bf16.mxu0 %v4198_v16  ;;  %12880 = vmatpush3.bf16.msra.mxu0 %v13432_v43  ;;  %v13495_v43 = vld [vmem:[%s17511_s5 + $0x180] ss:$16 sps:$4 sm:$0xff]  }
 0x388   : > { %12881 = vmatprep.subr.bf16.mxu0 %v13433_v27  ;;  %v4641_v16 = vld [vmem:[#allocation2 + $0x61] sm:$0xff]  ;;  %5498 = vmatpush1.bf16.msra.mxu1 %v13495_v43 }
 0x38b   : > { %12882 = vmatpush3.bf16.msra.mxu0 %v13433_v27  ;;  %v13456_v27 = vld [vmem:[%s17509_s3 + $0x580] sm:$0xff]  }
 0x38c   : > { %12883 = vmatprep.subr.bf16.mxu0 %v13434_v56 }
 0x38e   : > { %12876 = vmatmul.mubr.bf16.gmra.mrb[44].mxu0 %v4199_v0  ;;  %v4648_v0 = vpack.c.bf16 %v4642_v19, %v4641_v16  ;;  %v13503_v16 = vld [vmem:[%s17511_s5 + $0xc4c] ss:$16 sps:$4 sm:$0xff]   ;;  %v5096_v19 = vld [vmem:[#allocation2 + $0xb4] sm:$0xff] }
 0x38f   : > { %12884 = vmatpush3.bf16.msra.mxu0 %v13434_v56  ;;  %12895 = vmatprep.mubr.bf16.mxu0 %v17547_v50  ;;  %v4644_v56 = vld [vmem:[#allocation2 + $0x91] sm:$0xff] }
 0x390   : > { %12885 = vmatprep.subr.bf16.mxu0 %v13435_v23  ;;  %v4649_v10 = vpack.c.bf16 %v4644_v56, %v15367_v62  ;;  %v4646_v50 = vld [vmem:[#allocation2 + $0xb1] sm:$0xff] }
 0x391   : > { %v13501_v56 = vld [vmem:[%s17511_s5 + $0xc48] ss:$16 sps:$4 sm:$0xff]  }
 0x393   : > { %12886 = vmatpush3.bf16.msra.mxu0 %v13435_v23  ;;  %v13457_v23 = vld [vmem:[%s17509_s3 + $0x588] sm:$0xff]  }
 0x394   : > { %12887 = vmatprep.subr.bf16.mxu0 %v13436_v49 }
 0x397   : > { %12888 = vmatpush3.bf16.msra.mxu0 %v13436_v49  ;;  %v4789_v49 = vld [vmem:[#allocation2 + $0x42] sm:$0xff] }
 0x398   : > { %12889 = vmatprep.subr.bf16.mxu0 %v13437_v42 }
 0x39b   : > { %12890 = vmatpush3.bf16.msra.mxu0 %v13437_v42  ;;  %v4790_v42 = vld [vmem:[#allocation2 + $0x52] sm:$0xff] }
 0x39c   : > { %12891 = vmatprep.subr.bf16.mxu0 %v13438_v58  ;;  %v4797_v62 = vpack.c.bf16 %v4790_v42, %v4789_v49  ;;  %v13515_v49 = vld [vmem:[%s17511_s5 + $0xc8c] ss:$16 sps:$4 sm:$0xff]   ;;  %v13513_v42 = vld [vmem:[%s17511_s5 + $0xc88] ss:$16 sps:$4 sm:$0xff]  }
 0x39f   : > { %12892 = vmatpush3.bf16.msra.mxu0 %v13438_v58  ;;  %v4650_v58 = vpack.c.bf16 %v4646_v50, %v15380_v1  ;;  %v13461_v1 = vld [vmem:[%s17509_s3 + $0x5a8] sm:$0xff]   ;;  %v13512_v50 = vld [vmem:[%s17511_s5 + $0x1c4] ss:$16 sps:$4 sm:$0xff]  }
 0x3a0   : > { %12893 = vmatprep.subr.bf16.mxu0 %v13439_v3 }
 0x3a3   : > { %12894 = vmatpush3.bf16.msra.mxu0 %v13439_v3  ;;  %v13459_v3 = vld [vmem:[%s17509_s3 + $0x598] sm:$0xff]  }
 0x3a4   : > { %12903 = vmatprep.subr.bf16.mxu0 %v13440_v39 }
 0x3a6   : > { %12896 = vmatmul.mubr.bf16.vlgmr.msra.gmra.mrb[40].mxu0 %v17548_v44  ;;  %v13464_v44 = vld [vmem:[%s17509_s3 + $0x5c0] sm:$0xff]  }
 0x3a7   : > { %12899 = vmatprep.mubr.bf16.mxu0 %v4348_v34  ;;  %12904 = vmatpush3.bf16.msra.mxu0 %v13440_v39  ;;  %v13460_v39 = vld [vmem:[%s17509_s3 + $0x5a0] sm:$0xff]   ;;  %v13463_v34 = vld [vmem:[%s17509_s3 + $0x5b8] sm:$0xff]  }
 0x3a8   : > { %12905 = vmatprep.subr.bf16.mxu0 %v13441_v48 }
 0x3ab   : > { %12906 = vmatpush3.bf16.msra.mxu0 %v13441_v48  ;;  %v13462_v48 = vld [vmem:[%s17509_s3 + $0x5b0] sm:$0xff]  }
 0x3ac   : > { %12907 = vmatprep.subr.bf16.mxu0 %v13442_v52 }
 0x3ae   : > { %12900 = vmatmul.mubr.bf16.gmra.mrb[44].mxu0 %v4349_v22 }
 0x3af   : > { %12908 = vmatpush3.bf16.msra.mxu0 %v13442_v52  ;;  %12919 = vmatprep.mubr.bf16.mxu0 %v4497_v59  ;;  %v4791_v52 = vld [vmem:[#allocation2 + $0x62] sm:$0xff]  ;;  %v4799_v59 = vpack.c.bf16 %v4794_v33, %v15405_v15  ;;  %v13536_v33 = vld [vmem:[%s17511_s5 + $0xd0c] ss:$16 sps:$4 sm:$0xff]  }
 0x3b0   : > { %12909 = vmatprep.subr.bf16.mxu0 %v13443_v4  ;;  %v4798_v22 = vpack.c.bf16 %v4792_v60, %v4791_v52  ;;  %v14312_v52 = vmov 0   ;;  %v13528_v60 = vld [vmem:[%s17511_s5 + $0xce8] ss:$16 sps:$4 sm:$0xff]  }
 0x3b1   : > { %5521 = vmatprep.mubr.bf16.mxu1 %v14312_v52 }
 0x3b3   : > { %12910 = vmatpush3.bf16.msra.mxu0 %v13443_v4  ;;  %v13465_v4 = vld [vmem:[%s17509_s3 + $0x5c8] sm:$0xff]  }
 0x3b4   : > { %12911 = vmatprep.subr.bf16.mxu0 %v13444_v8 }
 0x3b7   : > { %12912 = vmatpush3.bf16.msra.mxu0 %v13444_v8  ;;  %v13466_v8 = vld [vmem:[%s17509_s3 + $0x5d0] sm:$0xff]  }
 0x3b8   : > { %12913 = vmatprep.subr.bf16.mxu0 %v13445_v28 }
 0x3bb   : > { %12914 = vmatpush3.bf16.msra.mxu0 %v13445_v28  ;;  %v4796_v28 = vld [vmem:[#allocation2 + $0xb2] sm:$0xff] }
 0x3bc   : > { %12915 = vmatprep.subr.bf16.mxu0 %v13446_v53 }
 0x3bf   : > { %12916 = vmatpush3.bf16.msra.mxu0 %v13446_v53  ;;  %v4939_v53 = vld [vmem:[#allocation2 + $0x43] sm:$0xff] }
 0x3c0   : > { %12917 = vmatprep.subr.bf16.mxu0 %v13447_v11 }
 0x3c3   : > { %12918 = vmatpush3.bf16.msra.mxu0 %v13447_v11  ;;  %v4940_v11 = vld [vmem:[#allocation2 + $0x53] sm:$0xff] }
 0x3c4   : > { %12927 = vmatprep.subr.bf16.mxu0 %v13448_v20  ;;  %v4947_v15 = vpack.c.bf16 %v4940_v11, %v4939_v53 }
 0x3c6   : > { %12920 = vmatmul.mubr.bf16.vlgmr.msra.gmra.mrb[40].mxu0 %v4498_v57  ;;  %v13472_v57 = vld [vmem:[%s17509_s3 + $0x600] sm:$0xff]  }
 0x3c7   : > { %12923 = vmatprep.mubr.bf16.mxu0 %v4499_v63  ;;  %12928 = vmatpush3.bf16.msra.mxu0 %v13448_v20  ;;  %v4800_v20 = vpack.c.bf16 %v4796_v28, %v15418_v61  ;;  %v13469_v61 = vld [vmem:[%s17509_s3 + $0x5e8] sm:$0xff]   ;;  %v4942_v63 = vld [vmem:[#allocation2 + $0x73] sm:$0xff] }
 0x3c8   : > { %12929 = vmatprep.subr.bf16.mxu0 %v13449_v35 }
 0x3cb   : > { %12930 = vmatpush3.bf16.msra.mxu0 %v13449_v35  ;;  %v4941_v35 = vld [vmem:[#allocation2 + $0x63] sm:$0xff] }
 0x3cc   : > { %12931 = vmatprep.subr.bf16.mxu0 %v13450_v41  ;;  %v4948_v30 = vpack.c.bf16 %v4942_v63, %v4941_v35 }
 0x3ce   : > { %12924 = vmatmul.mubr.bf16.gmra.mrb[44].mxu0 %v4500_v26  ;;  %v13474_v26 = vld [vmem:[%s17509_s3 + $0x610] sm:$0xff]  }
 0x3cf   : > { %12932 = vmatpush3.bf16.msra.mxu0 %v13450_v41  ;;  %12943 = vmatprep.mubr.bf16.mxu0 %v4647_v38  ;;  %v4944_v41 = vld [vmem:[#allocation2 + $0x93] sm:$0xff]  ;;  %v5089_v38 = vld [vmem:[#allocation2 + $0x44] sm:$0xff] }
 0x3d0   : > { %12933 = vmatprep.subr.bf16.mxu0 %v13451_v17  ;;  %v4949_v6 = vpack.c.bf16 %v4944_v41, %v15443_v9  ;;  %v5097_v9 = vpack.c.bf16 %v5090_v45, %v5089_v38 }
 0x3d3   : > { %12934 = vmatpush3.bf16.msra.mxu0 %v13451_v17  ;;  %v4946_v17 = vld [vmem:[#allocation2 + $0xb3] sm:$0xff] }
 0x3d4   : > { %12935 = vmatprep.subr.bf16.mxu0 %v13452_v32  ;;  %v4950_v40 = vpack.c.bf16 %v4946_v17, %v15456_v21  ;;  %v13477_v21 = vld [vmem:[%s17509_s3 + $0x628] sm:$0xff]  }
 0x3d7   : > { %12936 = vmatpush3.bf16.msra.mxu0 %v13452_v32  ;;  %v13476_v32 = vld [vmem:[%s17509_s3 + $0x620] sm:$0xff]  }
 0x3d8   : > { %12937 = vmatprep.subr.bf16.mxu0 %v13453_v54 }
 0x3db   : > { %12938 = vmatpush3.bf16.msra.mxu0 %v13453_v54  ;;  %v13494_v54 = vld [vmem:[%s17511_s5 + $0xc0c] ss:$16 sps:$4 sm:$0xff]  }
 0x3dc   : > { %12939 = vmatprep.subr.bf16.mxu0 %v13454_v2 }
 0x3df   : > { %12940 = vmatpush3.bf16.msra.mxu0 %v13454_v2  ;;  %v5094_v2 = vld [vmem:[#allocation2 + $0x94] sm:$0xff] }
 0x3e0   : > { %12941 = vmatprep.subr.bf16.mxu0 %v13455_v5  ;;  %v5099_v43 = vpack.c.bf16 %v5094_v2, %v15481_v7  ;;  %v5100_v7 = vpack.c.bf16 %v5096_v19, %v15494_v18  ;;  %v13509_v18 = vld [vmem:[%s17511_s5 + $0xc6c] ss:$16 sps:$4 sm:$0xff]  }
 0x3e1   : > { %v13542_v2 = vld [vmem:[%s17511_s5 + $0xd2c] ss:$16 sps:$4 sm:$0xff]  }
 0x3e2   : > { %v13551_v19 = vld [vmem:[%s17511_s5 + $0x18c] ss:$16 sps:$4 sm:$0xff]  }
 0x3e3   : > { %12942 = vmatpush3.bf16.msra.mxu0 %v13455_v5  ;;  %v13500_v5 = vld [vmem:[%s17511_s5 + $0xc2c] ss:$16 sps:$4 sm:$0xff]  }
 0x3e4   : > { %12951 = vmatprep.subr.bf16.mxu0 %v13456_v27 }
 0x3e6   : > { %12944 = vmatmul.mubr.bf16.vlgmr.msra.gmra.mrb[40].mxu0 %v4648_v0  ;;  %v13504_v0 = vld [vmem:[%s17511_s5 + $0x1a0] ss:$16 sps:$4 sm:$0xff]  }
 0x3e7   : > { %12947 = vmatprep.mubr.bf16.mxu0 %v4649_v10  ;;  %12952 = vmatpush3.bf16.msra.mxu0 %v13456_v27  ;;  %v13498_v27 = vld [vmem:[%s17511_s5 + $0xc28] ss:$16 sps:$4 sm:$0xff]  }
 0x3e8   : > { %12953 = vmatprep.subr.bf16.mxu0 %v13457_v23  ;;  %v13507_v10 = vld [vmem:[%s17511_s5 + $0xc68] ss:$16 sps:$4 sm:$0xff]  }
 0x3eb   : > { %12954 = vmatpush3.bf16.msra.mxu0 %v13457_v23  ;;  %v13506_v23 = vld [vmem:[%s17511_s5 + $0x1a4] ss:$16 sps:$4 sm:$0xff]  }
 0x3ec   : > { %12955 = vmatprep.subr.bf16.mxu0 %v13458_v51  ;;  %5499 = vmatprep.subr.bf16.mxu1 %v13506_v23  ;;  %v13557_v23 = vld [vmem:[%s17511_s5 + $0x1ac] ss:$16 sps:$4 sm:$0xff]  }
 0x3ed   : > { %5500 = vmatpush1.bf16.msra.mxu1 %v13504_v0  ;;  %v13552_v0 = vld [vmem:[%s17511_s5 + $0xd68] ss:$16 sps:$4 sm:$0xff]  }
 0x3ee   : > { %12948 = vmatmul.mubr.bf16.gmra.mrb[44].mxu0 %v4650_v58  ;;  %5501 = vmatprep.subr.bf16.mxu1 %v13512_v50  ;;  %v13516_v58 = vld [vmem:[%s17511_s5 + $0xca8] ss:$16 sps:$4 sm:$0xff]   ;;  %v13563_v50 = vld [vmem:[%s17511_s5 + $0x1cc] ss:$16 sps:$4 sm:$0xff]  }
 0x3ef   : > { %12956 = vmatpush3.bf16.msra.mxu0 %v13458_v51  ;;  %12967 = vmatprep.mubr.bf16.mxu0 %v4797_v62  ;;  %v13510_v51 = vld [vmem:[%s17511_s5 + $0x1c0] ss:$16 sps:$4 sm:$0xff]  }
 0x3f0   : > { %12957 = vmatprep.subr.bf16.mxu0 %v13459_v3  ;;  %v13519_v62 = vld [vmem:[%s17511_s5 + $0x1e0] ss:$16 sps:$4 sm:$0xff]  }
 0x3f1   : > { %5502 = vmatpush1.bf16.msra.mxu1 %v13510_v51  ;;  %v13558_v51 = vld [vmem:[%s17511_s5 + $0xd88] ss:$16 sps:$4 sm:$0xff]  }
 0x3f3   : > { %12958 = vmatpush3.bf16.msra.mxu0 %v13459_v3  ;;  %v13518_v3 = vld [vmem:[%s17511_s5 + $0xcac] ss:$16 sps:$4 sm:$0xff]  }
 0x3f4   : > { %12959 = vmatprep.subr.bf16.mxu0 %v13460_v39 }
 0x3f7   : > { %12960 = vmatpush3.bf16.msra.mxu0 %v13460_v39  ;;  %v13521_v39 = vld [vmem:[%s17511_s5 + $0x1e4] ss:$16 sps:$4 sm:$0xff]  }
 0x3f8   : > { %12961 = vmatprep.subr.bf16.mxu0 %v13461_v1  ;;  %5503 = vmatprep.subr.bf16.mxu1 %v13521_v39  ;;  %v13567_v39 = vld [vmem:[%s17511_s5 + $0x1e8] ss:$16 sps:$4 sm:$0xff]  }
 0x3f9   : > { %5504 = vmatpush1.bf16.msra.mxu1 %v13519_v62  ;;  %v13572_v62 = vld [vmem:[%s17511_s5 + $0xdcc] ss:$16 sps:$4 sm:$0xff]  }
 0x3fb   : > { %12962 = vmatpush3.bf16.msra.mxu0 %v13461_v1  ;;  %v13524_v1 = vld [vmem:[%s17511_s5 + $0xccc] ss:$16 sps:$4 sm:$0xff]  }
 0x3fc   : > { %12963 = vmatprep.subr.bf16.mxu0 %v13462_v48 }
 0x3ff   : > { %12964 = vmatpush3.bf16.msra.mxu0 %v13462_v48  ;;  %v13522_v48 = vld [vmem:[%s17511_s5 + $0xcc8] ss:$16 sps:$4 sm:$0xff]  }
 0x400   : > { %12965 = vmatprep.subr.bf16.mxu0 %v13463_v34 }
 0x403   : > { %12966 = vmatpush3.bf16.msra.mxu0 %v13463_v34  ;;  %v13527_v34 = vld [vmem:[%s17511_s5 + $0x10c] ss:$16 sps:$4 sm:$0xff]  }
 0x404   : > { %12975 = vmatprep.subr.bf16.mxu0 %v13464_v44  ;;  %5530 = vmatprep.subr.bf16.mxu1 %v13527_v34  ;;  %v13578_v34 = vld [vmem:[%s17511_s5 + $0xdec] ss:$16 sps:$4 sm:$0xff]  }
 0x406   : > { %12968 = vmatmul.mubr.bf16.vlgmr.msra.gmra.mrb[40].mxu0 %v4798_v22  ;;  %v10884_v22 = vld [vmem:[%s17510_s4] ss:$0 sm:$0xff] }
 0x407   : > { %12971 = vmatprep.mubr.bf16.mxu0 %v4799_v59  ;;  %12976 = vmatpush3.bf16.msra.mxu0 %v13464_v44  ;;  %v13530_v44 = vld [vmem:[%s17511_s5 + $0xcec] ss:$16 sps:$4 sm:$0xff]  }
 0x408   : > { %12977 = vmatprep.subr.bf16.mxu0 %v13465_v4 }
 0x40b   : > { %12978 = vmatpush3.bf16.msra.mxu0 %v13465_v4 }
 0x40c   : > { %12979 = vmatprep.subr.bf16.mxu0 %v13466_v8 }
 0x40e   : > { %12972 = vmatmul.mubr.bf16.gmra.mrb[44].mxu0 %v4800_v20 }
 0x40f   : > { %12980 = vmatpush3.bf16.msra.mxu0 %v13466_v8  ;;  %12991 = vmatprep.mubr.bf16.mxu0 %v4947_v15 }
 0x410   : > { %12981 = vmatprep.subr.bf16.mxu0 %v13467_v55 }
 0x413   : > { %12982 = vmatpush3.bf16.msra.mxu0 %v13467_v55 }
 0x414   : > { %12983 = vmatprep.subr.bf16.mxu0 %v13468_v29 }
 0x417   : > { %12984 = vmatpush3.bf16.msra.mxu0 %v13468_v29 }
 0x418   : > { %12985 = vmatprep.subr.bf16.mxu0 %v13469_v61 }
 0x41b   : > { %12986 = vmatpush3.bf16.msra.mxu0 %v13469_v61 }
 0x41c   : > { %12987 = vmatprep.subr.bf16.mxu0 %v13470_v37 }
 0x41f   : > { %12988 = vmatpush3.bf16.msra.mxu0 %v13470_v37 }
 0x420   : > { %12989 = vmatprep.subr.bf16.mxu0 %v13471_v14 }
 0x423   : > { %12990 = vmatpush3.bf16.msra.mxu0 %v13471_v14 }
 0x424   : > { %12999 = vmatprep.subr.bf16.mxu0 %v13472_v57 }
 0x426   : > { %12992 = vmatmul.mubr.bf16.vlgmr.msra.gmra.mrb[40].mxu0 %v4948_v30 }
 0x427   : > { %12995 = vmatprep.mubr.bf16.mxu0 %v4949_v6  ;;  %13000 = vmatpush3.bf16.msra.mxu0 %v13472_v57 }
 0x428   : > { %13001 = vmatprep.subr.bf16.mxu0 %v13473_v25 }
 0x42b   : > { %13002 = vmatpush3.bf16.msra.mxu0 %v13473_v25 }
 0x42c   : > { %13003 = vmatprep.subr.bf16.mxu0 %v13474_v26 }
 0x42e   : > { %12996 = vmatmul.mubr.bf16.gmra.mrb[44].mxu0 %v4950_v40 }
 0x42f   : > { %13004 = vmatpush3.bf16.msra.mxu0 %v13474_v26  ;;  %13015 = vmatprep.mubr.bf16.mxu0 %v5097_v9 }
 0x430   : > { %13005 = vmatprep.subr.bf16.mxu0 %v13475_v13 }
 0x433   : > { %13006 = vmatpush3.bf16.msra.mxu0 %v13475_v13  ;;  %v13525_v13 = vld [vmem:[%s17511_s5 + $0x108] ss:$16 sps:$4 sm:$0xff]  }
 0x434   : > { %13007 = vmatprep.subr.bf16.mxu0 %v13476_v32 }
 0x437   : > { %13008 = vmatpush3.bf16.msra.mxu0 %v13476_v32  ;;  %v13533_v32 = vld [vmem:[%s17511_s5 + $0x12c] ss:$16 sps:$4 sm:$0xff]  }
 0x438   : > { %13009 = vmatprep.subr.bf16.mxu0 %v13477_v21 }
 0x43b   : > { %13010 = vmatpush3.bf16.msra.mxu0 %v13477_v21 }
 0x43c   : > { %13011 = vmatprep.subr.bf16.mxu0 %v13478_v47 }
 0x43f   : > { %13012 = vmatpush3.bf16.msra.mxu0 %v13478_v47 }
 0x440   : > { %13013 = vmatprep.subr.bf16.mxu0 %v13479_v31 }
 0x443   : > { %13014 = vmatpush3.bf16.msra.mxu0 %v13479_v31  ;;  %v13531_v31 = vld [vmem:[%s17511_s5 + $0x128] ss:$16 sps:$4 sm:$0xff]  }
 0x444   : > { %8876 = vmatprep.subr.bf16.mxu0 %v13494_v54  ;;  %v13534_v54 = vld [vmem:[%s17511_s5 + $0xd08] ss:$16 sps:$4 sm:$0xff]  }
 0x446   : > { %13016 = vmatmul.mubr.bf16.vlgmr.msra.gmra.mrb[40].mxu0 %v5098_v36  ;;  %v13540_v36 = vld [vmem:[%s17511_s5 + $0xd28] ss:$16 sps:$4 sm:$0xff]  }
 0x447   : > { %13019 = vmatprep.mubr.bf16.mxu0 %v5099_v43  ;;  %8877 = vmatpush1.bf16.msra.mxu0 %v13492_v24  ;;  %v13537_v24 = vld [vmem:[%s17511_s5 + $0x148] ss:$16 sps:$4 sm:$0xff]   ;;  %v13548_v43 = vld [vmem:[%s17511_s5 + $0xd4c] ss:$16 sps:$4 sm:$0xff]  }
 0x448   : > { %8878 = vmatprep.subr.bf16.mxu0 %v13500_v5  ;;  %v13545_v5 = vld [vmem:[%s17511_s5 + $0x16c] ss:$16 sps:$4 sm:$0xff]  }
 0x44b   : > { %8879 = vmatpush1.bf16.msra.mxu0 %v13498_v27  ;;  %v13543_v27 = vld [vmem:[%s17511_s5 + $0x168] ss:$16 sps:$4 sm:$0xff]  }
 0x44c   : > { %8880 = vmatprep.subr.bf16.mxu0 %v13503_v16  ;;  %v13546_v16 = vld [vmem:[%s17511_s5 + $0xd48] ss:$16 sps:$4 sm:$0xff]  }
 0x44e   : > { %13020 = vmatmul.mubr.bf16.gmra.mrb[44].mxu0 %v5100_v7  ;;  %v13549_v7 = vld [vmem:[%s17511_s5 + $0x188] ss:$16 sps:$4 sm:$0xff]  }
 0x44f   : > { %8881 = vmatpush1.bf16.msra.mxu0 %v13501_v56  ;;  %8908 = vmatprep.mubr.bf16.mxu0 %v14312_v52  ;;  %v13554_v56 = vld [vmem:[%s17511_s5 + $0xd6c] ss:$16 sps:$4 sm:$0xff]  }
 0x450   : > { %8882 = vmatprep.subr.bf16.mxu0 %v13509_v18  ;;  %v13555_v18 = vld [vmem:[%s17511_s5 + $0x1a8] ss:$16 sps:$4 sm:$0xff]  }
 0x453   : > { %8883 = vmatpush1.bf16.msra.mxu0 %v13507_v10  ;;  %v13560_v10 = vld [vmem:[%s17511_s5 + $0xd8c] ss:$16 sps:$4 sm:$0xff]  }
 0x454   : > { %8884 = vmatprep.subr.bf16.mxu0 %v13515_v49  ;;  %v13566_v49 = vld [vmem:[%s17511_s5 + $0xdac] ss:$16 sps:$4 sm:$0xff]  }
 0x457   : > { %8885 = vmatpush1.bf16.msra.mxu0 %v13513_v42  ;;  %v13561_v42 = vld [vmem:[%s17511_s5 + $0x1c8] ss:$16 sps:$4 sm:$0xff]  }
 0x458   : > { %8886 = vmatprep.subr.bf16.mxu0 %v13518_v3  ;;  %v13569_v3 = vld [vmem:[%s17511_s5 + $0x1ec] ss:$16 sps:$4 sm:$0xff]  }
 0x45b   : > { %8887 = vmatpush1.bf16.msra.mxu0 %v13516_v58  ;;  %v13564_v58 = vld [vmem:[%s17511_s5 + $0xda8] ss:$16 sps:$4 sm:$0xff]  }
 0x45c   : > { %8888 = vmatprep.subr.bf16.mxu0 %v13524_v1  ;;  %v13570_v1 = vld [vmem:[%s17511_s5 + $0xdc8] ss:$16 sps:$4 sm:$0xff]  }
 0x45f   : > { %8889 = vmatpush1.bf16.msra.mxu0 %v13522_v48  ;;  %v13575_v48 = vld [vmem:[%s17511_s5 + $0x4] ss:$16 sps:$4 sm:$0xff]  }
 0x460   : > { %8890 = vmatprep.subr.bf16.mxu0 %v13530_v44  ;;  %v13573_v44 = vld [vmem:[%s17511_s5] ss:$16 sps:$4 sm:$0xff]  }
 0x463   : > { %8891 = vmatpush1.bf16.msra.mxu0 %v13528_v60  ;;  %v13576_v60 = vld [vmem:[%s17511_s5 + $0xde8] ss:$16 sps:$4 sm:$0xff]  }
 0x464   : > { %9158 = vmatprep.subr.bf16.mxu0 %v13536_v33  ;;  %v13581_v33 = vld [vmem:[%s17511_s5 + $0x24] ss:$16 sps:$4 sm:$0xff]  }
 0x519   : > { %v13017_v4 = vpop.f32.mrb[40].mxu0 }
 0x51a   : > { %v5248_v59 = vadd.f32 %v13017_v4, %v10884_v22  ;;  %v5200_v8 = vpop.f32.mrb[41].mxu0  ;;  %v13579_v4 = vld [vmem:[%s17511_s5 + $0x20] ss:$16 sps:$4 sm:$0xff]  }
 0x51b   : > { %v13018_v28 = vpop.f32.mrb[42].mxu0  ;;  %v5246_v20 = vadd.f32 %v10884_v22, %v5200_v8  ;;  %v13587_v8 = vld [vmem:[%s17511_s5 + $0x44] ss:$16 sps:$4 sm:$0xff]  }
 0x51c   : > { %v5249_v53 = vadd.f32 %v13018_v28, %v10884_v22  ;;  %v5203_v11 = vpop.f32.mrb[43].mxu0 }
 0x51d   : > { %v5247_v55 = vadd.f32 %v10884_v22, %v5203_v11  ;;  %v13585_v11 = vld [vmem:[%s17511_s5 + $0x40] ss:$16 sps:$4 sm:$0xff]  }
 0x51e   : > { %v15725_v15 = vmax.f32 %v5248_v59, %v5249_v53  ;;  %v13582_v59 = vld [vmem:[%s17511_s5 + $0xe08] ss:$16 sps:$4 sm:$0xff]   ;;  %v13590_v53 = vld [vmem:[%s17511_s5 + $0xe2c] ss:$16 sps:$4 sm:$0xff]  }
 0x51f   : > { %v5254_v29 = vmax.f32 %v5246_v20, %v5247_v55  ;;  %v13588_v20 = vld [vmem:[%s17511_s5 + $0xe28] ss:$16 sps:$4 sm:$0xff]   ;;  %v13593_v55 = vld [vmem:[%s17511_s5 + $0x64] ss:$16 sps:$4 sm:$0xff]  }
 0x521   : > { %v5256_v61 = vrot.slane %v5254_v29, 1  ;;  %v13021_v37 = vpop.f32.mrb[44].mxu0 }
 0x522   : > { %v5216_v14 = vpop.f32.mrb[45].mxu0  ;;  %v5252_v41 = vadd.f32 %v13021_v37, %v10884_v22  ;;  %v13594_v37 = vld [vmem:[%s17511_s5 + $0xe48] ss:$16 sps:$4 sm:$0xff]  }
 0x523   : > { %v5258_v57 = vmax.f32 %v5254_v29, %v5256_v61  ;;  %v5250_v35 = vadd.f32 %v10884_v22, %v5216_v14  ;;  %v13022_v63 = vpop.f32.mrb[46].mxu0  ;;  %v13596_v29 = vld [vmem:[%s17511_s5 + $0xe4c] ss:$16 sps:$4 sm:$0xff]   ;;  %v13591_v61 = vld [vmem:[%s17511_s5 + $0x60] ss:$16 sps:$4 sm:$0xff]  }
 0x524   : > { %v5253_v30 = vadd.f32 %v13022_v63, %v10884_v22  ;;  %v5219_v25 = vpop.f32.mrb[47].mxu0  ;;  %v13599_v14 = vld [vmem:[%s17511_s5 + $0x84] ss:$16 sps:$4 sm:$0xff]   ;;  %v13600_v63 = vld [vmem:[%s17511_s5 + $0xe68] ss:$16 sps:$4 sm:$0xff]  }
 0x525   : > { %v5259_v6 = vmax.f32 %v5258_v57, 0.0  ;;  %v5251_v26 = vadd.f32 %v10884_v22, %v5219_v25  ;;  %v13584_v22 = vld [vmem:[%s17511_s5 + $0xe0c] ss:$16 sps:$4 sm:$0xff]   ;;  %v13603_v25 = vld [vmem:[%s17511_s5 + $0xa0] ss:$16 sps:$4 sm:$0xff]  }
 0x526   : > { %v8635_v17 = vmax.f32 %v5252_v41, %v5253_v30  ;;  %v13602_v57 = vld [vmem:[%s17511_s5 + $0xe6c] ss:$16 sps:$4 sm:$0xff]   ;;  %v13605_v41 = vld [vmem:[%s17511_s5 + $0xa4] ss:$16 sps:$4 sm:$0xff]  }
 0x527   : > { %v15727_v38 = vpack.c.bf16 %v5259_v6, %v5259_v6  ;;  %v15729_v45 = vmax.f32 %v5250_v35, %v5251_v26  ;;  %v13597_v35 = vld [vmem:[%s17511_s5 + $0x80] ss:$16 sps:$4 sm:$0xff]   ;;  %v13608_v30 = vld [vmem:[%s17511_s5 + $0xe8c] ss:$16 sps:$4 sm:$0xff]   ;;  %v13606_v6 = vld [vmem:[%s17511_s5 + $0xe88] ss:$16 sps:$4 sm:$0xff]  }
 0x528   : > { %v8637_v40 = vrot.slane %v8635_v17, 1  ;;  %v13611_v26 = vld [vmem:[%s17511_s5 + $0xc4] ss:$16 sps:$4 sm:$0xff]  }
 0x529   : > { %v5327_v9 = vrot.slane %v15727_v38, 1 }
 0x52a   : > { %v8639_v21 = vmax.f32 %v8635_v17, %v8637_v40  ;;  %v13614_v17 = vld [vmem:[%s17511_s5 + $0xeac] ss:$16 sps:$4 sm:$0xff]   ;;  %v13609_v40 = vld [vmem:[%s17511_s5 + $0xc0] ss:$16 sps:$4 sm:$0xff]  }
 0x52b   : > { %5522 = vmatmul.mubr.bf16.vlgmr.msra.gmra.mrb[56].mxu1 %v5327_v9 }
 0x52c   : > { %v8640_v47 = vmax.f32 %v8639_v21, 0.0  ;;  %5531 = vmatpush1.bf16.msra.mxu1 %v13525_v13  ;;  %5562 = vmatprep.mubr.bf16.mxu1 %v14312_v52  ;;  %v13612_v13 = vld [vmem:[%s17511_s5 + $0xea8] ss:$16 sps:$4 sm:$0xff]   ;;  %v13615_v21 = vld [vmem:[%s17511_s5 + $0xe0] ss:$16 sps:$4 sm:$0xff]  }
 0x52d   : > { %5532 = vmatprep.subr.bf16.mxu1 %v13533_v32  ;;  %v13620_v32 = vld [vmem:[%s17511_s5 + $0xecc] ss:$16 sps:$4 sm:$0xff]  }
 0x52e   : > { %v15750_v12 = vpack.c.bf16 %v8640_v47, %v8640_v47  ;;  %v13618_v47 = vld [vmem:[%s17511_s5 + $0xec8] ss:$16 sps:$4 sm:$0xff]  }
 0x530   : > { %5533 = vmatpush1.bf16.msra.mxu1 %v13531_v31  ;;  %8909 = vmatmul.mubr.bf16.vlgmr.msra.gmra.mrb[48].mxu0 %v15750_v12  ;;  %v8955_v28 = vrot.slane %v15750_v12, 1  ;;  %v13623_v31 = vld [vmem:[%s17511_s5 + $0xc] ss:$16 sps:$4 sm:$0xff]  }
 0x531   : > { %9159 = vmatpush1.bf16.msra.mxu0 %v13534_v54  ;;  %5534 = vmatprep.subr.bf16.mxu1 %v13539_v46  ;;  %v13626_v54 = vld [vmem:[%s17511_s5 + $0xeec] ss:$16 sps:$4 sm:$0xff]   ;;  %v13621_v46 = vld [vmem:[%s17511_s5 + $0x8] ss:$16 sps:$4 sm:$0xff]  }
 0x532   : > { %9160 = vmatprep.subr.bf16.mxu0 %v13542_v2  ;;  %9190 = vmatprep.mubr.bf16.mxu0 %v14312_v52  ;;  %v13624_v2 = vld [vmem:[%s17511_s5 + $0xee8] ss:$16 sps:$4 sm:$0xff]  }
 0x534   : > { %5535 = vmatpush1.bf16.msra.mxu1 %v13537_v24  ;;  %v13629_v24 = vld [vmem:[%s17511_s5 + $0x2c] ss:$16 sps:$4 sm:$0xff]  }
 0x535   : > { %9161 = vmatpush1.bf16.msra.mxu0 %v13540_v36  ;;  %5536 = vmatprep.subr.bf16.mxu1 %v13545_v5  ;;  %v13632_v36 = vld [vmem:[%s17511_s5 + $0xf0c] ss:$16 sps:$4 sm:$0xff]   ;;  %v13627_v5 = vld [vmem:[%s17511_s5 + $0x28] ss:$16 sps:$4 sm:$0xff]  }
 0x536   : > { %9162 = vmatprep.subr.bf16.mxu0 %v13548_v43  ;;  %v13630_v43 = vld [vmem:[%s17511_s5 + $0xf08] ss:$16 sps:$4 sm:$0xff]  }
 0x538   : > { %5537 = vmatpush1.bf16.msra.mxu1 %v13543_v27  ;;  %v13635_v27 = vld [vmem:[%s17511_s5 + $0x4c] ss:$16 sps:$4 sm:$0xff]  }
 0x539   : > { %9163 = vmatpush1.bf16.msra.mxu0 %v13546_v16  ;;  %5538 = vmatprep.subr.bf16.mxu1 %v13551_v19  ;;  %v9236_v16 = vrot.slane %v15750_v12, 2  ;;  %v13638_v19 = vld [vmem:[%s17511_s5 + $0xf2c] ss:$16 sps:$4 sm:$0xff]  }
 0x53a   : > { %9164 = vmatprep.subr.bf16.mxu0 %v13554_v56  ;;  %v13633_v56 = vld [vmem:[%s17511_s5 + $0x48] ss:$16 sps:$4 sm:$0xff]  }
 0x53c   : > { %5539 = vmatpush1.bf16.msra.mxu1 %v13549_v7  ;;  %v13636_v7 = vld [vmem:[%s17511_s5 + $0xf28] ss:$16 sps:$4 sm:$0xff]  }
 0x53d   : > { %9165 = vmatpush1.bf16.msra.mxu0 %v13552_v0  ;;  %5540 = vmatprep.subr.bf16.mxu1 %v13557_v23  ;;  %v13641_v0 = vld [vmem:[%s17511_s5 + $0x6c] ss:$16 sps:$4 sm:$0xff]  }
 0x53e   : > { %9166 = vmatprep.subr.bf16.mxu0 %v13560_v10  ;;  %v13644_v23 = vld [vmem:[%s17511_s5 + $0xf4c] ss:$16 sps:$4 sm:$0xff]   ;;  %v13639_v10 = vld [vmem:[%s17511_s5 + $0x68] ss:$16 sps:$4 sm:$0xff]  }
 0x540   : > { %5541 = vmatpush1.bf16.msra.mxu1 %v13555_v18  ;;  %v13642_v18 = vld [vmem:[%s17511_s5 + $0xf48] ss:$16 sps:$4 sm:$0xff]  }
 0x541   : > { %9167 = vmatpush1.bf16.msra.mxu0 %v13558_v51  ;;  %5542 = vmatprep.subr.bf16.mxu1 %v13563_v50  ;;  %v13647_v51 = vld [vmem:[%s17511_s5 + $0x8c] ss:$16 sps:$4 sm:$0xff]  }
 0x542   : > { %9168 = vmatprep.subr.bf16.mxu0 %v13566_v49  ;;  %v13650_v50 = vld [vmem:[%s17511_s5 + $0xf6c] ss:$16 sps:$4 sm:$0xff]   ;;  %v13645_v49 = vld [vmem:[%s17511_s5 + $0x88] ss:$16 sps:$4 sm:$0xff]  }
 0x544   : > { %5543 = vmatpush1.bf16.msra.mxu1 %v13561_v42  ;;  %v13648_v42 = vld [vmem:[%s17511_s5 + $0xf68] ss:$16 sps:$4 sm:$0xff]  }
 0x545   : > { %9169 = vmatpush1.bf16.msra.mxu0 %v13564_v58  ;;  %5544 = vmatprep.subr.bf16.mxu1 %v13569_v3  ;;  %v13653_v58 = vld [vmem:[%s17511_s5 + $0xac] ss:$16 sps:$4 sm:$0xff]  }
 0x546   : > { %9170 = vmatprep.subr.bf16.mxu0 %v13572_v62  ;;  %v13656_v3 = vld [vmem:[%s17511_s5 + $0xf8c] ss:$16 sps:$4 sm:$0xff]   ;;  %v13651_v62 = vld [vmem:[%s17511_s5 + $0xa8] ss:$16 sps:$4 sm:$0xff]  }
 0x548   : > { %5545 = vmatpush1.bf16.msra.mxu1 %v13567_v39  ;;  %v13654_v39 = vld [vmem:[%s17511_s5 + $0xf88] ss:$16 sps:$4 sm:$0xff]  }
 0x549   : > { %9171 = vmatpush1.bf16.msra.mxu0 %v13570_v1  ;;  %5731 = vmatprep.subr.bf16.mxu1 %v13575_v48  ;;  %v13659_v1 = vld [vmem:[%s17511_s5 + $0xcc] ss:$16 sps:$4 sm:$0xff]  }
 0x54a   : > { %9172 = vmatprep.subr.bf16.mxu0 %v13578_v34  ;;  %v13662_v48 = vld [vmem:[%s17511_s5 + $0xfac] ss:$16 sps:$4 sm:$0xff]   ;;  %v13657_v34 = vld [vmem:[%s17511_s5 + $0xc8] ss:$16 sps:$4 sm:$0xff]  }
 0x54b   : > { %5563 = vmatmul.mubr.bf16.vlgmr.msra.gmra.mrb[60].mxu1 %v5327_v9  ;;  %v13617_v9 = vld [vmem:[%s17511_s5 + $0xe4] ss:$16 sps:$4 sm:$0xff]  }
 0x54c   : > { %5732 = vmatpush1.bf16.msra.mxu1 %v13573_v44  ;;  %5763 = vmatprep.mubr.bf16.mxu1 %v14312_v52  ;;  %v13660_v44 = vld [vmem:[%s17511_s5 + $0xfa8] ss:$16 sps:$4 sm:$0xff]  }
 0x54d   : > { %9173 = vmatpush1.bf16.msra.mxu0 %v13576_v60  ;;  %5733 = vmatprep.subr.bf16.mxu1 %v13581_v33  ;;  %v13665_v60 = vld [vmem:[%s17511_s5 + $0xec] ss:$16 sps:$4 sm:$0xff]  }
 0x54e   : > { %9439 = vmatprep.subr.bf16.mxu0 %v13584_v22  ;;  %v13668_v33 = vld [vmem:[%s17511_s5 + $0xfcc] ss:$16 sps:$4 sm:$0xff]   ;;  %v13663_v22 = vld [vmem:[%s17511_s5 + $0xe8] ss:$16 sps:$4 sm:$0xff]  }
 0x550   : > { %5734 = vmatpush1.bf16.msra.mxu1 %v13579_v4  ;;  %9191 = vmatmul.mubr.bf16.vlgmr.msra.gmra.mrb[52].mxu0 %v8955_v28  ;;  %v13666_v4 = vld [vmem:[%s17511_s5 + $0xfc8] ss:$16 sps:$4 sm:$0xff]  }
 0x551   : > { %9440 = vmatpush1.bf16.msra.mxu0 %v13582_v59  ;;  %5735 = vmatprep.subr.bf16.mxu1 %v13587_v8  ;;  %v13671_v59 = vld [vmem:[%s17511_s5 + $0x204] ss:$16 sps:$4 sm:$0xff]   ;;  %v13674_v8 = vld [vmem:[%s17511_s5 + $0xfec] ss:$16 sps:$4 sm:$0xff]  }
 0x552   : > { %9441 = vmatprep.subr.bf16.mxu0 %v13590_v53  ;;  %9471 = vmatprep.mubr.bf16.mxu0 %v14312_v52  ;;  %v13669_v53 = vld [vmem:[%s17511_s5 + $0x200] ss:$16 sps:$4 sm:$0xff]  }
 0x554   : > { %5736 = vmatpush1.bf16.msra.mxu1 %v13585_v11  ;;  %v13672_v11 = vld [vmem:[%s17511_s5 + $0xfe8] ss:$16 sps:$4 sm:$0xff]  }
 0x555   : > { %9442 = vmatpush1.bf16.msra.mxu0 %v13588_v20  ;;  %5737 = vmatprep.subr.bf16.mxu1 %v13593_v55  ;;  %v13677_v20 = vld [vmem:[%s17511_s5 + $0x224] ss:$16 sps:$4 sm:$0xff]   ;;  %v13675_v55 = vld [vmem:[%s17511_s5 + $0x220] ss:$16 sps:$4 sm:$0xff]  }
 0x556   : > { %9443 = vmatprep.subr.bf16.mxu0 %v13596_v29  ;;  %v13680_v29 = vld [vmem:[%s17511_s5 + $0x244] ss:$16 sps:$4 sm:$0xff]  }
 0x558   : > { %5738 = vmatpush1.bf16.msra.mxu1 %v13591_v61  ;;  %v9517_v61 = vrot.slane %v15750_v12, 3 }
 0x559   : > { %9444 = vmatpush1.bf16.msra.mxu0 %v13594_v37  ;;  %5739 = vmatprep.subr.bf16.mxu1 %v13599_v14  ;;  %v13678_v37 = vld [vmem:[%s17511_s5 + $0x240] ss:$16 sps:$4 sm:$0xff]   ;;  %v13683_v14 = vld [vmem:[%s17511_s5 + $0x264] ss:$16 sps:$4 sm:$0xff]  }
 0x55a   : > { %9445 = vmatprep.subr.bf16.mxu0 %v13602_v57  ;;  %v13681_v57 = vld [vmem:[%s17511_s5 + $0x260] ss:$16 sps:$4 sm:$0xff]  }
 0x55c   : > { %5740 = vmatpush1.bf16.msra.mxu1 %v13597_v35  ;;  %v13686_v35 = vld [vmem:[%s17511_s5 + $0x284] ss:$16 sps:$4 sm:$0xff]  }
 0x55d   : > { %9446 = vmatpush1.bf16.msra.mxu0 %v13600_v63  ;;  %5741 = vmatprep.subr.bf16.mxu1 %v13605_v41  ;;  %v13684_v63 = vld [vmem:[%s17511_s5 + $0x280] ss:$16 sps:$4 sm:$0xff]   ;;  %v13689_v41 = vld [vmem:[%s17511_s5 + $0x2a4] ss:$16 sps:$4 sm:$0xff]  }
 0x55e   : > { %9447 = vmatprep.subr.bf16.mxu0 %v13608_v30  ;;  %v13687_v30 = vld [vmem:[%s17511_s5 + $0x2a0] ss:$16 sps:$4 sm:$0xff]  }
 0x560   : > { %5742 = vmatpush1.bf16.msra.mxu1 %v13603_v25  ;;  %v13692_v25 = vld [vmem:[%s17511_s5 + $0x2c4] ss:$16 sps:$4 sm:$0xff]  }
 0x561   : > { %9448 = vmatpush1.bf16.msra.mxu0 %v13606_v6  ;;  %5743 = vmatprep.subr.bf16.mxu1 %v13611_v26  ;;  %v13690_v6 = vld [vmem:[%s17511_s5 + $0x2c0] ss:$16 sps:$4 sm:$0xff]   ;;  %v13695_v26 = vld [vmem:[%s17511_s5 + $0x2e4] ss:$16 sps:$4 sm:$0xff]  }
 0x562   : > { %9449 = vmatprep.subr.bf16.mxu0 %v13614_v17  ;;  %v13693_v17 = vld [vmem:[%s17511_s5 + $0x2e0] ss:$16 sps:$4 sm:$0xff]  }
 0x564   : > { %5744 = vmatpush1.bf16.msra.mxu1 %v13609_v40  ;;  %v13698_v40 = vld [vmem:[%s17511_s5 + $0x20c] ss:$16 sps:$4 sm:$0xff]  }
 0x565   : > { %9450 = vmatpush1.bf16.msra.mxu0 %v13612_v13  ;;  %5745 = vmatprep.subr.bf16.mxu1 %v13617_v9  ;;  %v13696_v13 = vld [vmem:[%s17511_s5 + $0x208] ss:$16 sps:$4 sm:$0xff]   ;;  %v5846_v9 = vrot.slane %v15727_v38, 2 }
 0x566   : > { %9451 = vmatprep.subr.bf16.mxu0 %v13620_v32  ;;  %v13701_v32 = vld [vmem:[%s17511_s5 + $0x22c] ss:$16 sps:$4 sm:$0xff]  }
 0x568   : > { %5746 = vmatpush1.bf16.msra.mxu1 %v13615_v21  ;;  %v13699_v21 = vld [vmem:[%s17511_s5 + $0x228] ss:$16 sps:$4 sm:$0xff]  }
 0x569   : > { %9452 = vmatpush1.bf16.msra.mxu0 %v13618_v47  ;;  %5772 = vmatprep.subr.bf16.mxu1 %v13623_v31  ;;  %v13704_v47 = vld [vmem:[%s17511_s5 + $0x24c] ss:$16 sps:$4 sm:$0xff]   ;;  %v13702_v31 = vld [vmem:[%s17511_s5 + $0x248] ss:$16 sps:$4 sm:$0xff]  }
 0x56a   : > { %9453 = vmatprep.subr.bf16.mxu0 %v13626_v54  ;;  %v13707_v54 = vld [vmem:[%s17511_s5 + $0x26c] ss:$16 sps:$4 sm:$0xff]  }
 0x56b   : > { %5764 = vmatmul.mubr.bf16.vlgmr.msra.gmra.mrb[64].mxu1 %v15727_v38 }
 0x56c   : > { %5773 = vmatpush1.bf16.msra.mxu1 %v13621_v46  ;;  %5804 = vmatprep.mubr.bf16.mxu1 %v14312_v52  ;;  %v13705_v46 = vld [vmem:[%s17511_s5 + $0x268] ss:$16 sps:$4 sm:$0xff]  }
 0x56d   : > { %9454 = vmatpush1.bf16.msra.mxu0 %v13624_v2  ;;  %5774 = vmatprep.subr.bf16.mxu1 %v13629_v24  ;;  %v13710_v2 = vld [vmem:[%s17511_s5 + $0x28c] ss:$16 sps:$4 sm:$0xff]   ;;  %v13708_v24 = vld [vmem:[%s17511_s5 + $0x288] ss:$16 sps:$4 sm:$0xff]  }
 0x56e   : > { %9720 = vmatprep.subr.bf16.mxu0 %v13632_v36  ;;  %v13713_v36 = vld [vmem:[%s17511_s5 + $0x2ac] ss:$16 sps:$4 sm:$0xff]  }
 0x570   : > { %5775 = vmatpush1.bf16.msra.mxu1 %v13627_v5  ;;  %9472 = vmatmul.mubr.bf16.vlgmr.msra.gmra.mrb[56].mxu0 %v9236_v16  ;;  %v13711_v5 = vld [vmem:[%s17511_s5 + $0x2a8] ss:$16 sps:$4 sm:$0xff]  }
 0x571   : > { %9721 = vmatpush1.bf16.msra.mxu0 %v13630_v43  ;;  %5776 = vmatprep.subr.bf16.mxu1 %v13635_v27  ;;  %v13716_v43 = vld [vmem:[%s17511_s5 + $0x2cc] ss:$16 sps:$4 sm:$0xff]   ;;  %v13714_v27 = vld [vmem:[%s17511_s5 + $0x2c8] ss:$16 sps:$4 sm:$0xff]  }
 0x572   : > { %9722 = vmatprep.subr.bf16.mxu0 %v13638_v19  ;;  %9752 = vmatprep.mubr.bf16.mxu0 %v14312_v52  ;;  %v13719_v19 = vld [vmem:[%s17511_s5 + $0x2ec] ss:$16 sps:$4 sm:$0xff]  }
 0x574   : > { %5777 = vmatpush1.bf16.msra.mxu1 %v13633_v56  ;;  %v13717_v56 = vld [vmem:[%s17511_s5 + $0x2e8] ss:$16 sps:$4 sm:$0xff]  }
 0x575   : > { %9723 = vmatpush1.bf16.msra.mxu0 %v13636_v7  ;;  %5778 = vmatprep.subr.bf16.mxu1 %v13641_v0  ;;  %v13722_v7 = vld [vmem:[%s17511_s5 + $0x304] ss:$16 sps:$4 sm:$0xff]   ;;  %v13720_v0 = vld [vmem:[%s17511_s5 + $0x300] ss:$16 sps:$4 sm:$0xff]  }
 0x576   : > { %9724 = vmatprep.subr.bf16.mxu0 %v13644_v23  ;;  %v13725_v23 = vld [vmem:[%s17511_s5 + $0x324] ss:$16 sps:$4 sm:$0xff]  }
 0x578   : > { %5779 = vmatpush1.bf16.msra.mxu1 %v13639_v10  ;;  %v13723_v10 = vld [vmem:[%s17511_s5 + $0x320] ss:$16 sps:$4 sm:$0xff]  }
 0x579   : > { %9725 = vmatpush1.bf16.msra.mxu0 %v13642_v18  ;;  %5780 = vmatprep.subr.bf16.mxu1 %v13647_v51  ;;  %v13728_v18 = vld [vmem:[%s17511_s5 + $0x344] ss:$16 sps:$4 sm:$0xff]   ;;  %v13726_v51 = vld [vmem:[%s17511_s5 + $0x340] ss:$16 sps:$4 sm:$0xff]  }
 0x57a   : > { %9726 = vmatprep.subr.bf16.mxu0 %v13650_v50  ;;  %v13731_v50 = vld [vmem:[%s17511_s5 + $0x364] ss:$16 sps:$4 sm:$0xff]  }
 0x57c   : > { %5781 = vmatpush1.bf16.msra.mxu1 %v13645_v49  ;;  %v13729_v49 = vld [vmem:[%s17511_s5 + $0x360] ss:$16 sps:$4 sm:$0xff]  }
 0x57d   : > { %9727 = vmatpush1.bf16.msra.mxu0 %v13648_v42  ;;  %5782 = vmatprep.subr.bf16.mxu1 %v13653_v58  ;;  %v13734_v42 = vld [vmem:[%s17511_s5 + $0x384] ss:$16 sps:$4 sm:$0xff]   ;;  %v13732_v58 = vld [vmem:[%s17511_s5 + $0x380] ss:$16 sps:$4 sm:$0xff]  }
 0x57e   : > { %9728 = vmatprep.subr.bf16.mxu0 %v13656_v3  ;;  %v13737_v3 = vld [vmem:[%s17511_s5 + $0x3a4] ss:$16 sps:$4 sm:$0xff]  }
 0x580   : > { %5783 = vmatpush1.bf16.msra.mxu1 %v13651_v62  ;;  %v13735_v62 = vld [vmem:[%s17511_s5 + $0x3a0] ss:$16 sps:$4 sm:$0xff]  }
 0x581   : > { %9729 = vmatpush1.bf16.msra.mxu0 %v13654_v39  ;;  %5784 = vmatprep.subr.bf16.mxu1 %v13659_v1  ;;  %v13740_v39 = vld [vmem:[%s17511_s5 + $0x3c4] ss:$16 sps:$4 sm:$0xff]   ;;  %v13738_v1 = vld [vmem:[%s17511_s5 + $0x3c0] ss:$16 sps:$4 sm:$0xff]  }
 0x582   : > { %9730 = vmatprep.subr.bf16.mxu0 %v13662_v48  ;;  %v13743_v48 = vld [vmem:[%s17511_s5 + $0x3e4] ss:$16 sps:$4 sm:$0xff]  }
 0x584   : > { %5785 = vmatpush1.bf16.msra.mxu1 %v13657_v34  ;;  %v13741_v34 = vld [vmem:[%s17511_s5 + $0x3e0] ss:$16 sps:$4 sm:$0xff]  }
 0x585   : > { %9731 = vmatpush1.bf16.msra.mxu0 %v13660_v44  ;;  %5786 = vmatprep.subr.bf16.mxu1 %v13665_v60  ;;  %v13746_v44 = vld [vmem:[%s17511_s5 + $0x30c] ss:$16 sps:$4 sm:$0xff]   ;;  %v13744_v60 = vld [vmem:[%s17511_s5 + $0x308] ss:$16 sps:$4 sm:$0xff]  }
 0x586   : > { %9732 = vmatprep.subr.bf16.mxu0 %v13668_v33  ;;  %v6127_v33 = vrot.slane %v15727_v38, 3 }
 0x588   : > { %5787 = vmatpush1.bf16.msra.mxu1 %v13663_v22  ;;  %v13749_v22 = vld [vmem:[%s17511_s5 + $0x32c] ss:$16 sps:$4 sm:$0xff]  }
 0x589   : > { %9733 = vmatpush1.bf16.msra.mxu0 %v13666_v4  ;;  %6008 = vmatprep.subr.bf16.mxu1 %v13671_v59  ;;  %v13747_v4 = vld [vmem:[%s17511_s5 + $0x328] ss:$16 sps:$4 sm:$0xff]   ;;  %v13752_v59 = vld [vmem:[%s17511_s5 + $0x34c] ss:$16 sps:$4 sm:$0xff]  }
 0x58a   : > { %9734 = vmatprep.subr.bf16.mxu0 %v13674_v8  ;;  %v13755_v8 = vld [vmem:[%s17511_s5 + $0x36c] ss:$16 sps:$4 sm:$0xff]  }
 0x58b   : > { %5805 = vmatmul.mubr.bf16.vlgmr.msra.gmra.mrb[68].mxu1 %v15727_v38  ;;  %v13750_v38 = vld [vmem:[%s17511_s5 + $0x348] ss:$16 sps:$4 sm:$0xff]  }
 0x58c   : > { %6009 = vmatpush1.bf16.msra.mxu1 %v13669_v53  ;;  %6040 = vmatprep.mubr.bf16.mxu1 %v14312_v52  ;;  %v13753_v53 = vld [vmem:[%s17511_s5 + $0x368] ss:$16 sps:$4 sm:$0xff]  }
 0x58d   : > { %9735 = vmatpush1.bf16.msra.mxu0 %v13672_v11  ;;  %6010 = vmatprep.subr.bf16.mxu1 %v13677_v20  ;;  %v13758_v11 = vld [vmem:[%s17511_s5 + $0x38c] ss:$16 sps:$4 sm:$0xff]   ;;  %v13756_v20 = vld [vmem:[%s17511_s5 + $0x388] ss:$16 sps:$4 sm:$0xff]  }
 0x590   : > { %6011 = vmatpush1.bf16.msra.mxu1 %v13675_v55  ;;  %9753 = vmatmul.mubr.bf16.vlgmr.msra.gmra.mrb[60].mxu0 %v9517_v61  ;;  %v13761_v55 = vld [vmem:[%s17511_s5 + $0x3ac] ss:$16 sps:$4 sm:$0xff]  }
 0x591   : > { %6012 = vmatprep.subr.bf16.mxu1 %v13680_v29  ;;  %v13759_v29 = vld [vmem:[%s17511_s5 + $0x3a8] ss:$16 sps:$4 sm:$0xff]  }
 0x594   : > { %6013 = vmatpush1.bf16.msra.mxu1 %v13678_v37  ;;  %v13764_v37 = vld [vmem:[%s17511_s5 + $0x3cc] ss:$16 sps:$4 sm:$0xff]  }
 0x595   : > { %6014 = vmatprep.subr.bf16.mxu1 %v13683_v14 }
 0x598   : > { %6015 = vmatpush1.bf16.msra.mxu1 %v13681_v57 }
 0x599   : > { %6016 = vmatprep.subr.bf16.mxu1 %v13686_v35 }
 0x59c   : > { %6017 = vmatpush1.bf16.msra.mxu1 %v13684_v63  ;;  %v13762_v63 = vld [vmem:[%s17511_s5 + $0x3c8] ss:$16 sps:$4 sm:$0xff]  }
 0x59d   : > { %6018 = vmatprep.subr.bf16.mxu1 %v13689_v41 }
 0x5a0   : > { %6019 = vmatpush1.bf16.msra.mxu1 %v13687_v30  ;;  %v13767_v30 = vld [vmem:[%s17511_s5 + $0x3ec] ss:$16 sps:$4 sm:$0xff]  }
 0x5a1   : > { %6020 = vmatprep.subr.bf16.mxu1 %v13692_v25 }
 0x5a4   : > { %6021 = vmatpush1.bf16.msra.mxu1 %v13690_v6 }
 0x5a5   : > { %6022 = vmatprep.subr.bf16.mxu1 %v13695_v26  ;;  %v13765_v26 = vld [vmem:[%s17511_s5 + $0x3e8] ss:$16 sps:$4 sm:$0xff]  }
 0x5a8   : > { %6023 = vmatpush1.bf16.msra.mxu1 %v13693_v17 }
 0x5a9   : > { %6049 = vmatprep.subr.bf16.mxu1 %v13698_v40  ;;  %v13770_v40 = vld [vmem:[%s17511_s5 + $0x404] ss:$16 sps:$4 sm:$0xff]  }
 0x5ab   : > { %6041 = vmatmul.mubr.bf16.vlgmr.msra.gmra.mrb[72].mxu1 %v5846_v9 }
 0x5ac   : > { %6050 = vmatpush1.bf16.msra.mxu1 %v13696_v13  ;;  %6081 = vmatprep.mubr.bf16.mxu1 %v14312_v52 }
 0x5ad   : > { %6051 = vmatprep.subr.bf16.mxu1 %v13701_v32  ;;  %v13773_v32 = vld [vmem:[%s17511_s5 + $0x424] ss:$16 sps:$4 sm:$0xff]  }
 0x5b0   : > { %6052 = vmatpush1.bf16.msra.mxu1 %v13699_v21  ;;  %v13771_v21 = vld [vmem:[%s17511_s5 + $0x420] ss:$16 sps:$4 sm:$0xff]  }
 0x5b1   : > { %6053 = vmatprep.subr.bf16.mxu1 %v13704_v47  ;;  %v13776_v47 = vld [vmem:[%s17511_s5 + $0x444] ss:$16 sps:$4 sm:$0xff]  }
 0x5b4   : > { %6054 = vmatpush1.bf16.msra.mxu1 %v13702_v31  ;;  %v13774_v31 = vld [vmem:[%s17511_s5 + $0x440] ss:$16 sps:$4 sm:$0xff]  }
 0x5b5   : > { %6055 = vmatprep.subr.bf16.mxu1 %v13707_v54  ;;  %v13779_v54 = vld [vmem:[%s17511_s5 + $0x464] ss:$16 sps:$4 sm:$0xff]  }
 0x5b8   : > { %6056 = vmatpush1.bf16.msra.mxu1 %v13705_v46  ;;  %v13777_v46 = vld [vmem:[%s17511_s5 + $0x460] ss:$16 sps:$4 sm:$0xff]  }
 0x5b9   : > { %6057 = vmatprep.subr.bf16.mxu1 %v13710_v2  ;;  %v13782_v2 = vld [vmem:[%s17511_s5 + $0x484] ss:$16 sps:$4 sm:$0xff]  }
 0x5bc   : > { %6058 = vmatpush1.bf16.msra.mxu1 %v13708_v24  ;;  %v13780_v24 = vld [vmem:[%s17511_s5 + $0x480] ss:$16 sps:$4 sm:$0xff]  }
 0x5bd   : > { %6059 = vmatprep.subr.bf16.mxu1 %v13713_v36  ;;  %v13785_v36 = vld [vmem:[%s17511_s5 + $0x4a4] ss:$16 sps:$4 sm:$0xff]  }
 0x5c0   : > { %6060 = vmatpush1.bf16.msra.mxu1 %v13711_v5  ;;  %v13783_v5 = vld [vmem:[%s17511_s5 + $0x4a0] ss:$16 sps:$4 sm:$0xff]  }
 0x5c1   : > { %6061 = vmatprep.subr.bf16.mxu1 %v13716_v43  ;;  %v6377_v43 = vrot.slane %v15725_v15, 1 }
 0x5c4   : > { %6062 = vmatpush1.bf16.msra.mxu1 %v13714_v27  ;;  %v13788_v27 = vld [vmem:[%s17511_s5 + $0x4c4] ss:$16 sps:$4 sm:$0xff]  }
 0x5c5   : > { %6063 = vmatprep.subr.bf16.mxu1 %v13719_v19 }
 0x5c8   : > { %6064 = vmatpush1.bf16.msra.mxu1 %v13717_v56 }
 0x5c9   : > { %6289 = vmatprep.subr.bf16.mxu1 %v13722_v7 }
 0x5cb   : > { %6082 = vmatmul.mubr.bf16.vlgmr.msra.gmra.mrb[76].mxu1 %v5846_v9  ;;  %v13768_v9 = vld [vmem:[%s17511_s5 + $0x400] ss:$16 sps:$4 sm:$0xff]  }
 0x5cc   : > { %6290 = vmatpush1.bf16.msra.mxu1 %v13720_v0  ;;  %6321 = vmatprep.mubr.bf16.mxu1 %v14312_v52  ;;  %v13786_v0 = vld [vmem:[%s17511_s5 + $0x4c0] ss:$16 sps:$4 sm:$0xff]  }
 0x5cd   : > { %6291 = vmatprep.subr.bf16.mxu1 %v13725_v23  ;;  %v6379_v23 = vmax.f32 %v15725_v15, %v6377_v43  ;;  %v13794_v15 = vld [vmem:[%s17511_s5 + $0x40c] ss:$16 sps:$4 sm:$0xff]  }
 0x5d0   : > { %6292 = vmatpush1.bf16.msra.mxu1 %v13723_v10 }
 0x5d1   : > { %6293 = vmatprep.subr.bf16.mxu1 %v13728_v18  ;;  %v13791_v18 = vld [vmem:[%s17511_s5 + $0x4e4] ss:$16 sps:$4 sm:$0xff]  }
 0x5d4   : > { %6294 = vmatpush1.bf16.msra.mxu1 %v13726_v51 }
 0x5d5   : > { %6295 = vmatprep.subr.bf16.mxu1 %v13731_v50 }
 0x5d8   : > { %6296 = vmatpush1.bf16.msra.mxu1 %v13729_v49  ;;  %v13789_v49 = vld [vmem:[%s17511_s5 + $0x4e0] ss:$16 sps:$4 sm:$0xff]  }
 0x5d9   : > { %6297 = vmatprep.subr.bf16.mxu1 %v13734_v42  ;;  %v6380_v42 = vmax.f32 %v6379_v23, 0.0  ;;  %v13834_v23 = vld [vmem:[%s17511_s5 + $0x5c0] ss:$16 sps:$4 sm:$0xff]  }
 0x5dc   : > { %6298 = vmatpush1.bf16.msra.mxu1 %v13732_v58 }
 0x5dd   : > { %6299 = vmatprep.subr.bf16.mxu1 %v13737_v3 }
 0x5e0   : > { %6300 = vmatpush1.bf16.msra.mxu1 %v13735_v62  ;;  %v13792_v62 = vld [vmem:[%s17511_s5 + $0x408] ss:$16 sps:$4 sm:$0xff]  }
 0x5e1   : > { %6301 = vmatprep.subr.bf16.mxu1 %v13740_v39  ;;  %v16309_v39 = vpack.c.bf16 %v6380_v42, %v6380_v42 }
 0x5e4   : > { %6302 = vmatpush1.bf16.msra.mxu1 %v13738_v1  ;;  %v13797_v1 = vld [vmem:[%s17511_s5 + $0x42c] ss:$16 sps:$4 sm:$0xff]  }
 0x5e5   : > { %6303 = vmatprep.subr.bf16.mxu1 %v13743_v48  ;;  %v13795_v48 = vld [vmem:[%s17511_s5 + $0x428] ss:$16 sps:$4 sm:$0xff]  }
 0x5e8   : > { %6304 = vmatpush1.bf16.msra.mxu1 %v13741_v34  ;;  %v13800_v34 = vld [vmem:[%s17511_s5 + $0x44c] ss:$16 sps:$4 sm:$0xff]  }
 0x5e9   : > { %6330 = vmatprep.subr.bf16.mxu1 %v13746_v44  ;;  %v13798_v44 = vld [vmem:[%s17511_s5 + $0x448] ss:$16 sps:$4 sm:$0xff]  }
 0x5eb   : > { %6322 = vmatmul.mubr.bf16.vlgmr.msra.gmra.mrb[80].mxu1 %v6127_v33 }
 0x5ec   : > { %6331 = vmatpush1.bf16.msra.mxu1 %v13744_v60  ;;  %6362 = vmatprep.mubr.bf16.mxu1 %v14312_v52  ;;  %v13803_v60 = vld [vmem:[%s17511_s5 + $0x46c] ss:$16 sps:$4 sm:$0xff]  }
 0x5ed   : > { %6332 = vmatprep.subr.bf16.mxu1 %v13749_v22  ;;  %v13806_v22 = vld [vmem:[%s17511_s5 + $0x48c] ss:$16 sps:$4 sm:$0xff]  }
 0x5f0   : > { %6333 = vmatpush1.bf16.msra.mxu1 %v13747_v4  ;;  %v13804_v4 = vld [vmem:[%s17511_s5 + $0x488] ss:$16 sps:$4 sm:$0xff]  }
 0x5f1   : > { %6334 = vmatprep.subr.bf16.mxu1 %v13752_v59  ;;  %v13809_v59 = vld [vmem:[%s17511_s5 + $0x4ac] ss:$16 sps:$4 sm:$0xff]  }
 0x5f4   : > { %6335 = vmatpush1.bf16.msra.mxu1 %v13750_v38  ;;  %v13807_v38 = vld [vmem:[%s17511_s5 + $0x4a8] ss:$16 sps:$4 sm:$0xff]  }
 0x5f5   : > { %6336 = vmatprep.subr.bf16.mxu1 %v13755_v8  ;;  %v13812_v8 = vld [vmem:[%s17511_s5 + $0x4cc] ss:$16 sps:$4 sm:$0xff]  }
 0x5f8   : > { %6337 = vmatpush1.bf16.msra.mxu1 %v13753_v53 }
 0x5f9   : > { %6338 = vmatprep.subr.bf16.mxu1 %v13758_v11 }
 0x5fc   : > { %6339 = vmatpush1.bf16.msra.mxu1 %v13756_v20 }
 0x5fd   : > { %6340 = vmatprep.subr.bf16.mxu1 %v13761_v55 }
 0x5fe   : > { %v16227_v14 = vpop.f32.mrb[56].mxu1 }
 0x5ff   : > { %v16229_v57 = vpop.f32.mrb[57].mxu1 }
 0x600   : > { %6341 = vmatpush1.bf16.msra.mxu1 %v13759_v29  ;;  %v5527_v35 = vpop.f32.mrb[58].mxu1 }
 0x601   : > { %v5528_v41 = vpop.f32.mrb[59].mxu1  ;;  %6342 = vmatprep.subr.bf16.mxu1 %v13764_v37  ;;  %v13810_v37 = vld [vmem:[%s17511_s5 + $0x4c8] ss:$16 sps:$4 sm:$0xff]  }
 0x603   : > { %v16237_v25 = vpop.f32.mrb[48].mxu0 }
 0x604   : > { %6343 = vmatpush1.bf16.msra.mxu1 %v13762_v63  ;;  %v16239_v6 = vpop.f32.mrb[49].mxu0  ;;  %v13815_v63 = vld [vmem:[%s17511_s5 + $0x4ec] ss:$16 sps:$4 sm:$0xff]  }
 0x605   : > { %v8914_v17 = vpop.f32.mrb[50].mxu0  ;;  %6344 = vmatprep.subr.bf16.mxu1 %v13767_v30 }
 0x606   : > { %v8915_v13 = vpop.f32.mrb[51].mxu0 }
 0x607   : > { %v13821_v13 = vld [vmem:[%s17511_s5 + $0x524] ss:$16 sps:$4 sm:$0xff]  }
 0x608   : > { %6345 = vmatpush1.bf16.msra.mxu1 %v13765_v26  ;;  %v13818_v26 = vld [vmem:[%s17511_s5 + $0x504] ss:$16 sps:$4 sm:$0xff]  }
 0x609   : > { %6575 = vmatprep.subr.bf16.mxu1 %v13770_v40  ;;  %v13816_v40 = vld [vmem:[%s17511_s5 + $0x500] ss:$16 sps:$4 sm:$0xff]  }
 0x60b   : > { %6363 = vmatmul.mubr.bf16.vlgmr.msra.gmra.mrb[84].mxu1 %v6127_v33  ;;  %v13801_v33 = vld [vmem:[%s17511_s5 + $0x468] ss:$16 sps:$4 sm:$0xff]  }
 0x60c   : > { %6576 = vmatpush1.bf16.msra.mxu1 %v13768_v9  ;;  %6607 = vmatprep.mubr.bf16.mxu1 %v14312_v52  ;;  %v13819_v9 = vld [vmem:[%s17511_s5 + $0x520] ss:$16 sps:$4 sm:$0xff]  }
 0x60d   : > { %6577 = vmatprep.subr.bf16.mxu1 %v13773_v32  ;;  %v13824_v32 = vld [vmem:[%s17511_s5 + $0x544] ss:$16 sps:$4 sm:$0xff]  }
 0x610   : > { %6578 = vmatpush1.bf16.msra.mxu1 %v13771_v21  ;;  %v13822_v21 = vld [vmem:[%s17511_s5 + $0x540] ss:$16 sps:$4 sm:$0xff]  }
 0x611   : > { %6579 = vmatprep.subr.bf16.mxu1 %v13776_v47  ;;  %v13827_v47 = vld [vmem:[%s17511_s5 + $0x564] ss:$16 sps:$4 sm:$0xff]  }
 0x614   : > { %6580 = vmatpush1.bf16.msra.mxu1 %v13774_v31  ;;  %v13825_v31 = vld [vmem:[%s17511_s5 + $0x560] ss:$16 sps:$4 sm:$0xff]  }
 0x615   : > { %6581 = vmatprep.subr.bf16.mxu1 %v13779_v54  ;;  %v13830_v54 = vld [vmem:[%s17511_s5 + $0x584] ss:$16 sps:$4 sm:$0xff]  }
 0x618   : > { %6582 = vmatpush1.bf16.msra.mxu1 %v13777_v46  ;;  %v13828_v46 = vld [vmem:[%s17511_s5 + $0x580] ss:$16 sps:$4 sm:$0xff]  }
 0x619   : > { %6583 = vmatprep.subr.bf16.mxu1 %v13782_v2  ;;  %v13833_v2 = vld [vmem:[%s17511_s5 + $0x5a4] ss:$16 sps:$4 sm:$0xff]  }
 0x61c   : > { %6584 = vmatpush1.bf16.msra.mxu1 %v13780_v24  ;;  %v13831_v24 = vld [vmem:[%s17511_s5 + $0x5a0] ss:$16 sps:$4 sm:$0xff]  }
 0x61d   : > { %6585 = vmatprep.subr.bf16.mxu1 %v13785_v36  ;;  %v13836_v36 = vld [vmem:[%s17511_s5 + $0x5c4] ss:$16 sps:$4 sm:$0xff]  }
 0x61e   : > { %v16285_v19 = vpop.f32.mrb[60].mxu1 }
 0x61f   : > { %v16287_v56 = vpop.f32.mrb[61].mxu1 }
 0x620   : > { %v5568_v7 = vpop.f32.mrb[62].mxu1  ;;  %6586 = vmatpush1.bf16.msra.mxu1 %v13783_v5 }
 0x621   : > { %v5569_v10 = vpop.f32.mrb[63].mxu1  ;;  %6587 = vmatprep.subr.bf16.mxu1 %v13788_v27 }
 0x623   : > { %v16296_v51 = vpop.f32.mrb[52].mxu0 }
 0x624   : > { %6588 = vmatpush1.bf16.msra.mxu1 %v13786_v0  ;;  %v16298_v50 = vpop.f32.mrb[53].mxu0 }
 0x625   : > { %v9196_v58 = vpop.f32.mrb[54].mxu0  ;;  %6589 = vmatprep.subr.bf16.mxu1 %v13791_v18  ;;  %v13839_v18 = vld [vmem:[%s17511_s5 + $0x5e4] ss:$16 sps:$4 sm:$0xff]  }
 0x626   : > { %v9197_v3 = vpop.f32.mrb[55].mxu0  ;;  %v13842_v58 = vld [vmem:[%s17511_s5 + $0x50c] ss:$16 sps:$4 sm:$0xff]  }
 0x627   : > { %v13840_v3 = vld [vmem:[%s17511_s5 + $0x508] ss:$16 sps:$4 sm:$0xff]  }
 0x628   : > { %6590 = vmatpush1.bf16.msra.mxu1 %v13789_v49 }
 0x629   : > { %6616 = vmatprep.subr.bf16.mxu1 %v13794_v15 }
 0x62b   : > { %6608 = vmatmul.mubr.bf16.vlgmr.msra.gmra.mrb[88].mxu1 %v16309_v39 }
 0x62c   : > { %6617 = vmatpush1.bf16.msra.mxu1 %v13792_v62  ;;  %6648 = vmatprep.mubr.bf16.mxu1 %v14312_v52  ;;  %v6695_v62 = vrot.slane %v16309_v39, 1 }
 0x62d   : > { %6618 = vmatprep.subr.bf16.mxu1 %v13797_v1  ;;  %v13845_v1 = vld [vmem:[%s17511_s5 + $0x52c] ss:$16 sps:$4 sm:$0xff]  }
 0x630   : > { %6619 = vmatpush1.bf16.msra.mxu1 %v13795_v48  ;;  %v13843_v48 = vld [vmem:[%s17511_s5 + $0x528] ss:$16 sps:$4 sm:$0xff]  }
 0x631   : > { %6620 = vmatprep.subr.bf16.mxu1 %v13800_v34  ;;  %v13848_v34 = vld [vmem:[%s17511_s5 + $0x54c] ss:$16 sps:$4 sm:$0xff]  }
 0x634   : > { %6621 = vmatpush1.bf16.msra.mxu1 %v13798_v44  ;;  %v13846_v44 = vld [vmem:[%s17511_s5 + $0x548] ss:$16 sps:$4 sm:$0xff]  }
 0x635   : > { %6622 = vmatprep.subr.bf16.mxu1 %v13803_v60  ;;  %v13851_v60 = vld [vmem:[%s17511_s5 + $0x56c] ss:$16 sps:$4 sm:$0xff]  }
 0x638   : > { %6623 = vmatpush1.bf16.msra.mxu1 %v13801_v33  ;;  %v13849_v33 = vld [vmem:[%s17511_s5 + $0x568] ss:$16 sps:$4 sm:$0xff]  }
 0x639   : > { %6624 = vmatprep.subr.bf16.mxu1 %v13806_v22  ;;  %v13854_v22 = vld [vmem:[%s17511_s5 + $0x58c] ss:$16 sps:$4 sm:$0xff]  }
 0x63c   : > { %6625 = vmatpush1.bf16.msra.mxu1 %v13804_v4  ;;  %v13852_v4 = vld [vmem:[%s17511_s5 + $0x588] ss:$16 sps:$4 sm:$0xff]  }
 0x63d   : > { %6626 = vmatprep.subr.bf16.mxu1 %v13809_v59  ;;  %v13857_v59 = vld [vmem:[%s17511_s5 + $0x5ac] ss:$16 sps:$4 sm:$0xff]  }
 0x63e   : > { %v5765_v53 = vpop.f32.mrb[64].mxu1 }
 0x63f   : > { %v16347_v11 = vadd.f32 %v5765_v53, %v16227_v14  ;;  %v5767_v20 = vpop.f32.mrb[65].mxu1 }
 0x640   : > { %v16350_v55 = vadd.f32 %v5767_v20, %v16229_v57  ;;  %v5769_v29 = vpop.f32.mrb[66].mxu1  ;;  %6627 = vmatpush1.bf16.msra.mxu1 %v13807_v38  ;;  %v13813_v57 = vld [vmem:[%s17511_s5 + $0x4e8] ss:$16 sps:$4 sm:$0xff]  }
 0x641   : > { %v5770_v35 = vpop.f32.mrb[67].mxu1  ;;  %6628 = vmatprep.subr.bf16.mxu1 %v13812_v8  ;;  %v13855_v38 = vld [vmem:[%s17511_s5 + $0x5a8] ss:$16 sps:$4 sm:$0xff]   ;;  %v13860_v8 = vld [vmem:[%s17511_s5 + $0x5cc] ss:$16 sps:$4 sm:$0xff]  }
 0x643   : > { %v16358_v41 = vpop.f32.mrb[56].mxu0 }
 0x644   : > { %6629 = vmatpush1.bf16.msra.mxu1 %v13810_v37  ;;  %v16360_v14 = vpop.f32.mrb[57].mxu0 }
 0x645   : > { %v9477_v30 = vpop.f32.mrb[58].mxu0  ;;  %6630 = vmatprep.subr.bf16.mxu1 %v13815_v63  ;;  %v13858_v63 = vld [vmem:[%s17511_s5 + $0x5c8] ss:$16 sps:$4 sm:$0xff]  }
 0x646   : > { %v9478_v17 = vpop.f32.mrb[59].mxu0  ;;  %v13863_v30 = vld [vmem:[%s17511_s5 + $0x5ec] ss:$16 sps:$4 sm:$0xff]  }
 0x647   : > { %v13869_v17 = vld [vmem:[%s17511_s5 + $0x624] ss:$16 sps:$4 sm:$0xff]  }
 0x648   : > { %6631 = vmatpush1.bf16.msra.mxu1 %v13813_v57 }
 0x649   : > { %6857 = vmatprep.subr.bf16.mxu1 %v13818_v26  ;;  %v13864_v26 = vld [vmem:[%s17511_s5 + $0x600] ss:$16 sps:$4 sm:$0xff]  }
 0x64b   : > { %6649 = vmatmul.mubr.bf16.vlgmr.msra.gmra.mrb[92].mxu1 %v16309_v39 }
 0x64c   : > { %6858 = vmatpush1.bf16.msra.mxu1 %v13816_v40  ;;  %6889 = vmatprep.mubr.bf16.mxu1 %v14312_v52  ;;  %v13867_v40 = vld [vmem:[%s17511_s5 + $0x620] ss:$16 sps:$4 sm:$0xff]  }
 0x64d   : > { %6859 = vmatprep.subr.bf16.mxu1 %v13821_v13  ;;  %v13872_v13 = vld [vmem:[%s17511_s5 + $0x644] ss:$16 sps:$4 sm:$0xff]  }
 0x650   : > { %6860 = vmatpush1.bf16.msra.mxu1 %v13819_v9  ;;  %v13870_v9 = vld [vmem:[%s17511_s5 + $0x640] ss:$16 sps:$4 sm:$0xff]  }
 0x651   : > { %6861 = vmatprep.subr.bf16.mxu1 %v13824_v32  ;;  %v13875_v32 = vld [vmem:[%s17511_s5 + $0x664] ss:$16 sps:$4 sm:$0xff]  }
 0x654   : > { %6862 = vmatpush1.bf16.msra.mxu1 %v13822_v21  ;;  %v13873_v21 = vld [vmem:[%s17511_s5 + $0x660] ss:$16 sps:$4 sm:$0xff]  }
 0x655   : > { %6863 = vmatprep.subr.bf16.mxu1 %v13827_v47  ;;  %v13878_v47 = vld [vmem:[%s17511_s5 + $0x684] ss:$16 sps:$4 sm:$0xff]  }
 0x658   : > { %6864 = vmatpush1.bf16.msra.mxu1 %v13825_v31  ;;  %v13876_v31 = vld [vmem:[%s17511_s5 + $0x680] ss:$16 sps:$4 sm:$0xff]  }
 0x659   : > { %6865 = vmatprep.subr.bf16.mxu1 %v13830_v54  ;;  %v13881_v54 = vld [vmem:[%s17511_s5 + $0x6a4] ss:$16 sps:$4 sm:$0xff]  }
 0x65c   : > { %6866 = vmatpush1.bf16.msra.mxu1 %v13828_v46  ;;  %v13879_v46 = vld [vmem:[%s17511_s5 + $0x6a0] ss:$16 sps:$4 sm:$0xff]  }
 0x65d   : > { %6867 = vmatprep.subr.bf16.mxu1 %v13833_v2  ;;  %v13884_v2 = vld [vmem:[%s17511_s5 + $0x6c4] ss:$16 sps:$4 sm:$0xff]  }
 0x65e   : > { %v5806_v5 = vpop.f32.mrb[68].mxu1 }
 0x65f   : > { %v16407_v43 = vadd.f32 %v5806_v5, %v16285_v19  ;;  %v5808_v27 = vpop.f32.mrb[69].mxu1 }
 0x660   : > { %v16410_v7 = vadd.f32 %v5808_v27, %v16287_v56  ;;  %v5810_v0 = vpop.f32.mrb[70].mxu1  ;;  %6868 = vmatpush1.bf16.msra.mxu1 %v13831_v24  ;;  %v13837_v56 = vld [vmem:[%s17511_s5 + $0x5e0] ss:$16 sps:$4 sm:$0xff]  }
 0x661   : > { %v5811_v10 = vpop.f32.mrb[71].mxu1  ;;  %6869 = vmatprep.subr.bf16.mxu1 %v13836_v36 }
 0x663   : > { %v16418_v49 = vpop.f32.mrb[60].mxu0 }
 0x664   : > { %6870 = vmatpush1.bf16.msra.mxu1 %v13834_v23  ;;  %v16420_v19 = vpop.f32.mrb[61].mxu0  ;;  %v13882_v23 = vld [vmem:[%s17511_s5 + $0x6c0] ss:$16 sps:$4 sm:$0xff]  }
 0x665   : > { %v9758_v42 = vpop.f32.mrb[62].mxu0  ;;  %6871 = vmatprep.subr.bf16.mxu1 %v13839_v18  ;;  %v13887_v18 = vld [vmem:[%s17511_s5 + $0x6e4] ss:$16 sps:$4 sm:$0xff]  }
 0x666   : > { %v9759_v15 = vpop.f32.mrb[63].mxu0  ;;  %v6976_v42 = vrot.slane %v16309_v39, 2 }
 0x667   : > { %v13891_v15 = vld [vmem:[%s17511_s5 + $0x628] ss:$16 sps:$4 sm:$0xff]  }
 0x668   : > { %6872 = vmatpush1.bf16.msra.mxu1 %v13837_v56  ;;  %v13888_v56 = vld [vmem:[%s17511_s5 + $0x608] ss:$16 sps:$4 sm:$0xff]  }
 0x669   : > { %6898 = vmatprep.subr.bf16.mxu1 %v13842_v58  ;;  %v13893_v58 = vld [vmem:[%s17511_s5 + $0x62c] ss:$16 sps:$4 sm:$0xff]  }
 0x66b   : > { %6890 = vmatmul.mubr.bf16.vlgmr.msra.gmra.mrb[96].mxu1 %v6695_v62 }
 0x66c   : > { %6899 = vmatpush1.bf16.msra.mxu1 %v13840_v3  ;;  %6930 = vmatprep.mubr.bf16.mxu1 %v14312_v52  ;;  %v13896_v3 = vld [vmem:[%s17511_s5 + $0x64c] ss:$16 sps:$4 sm:$0xff]  }
 0x66d   : > { %6900 = vmatprep.subr.bf16.mxu1 %v13845_v1  ;;  %v13899_v1 = vld [vmem:[%s17511_s5 + $0x66c] ss:$16 sps:$4 sm:$0xff]  }
 0x670   : > { %6901 = vmatpush1.bf16.msra.mxu1 %v13843_v48  ;;  %v13897_v48 = vld [vmem:[%s17511_s5 + $0x668] ss:$16 sps:$4 sm:$0xff]  }
 0x671   : > { %6902 = vmatprep.subr.bf16.mxu1 %v13848_v34  ;;  %v13902_v34 = vld [vmem:[%s17511_s5 + $0x68c] ss:$16 sps:$4 sm:$0xff]  }
 0x674   : > { %6903 = vmatpush1.bf16.msra.mxu1 %v13846_v44  ;;  %v13900_v44 = vld [vmem:[%s17511_s5 + $0x688] ss:$16 sps:$4 sm:$0xff]  }
 0x675   : > { %6904 = vmatprep.subr.bf16.mxu1 %v13851_v60  ;;  %v13905_v60 = vld [vmem:[%s17511_s5 + $0x6ac] ss:$16 sps:$4 sm:$0xff]  }
 0x678   : > { %6905 = vmatpush1.bf16.msra.mxu1 %v13849_v33  ;;  %v13903_v33 = vld [vmem:[%s17511_s5 + $0x6a8] ss:$16 sps:$4 sm:$0xff]  }
 0x679   : > { %6906 = vmatprep.subr.bf16.mxu1 %v13854_v22  ;;  %v13908_v22 = vld [vmem:[%s17511_s5 + $0x6cc] ss:$16 sps:$4 sm:$0xff]  }
 0x67c   : > { %6907 = vmatpush1.bf16.msra.mxu1 %v13852_v4 }
 0x67d   : > { %6908 = vmatprep.subr.bf16.mxu1 %v13857_v59 }
 0x67e   : > { %v6042_v53 = vpop.f32.mrb[72].mxu1 }
 0x67f   : > { %v16467_v20 = vadd.f32 %v6042_v53, %v16347_v11  ;;  %v6044_v29 = vpop.f32.mrb[73].mxu1  ;;  %v13861_v11 = vld [vmem:[%s17511_s5 + $0x5e8] ss:$16 sps:$4 sm:$0xff]  }
 0x680   : > { %v16470_v37 = vadd.f32 %v6044_v29, %v16350_v55  ;;  %v6046_v35 = vpop.f32.mrb[74].mxu1  ;;  %6909 = vmatpush1.bf16.msra.mxu1 %v13855_v38  ;;  %v13866_v55 = vld [vmem:[%s17511_s5 + $0x604] ss:$16 sps:$4 sm:$0xff]   ;;  %v13906_v29 = vld [vmem:[%s17511_s5 + $0x6c8] ss:$16 sps:$4 sm:$0xff]  }
 0x681   : > { %v6047_v57 = vpop.f32.mrb[75].mxu1  ;;  %6910 = vmatprep.subr.bf16.mxu1 %v13860_v8 }
 0x682   : > { %v13912_v57 = vld [vmem:[%s17511_s5 + $0x700] ss:$16 sps:$4 sm:$0xff]  }
 0x684   : > { %6911 = vmatpush1.bf16.msra.mxu1 %v13858_v63  ;;  %v13911_v63 = vld [vmem:[%s17511_s5 + $0x6ec] ss:$16 sps:$4 sm:$0xff]  }
 0x685   : > { %6912 = vmatprep.subr.bf16.mxu1 %v13863_v30  ;;  %v13917_v30 = vld [vmem:[%s17511_s5 + $0x724] ss:$16 sps:$4 sm:$0xff]  }
 0x688   : > { %6913 = vmatpush1.bf16.msra.mxu1 %v13861_v11  ;;  %v13915_v11 = vld [vmem:[%s17511_s5 + $0x720] ss:$16 sps:$4 sm:$0xff]  }
 0x689   : > { %7138 = vmatprep.subr.bf16.mxu1 %v13866_v55  ;;  %v13920_v55 = vld [vmem:[%s17511_s5 + $0x744] ss:$16 sps:$4 sm:$0xff]  }
 0x68b   : > { %6931 = vmatmul.mubr.bf16.vlgmr.msra.gmra.mrb[100].mxu1 %v6695_v62  ;;  %v13894_v62 = vld [vmem:[%s17511_s5 + $0x648] ss:$16 sps:$4 sm:$0xff]  }
 0x68c   : > { %7139 = vmatpush1.bf16.msra.mxu1 %v13864_v26  ;;  %7170 = vmatprep.mubr.bf16.mxu1 %v14312_v52  ;;  %v13918_v26 = vld [vmem:[%s17511_s5 + $0x740] ss:$16 sps:$4 sm:$0xff]  }
 0x68d   : > { %7140 = vmatprep.subr.bf16.mxu1 %v13869_v17  ;;  %v13923_v17 = vld [vmem:[%s17511_s5 + $0x764] ss:$16 sps:$4 sm:$0xff]  }
 0x690   : > { %7141 = vmatpush1.bf16.msra.mxu1 %v13867_v40  ;;  %v13921_v40 = vld [vmem:[%s17511_s5 + $0x760] ss:$16 sps:$4 sm:$0xff]  }
 0x691   : > { %7142 = vmatprep.subr.bf16.mxu1 %v13872_v13  ;;  %v13926_v13 = vld [vmem:[%s17511_s5 + $0x784] ss:$16 sps:$4 sm:$0xff]  }
 0x694   : > { %7143 = vmatpush1.bf16.msra.mxu1 %v13870_v9  ;;  %v13924_v9 = vld [vmem:[%s17511_s5 + $0x780] ss:$16 sps:$4 sm:$0xff]  }
 0x695   : > { %7144 = vmatprep.subr.bf16.mxu1 %v13875_v32  ;;  %v13929_v32 = vld [vmem:[%s17511_s5 + $0x7a4] ss:$16 sps:$4 sm:$0xff]  }
 0x698   : > { %7145 = vmatpush1.bf16.msra.mxu1 %v13873_v21  ;;  %v13927_v21 = vld [vmem:[%s17511_s5 + $0x7a0] ss:$16 sps:$4 sm:$0xff]  }
 0x699   : > { %7146 = vmatprep.subr.bf16.mxu1 %v13878_v47  ;;  %v13932_v47 = vld [vmem:[%s17511_s5 + $0x7c4] ss:$16 sps:$4 sm:$0xff]  }
 0x69c   : > { %7147 = vmatpush1.bf16.msra.mxu1 %v13876_v31 }
 0x69d   : > { %7148 = vmatprep.subr.bf16.mxu1 %v13881_v54 }
 0x69e   : > { %v6083_v24 = vpop.f32.mrb[76].mxu1 }
 0x69f   : > { %v16522_v36 = vadd.f32 %v6083_v24, %v16407_v43  ;;  %v6085_v5 = vpop.f32.mrb[77].mxu1  ;;  %v13885_v43 = vld [vmem:[%s17511_s5 + $0x6e0] ss:$16 sps:$4 sm:$0xff]  }
 0x6a0   : > { %v16525_v27 = vadd.f32 %v6085_v5, %v16410_v7  ;;  %v6087_v0 = vpop.f32.mrb[78].mxu1  ;;  %7149 = vmatpush1.bf16.msra.mxu1 %v13879_v46  ;;  %v13890_v7 = vld [vmem:[%s17511_s5 + $0x60c] ss:$16 sps:$4 sm:$0xff]   ;;  %v13930_v5 = vld [vmem:[%s17511_s5 + $0x7c0] ss:$16 sps:$4 sm:$0xff]  }
 0x6a1   : > { %v6088_v10 = vpop.f32.mrb[79].mxu1  ;;  %7150 = vmatprep.subr.bf16.mxu1 %v13884_v2 }
 0x6a2   : > { %v13936_v10 = vld [vmem:[%s17511_s5 + $0x708] ss:$16 sps:$4 sm:$0xff]  }
 0x6a4   : > { %7151 = vmatpush1.bf16.msra.mxu1 %v13882_v23  ;;  %v13935_v23 = vld [vmem:[%s17511_s5 + $0x7e4] ss:$16 sps:$4 sm:$0xff]  }
 0x6a5   : > { %7152 = vmatprep.subr.bf16.mxu1 %v13887_v18  ;;  %v7257_v18 = vrot.slane %v16309_v39, 3  ;;  %v13942_v39 = vld [vmem:[%s17511_s5 + $0x748] ss:$16 sps:$4 sm:$0xff]  }
 0x6a8   : > { %7153 = vmatpush1.bf16.msra.mxu1 %v13885_v43  ;;  %v13941_v43 = vld [vmem:[%s17511_s5 + $0x72c] ss:$16 sps:$4 sm:$0xff]  }
 0x6a9   : > { %7179 = vmatprep.subr.bf16.mxu1 %v13890_v7  ;;  %v13939_v7 = vld [vmem:[%s17511_s5 + $0x728] ss:$16 sps:$4 sm:$0xff]  }
 0x6ab   : > { %7171 = vmatmul.mubr.bf16.vlgmr.msra.gmra.mrb[104].mxu1 %v6976_v42 }
 0x6ac   : > { %7180 = vmatpush1.bf16.msra.mxu1 %v13888_v56  ;;  %7211 = vmatprep.mubr.bf16.mxu1 %v14312_v52  ;;  %v13944_v56 = vld [vmem:[%s17511_s5 + $0x74c] ss:$16 sps:$4 sm:$0xff]  }
 0x6ad   : > { %7181 = vmatprep.subr.bf16.mxu1 %v13893_v58  ;;  %v13945_v58 = vld [vmem:[%s17511_s5 + $0x768] ss:$16 sps:$4 sm:$0xff]  }
 0x6b0   : > { %7182 = vmatpush1.bf16.msra.mxu1 %v13891_v15  ;;  %v13950_v15 = vld [vmem:[%s17511_s5 + $0x78c] ss:$16 sps:$4 sm:$0xff]  }
 0x6b1   : > { %7183 = vmatprep.subr.bf16.mxu1 %v13896_v3  ;;  %v13948_v3 = vld [vmem:[%s17511_s5 + $0x788] ss:$16 sps:$4 sm:$0xff]  }
 0x6b4   : > { %7184 = vmatpush1.bf16.msra.mxu1 %v13894_v62  ;;  %v13953_v62 = vld [vmem:[%s17511_s5 + $0x7ac] ss:$16 sps:$4 sm:$0xff]  }
 0x6b5   : > { %7185 = vmatprep.subr.bf16.mxu1 %v13899_v1  ;;  %v13951_v1 = vld [vmem:[%s17511_s5 + $0x7a8] ss:$16 sps:$4 sm:$0xff]  }
 0x6b8   : > { %7186 = vmatpush1.bf16.msra.mxu1 %v13897_v48  ;;  %v13956_v48 = vld [vmem:[%s17511_s5 + $0x7cc] ss:$16 sps:$4 sm:$0xff]  }
 0x6b9   : > { %7187 = vmatprep.subr.bf16.mxu1 %v13902_v34 }
 0x6bc   : > { %7188 = vmatpush1.bf16.msra.mxu1 %v13900_v44 }
 0x6bd   : > { %7189 = vmatprep.subr.bf16.mxu1 %v13905_v60 }
 0x6be   : > { %v6323_v4 = vpop.f32.mrb[80].mxu1 }
 0x6bf   : > { %v16578_v59 = vadd.f32 %v6323_v4, %v16467_v20  ;;  %v6325_v38 = vpop.f32.mrb[81].mxu1  ;;  %v13909_v20 = vld [vmem:[%s17511_s5 + $0x6e8] ss:$16 sps:$4 sm:$0xff]  }
 0x6c0   : > { %v16581_v8 = vadd.f32 %v6325_v38, %v16470_v37  ;;  %v6327_v53 = vpop.f32.mrb[82].mxu1  ;;  %7190 = vmatpush1.bf16.msra.mxu1 %v13903_v33  ;;  %v13914_v37 = vld [vmem:[%s17511_s5 + $0x704] ss:$16 sps:$4 sm:$0xff]   ;;  %v13954_v4 = vld [vmem:[%s17511_s5 + $0x7c8] ss:$16 sps:$4 sm:$0xff]  }
 0x6c1   : > { %v6328_v35 = vpop.f32.mrb[83].mxu1  ;;  %7191 = vmatprep.subr.bf16.mxu1 %v13908_v22  ;;  %v13959_v53 = vld [vmem:[%s17511_s5 + $0x7ec] ss:$16 sps:$4 sm:$0xff]  }
 0x6c2   : > { %v13965_v35 = vld [vmem:[%s17511_s5 + $0x824] ss:$16 sps:$4 sm:$0xff]  }
 0x6c4   : > { %7192 = vmatpush1.bf16.msra.mxu1 %v13906_v29  ;;  %v13960_v29 = vld [vmem:[%s17511_s5 + $0x800] ss:$16 sps:$4 sm:$0xff]  }
 0x6c5   : > { %7193 = vmatprep.subr.bf16.mxu1 %v13911_v63  ;;  %v13963_v63 = vld [vmem:[%s17511_s5 + $0x820] ss:$16 sps:$4 sm:$0xff]  }
 0x6c8   : > { %7194 = vmatpush1.bf16.msra.mxu1 %v13909_v20  ;;  %v13968_v20 = vld [vmem:[%s17511_s5 + $0x844] ss:$16 sps:$4 sm:$0xff]  }
 0x6c9   : > { %7419 = vmatprep.subr.bf16.mxu1 %v13914_v37  ;;  %v13966_v37 = vld [vmem:[%s17511_s5 + $0x840] ss:$16 sps:$4 sm:$0xff]  }
 0x6cb   : > { %7212 = vmatmul.mubr.bf16.vlgmr.msra.gmra.mrb[108].mxu1 %v6976_v42  ;;  %v13947_v42 = vld [vmem:[%s17511_s5 + $0x76c] ss:$16 sps:$4 sm:$0xff]  }
 0x6cc   : > { %7420 = vmatpush1.bf16.msra.mxu1 %v13912_v57  ;;  %7451 = vmatprep.mubr.bf16.mxu1 %v14312_v52  ;;  %v13971_v57 = vld [vmem:[%s17511_s5 + $0x864] ss:$16 sps:$4 sm:$0xff]  }
 0x6cd   : > { %7421 = vmatprep.subr.bf16.mxu1 %v13917_v30  ;;  %v13969_v30 = vld [vmem:[%s17511_s5 + $0x860] ss:$16 sps:$4 sm:$0xff]  }
 0x6d0   : > { %7422 = vmatpush1.bf16.msra.mxu1 %v13915_v11  ;;  %v13974_v11 = vld [vmem:[%s17511_s5 + $0x884] ss:$16 sps:$4 sm:$0xff]  }
 0x6d1   : > { %7423 = vmatprep.subr.bf16.mxu1 %v13920_v55  ;;  %v13972_v55 = vld [vmem:[%s17511_s5 + $0x880] ss:$16 sps:$4 sm:$0xff]  }
 0x6d4   : > { %7424 = vmatpush1.bf16.msra.mxu1 %v13918_v26  ;;  %v13977_v26 = vld [vmem:[%s17511_s5 + $0x8a4] ss:$16 sps:$4 sm:$0xff]  }
 0x6d5   : > { %7425 = vmatprep.subr.bf16.mxu1 %v13923_v17  ;;  %v13975_v17 = vld [vmem:[%s17511_s5 + $0x8a0] ss:$16 sps:$4 sm:$0xff]  }
 0x6d8   : > { %7426 = vmatpush1.bf16.msra.mxu1 %v13921_v40  ;;  %v7507_v40 = vrot.slane %v15729_v45, 1 }
 0x6d9   : > { %7427 = vmatprep.subr.bf16.mxu1 %v13926_v13  ;;  %v13980_v13 = vld [vmem:[%s17511_s5 + $0x8c4] ss:$16 sps:$4 sm:$0xff]  }
 0x6dc   : > { %7428 = vmatpush1.bf16.msra.mxu1 %v13924_v9 }
 0x6dd   : > { %7429 = vmatprep.subr.bf16.mxu1 %v13929_v32 }
 0x6de   : > { %v6364_v31 = vpop.f32.mrb[84].mxu1 }
 0x6df   : > { %v16633_v54 = vadd.f32 %v6364_v31, %v16522_v36  ;;  %v6366_v46 = vpop.f32.mrb[85].mxu1  ;;  %v13933_v36 = vld [vmem:[%s17511_s5 + $0x7e0] ss:$16 sps:$4 sm:$0xff]  }
 0x6e0   : > { %v16636_v2 = vadd.f32 %v6366_v46, %v16525_v27  ;;  %v6368_v24 = vpop.f32.mrb[86].mxu1  ;;  %7430 = vmatpush1.bf16.msra.mxu1 %v13927_v21  ;;  %v13938_v27 = vld [vmem:[%s17511_s5 + $0x70c] ss:$16 sps:$4 sm:$0xff]   ;;  %v13978_v46 = vld [vmem:[%s17511_s5 + $0x8c0] ss:$16 sps:$4 sm:$0xff]  }
 0x6e1   : > { %v6369_v0 = vpop.f32.mrb[87].mxu1  ;;  %7431 = vmatprep.subr.bf16.mxu1 %v13932_v47  ;;  %v7509_v24 = vmax.f32 %v15729_v45, %v7507_v40  ;;  %v13984_v45 = vld [vmem:[%s17511_s5 + $0x808] ss:$16 sps:$4 sm:$0xff]  }
 0x6e2   : > { %v13983_v0 = vld [vmem:[%s17511_s5 + $0x8e4] ss:$16 sps:$4 sm:$0xff]  }
 0x6e4   : > { %7432 = vmatpush1.bf16.msra.mxu1 %v13930_v5 }
 0x6e5   : > { %7433 = vmatprep.subr.bf16.mxu1 %v13935_v23  ;;  %v13986_v23 = vld [vmem:[%s17511_s5 + $0x80c] ss:$16 sps:$4 sm:$0xff]  }
 0x6e8   : > { %7434 = vmatpush1.bf16.msra.mxu1 %v13933_v36 }
 0x6e9   : > { %7460 = vmatprep.subr.bf16.mxu1 %v13938_v27  ;;  %v13989_v27 = vld [vmem:[%s17511_s5 + $0x82c] ss:$16 sps:$4 sm:$0xff]  }
 0x6eb   : > { %7452 = vmatmul.mubr.bf16.vlgmr.msra.gmra.mrb[112].mxu1 %v7257_v18 }
 0x6ec   : > { %7461 = vmatpush1.bf16.msra.mxu1 %v13936_v10  ;;  %7492 = vmatprep.mubr.bf16.mxu1 %v14312_v52  ;;  %v13987_v10 = vld [vmem:[%s17511_s5 + $0x828] ss:$16 sps:$4 sm:$0xff]  }
 0x6ed   : > { %7462 = vmatprep.subr.bf16.mxu1 %v13941_v43  ;;  %v13990_v43 = vld [vmem:[%s17511_s5 + $0x848] ss:$16 sps:$4 sm:$0xff]  }
 0x6f0   : > { %7463 = vmatpush1.bf16.msra.mxu1 %v13939_v7  ;;  %v13995_v7 = vld [vmem:[%s17511_s5 + $0x86c] ss:$16 sps:$4 sm:$0xff]  }
 0x6f1   : > { %7464 = vmatprep.subr.bf16.mxu1 %v13944_v56  ;;  %v13993_v56 = vld [vmem:[%s17511_s5 + $0x868] ss:$16 sps:$4 sm:$0xff]  }
 0x6f4   : > { %7465 = vmatpush1.bf16.msra.mxu1 %v13942_v39  ;;  %v13998_v39 = vld [vmem:[%s17511_s5 + $0x88c] ss:$16 sps:$4 sm:$0xff]  }
 0x6f5   : > { %7466 = vmatprep.subr.bf16.mxu1 %v13947_v42  ;;  %v13996_v42 = vld [vmem:[%s17511_s5 + $0x888] ss:$16 sps:$4 sm:$0xff]  }
 0x6f8   : > { %7467 = vmatpush1.bf16.msra.mxu1 %v13945_v58  ;;  %v14001_v58 = vld [vmem:[%s17511_s5 + $0x8ac] ss:$16 sps:$4 sm:$0xff]  }
 0x6f9   : > { %7468 = vmatprep.subr.bf16.mxu1 %v13950_v15  ;;  %v13999_v15 = vld [vmem:[%s17511_s5 + $0x8a8] ss:$16 sps:$4 sm:$0xff]  }
 0x6fc   : > { %7469 = vmatpush1.bf16.msra.mxu1 %v13948_v3  ;;  %v14004_v3 = vld [vmem:[%s17511_s5 + $0x8cc] ss:$16 sps:$4 sm:$0xff]  }
 0x6fd   : > { %7470 = vmatprep.subr.bf16.mxu1 %v13953_v62 }
 0x6fe   : > { %v6609_v34 = vpop.f32.mrb[88].mxu1 }
 0x6ff   : > { %v16689_v44 = vadd.f32 %v6609_v34, %v16578_v59  ;;  %v6611_v60 = vpop.f32.mrb[89].mxu1  ;;  %v13957_v59 = vld [vmem:[%s17511_s5 + $0x7e8] ss:$16 sps:$4 sm:$0xff]  }
 0x700   : > { %v16692_v33 = vadd.f32 %v6611_v60, %v16581_v8  ;;  %v6613_v22 = vpop.f32.mrb[90].mxu1  ;;  %7471 = vmatpush1.bf16.msra.mxu1 %v13951_v1  ;;  %v13962_v8 = vld [vmem:[%s17511_s5 + $0x804] ss:$16 sps:$4 sm:$0xff]  }
 0x701   : > { %v6614_v38 = vpop.f32.mrb[91].mxu1  ;;  %7472 = vmatprep.subr.bf16.mxu1 %v13956_v48  ;;  %v14002_v22 = vld [vmem:[%s17511_s5 + $0x8c8] ss:$16 sps:$4 sm:$0xff]  }
 0x702   : > { %v14007_v38 = vld [vmem:[%s17511_s5 + $0x8ec] ss:$16 sps:$4 sm:$0xff]  }
 0x704   : > { %7473 = vmatpush1.bf16.msra.mxu1 %v13954_v4 }
 0x705   : > { %7474 = vmatprep.subr.bf16.mxu1 %v13959_v53  ;;  %v14008_v53 = vld [vmem:[%s17511_s5 + $0x900] ss:$16 sps:$4 sm:$0xff]  }
 0x708   : > { %7475 = vmatpush1.bf16.msra.mxu1 %v13957_v59  ;;  %v14013_v59 = vld [vmem:[%s17511_s5 + $0x924] ss:$16 sps:$4 sm:$0xff]  }
 0x709   : > { %7705 = vmatprep.subr.bf16.mxu1 %v13962_v8  ;;  %v14011_v8 = vld [vmem:[%s17511_s5 + $0x920] ss:$16 sps:$4 sm:$0xff]  }
 0x70b   : > { %7493 = vmatmul.mubr.bf16.vlgmr.msra.gmra.mrb[116].mxu1 %v7257_v18  ;;  %v13992_v18 = vld [vmem:[%s17511_s5 + $0x84c] ss:$16 sps:$4 sm:$0xff]  }
 0x70c   : > { %7706 = vmatpush1.bf16.msra.mxu1 %v13960_v29  ;;  %7737 = vmatprep.mubr.bf16.mxu1 %v14312_v52  ;;  %v14016_v29 = vld [vmem:[%s17511_s5 + $0x944] ss:$16 sps:$4 sm:$0xff]  }
 0x70d   : > { %7707 = vmatprep.subr.bf16.mxu1 %v13965_v35  ;;  %v14014_v35 = vld [vmem:[%s17511_s5 + $0x940] ss:$16 sps:$4 sm:$0xff]  }
 0x710   : > { %7708 = vmatpush1.bf16.msra.mxu1 %v13963_v63  ;;  %v14019_v63 = vld [vmem:[%s17511_s5 + $0x964] ss:$16 sps:$4 sm:$0xff]  }
 0x711   : > { %7709 = vmatprep.subr.bf16.mxu1 %v13968_v20  ;;  %v14017_v20 = vld [vmem:[%s17511_s5 + $0x960] ss:$16 sps:$4 sm:$0xff]  }
 0x714   : > { %7710 = vmatpush1.bf16.msra.mxu1 %v13966_v37  ;;  %v14022_v37 = vld [vmem:[%s17511_s5 + $0x984] ss:$16 sps:$4 sm:$0xff]  }
 0x715   : > { %7711 = vmatprep.subr.bf16.mxu1 %v13971_v57  ;;  %v14020_v57 = vld [vmem:[%s17511_s5 + $0x980] ss:$16 sps:$4 sm:$0xff]  }
 0x718   : > { %7712 = vmatpush1.bf16.msra.mxu1 %v13969_v30  ;;  %v14025_v30 = vld [vmem:[%s17511_s5 + $0x9a4] ss:$16 sps:$4 sm:$0xff]  }
 0x719   : > { %7713 = vmatprep.subr.bf16.mxu1 %v13974_v11  ;;  %v14023_v11 = vld [vmem:[%s17511_s5 + $0x9a0] ss:$16 sps:$4 sm:$0xff]  }
 0x71c   : > { %7714 = vmatpush1.bf16.msra.mxu1 %v13972_v55  ;;  %v14028_v55 = vld [vmem:[%s17511_s5 + $0x9c4] ss:$16 sps:$4 sm:$0xff]  }
 0x71d   : > { %7715 = vmatprep.subr.bf16.mxu1 %v13977_v26 }
 0x71e   : > { %v6650_v9 = vpop.f32.mrb[92].mxu1 }
 0x71f   : > { %v16745_v32 = vadd.f32 %v6650_v9, %v16633_v54  ;;  %v6652_v21 = vpop.f32.mrb[93].mxu1  ;;  %v13981_v54 = vld [vmem:[%s17511_s5 + $0x8e0] ss:$16 sps:$4 sm:$0xff]  }
 0x720   : > { %v16748_v47 = vadd.f32 %v6652_v21, %v16636_v2  ;;  %v6654_v31 = vpop.f32.mrb[94].mxu1  ;;  %7716 = vmatpush1.bf16.msra.mxu1 %v13975_v17  ;;  %v7510_v2 = vmax.f32 %v7509_v24, 0.0  ;;  %v14026_v21 = vld [vmem:[%s17511_s5 + $0x9c0] ss:$16 sps:$4 sm:$0xff]   ;;  %v14032_v24 = vld [vmem:[%s17511_s5 + $0x908] ss:$16 sps:$4 sm:$0xff]  }
 0x721   : > { %v6655_v5 = vpop.f32.mrb[95].mxu1  ;;  %7717 = vmatprep.subr.bf16.mxu1 %v13980_v13 }
 0x722   : > { %v16766_v36 = vpack.c.bf16 %v7510_v2, %v7510_v2  ;;  %v14040_v2 = vld [vmem:[%s17511_s5 + $0x94c] ss:$16 sps:$4 sm:$0xff]  }
 0x724   : > { %7718 = vmatpush1.bf16.msra.mxu1 %v13978_v46  ;;  %v14031_v46 = vld [vmem:[%s17511_s5 + $0x9e4] ss:$16 sps:$4 sm:$0xff]   ;;  %v7825_v5 = vrot.slane %v16766_v36, 1 }
 0x725   : > { %7719 = vmatprep.subr.bf16.mxu1 %v13983_v0  ;;  %v14037_v0 = vld [vmem:[%s17511_s5 + $0x92c] ss:$16 sps:$4 sm:$0xff]  }
 0x728   : > { %7720 = vmatpush1.bf16.msra.mxu1 %v13981_v54  ;;  %v14035_v54 = vld [vmem:[%s17511_s5 + $0x928] ss:$16 sps:$4 sm:$0xff]  }
 0x729   : > { %7746 = vmatprep.subr.bf16.mxu1 %v13986_v23  ;;  %v14038_v23 = vld [vmem:[%s17511_s5 + $0x948] ss:$16 sps:$4 sm:$0xff]  }
 0x72b   : > { %7738 = vmatmul.mubr.bf16.vlgmr.msra.gmra.mrb[120].mxu1 %v16766_v36 }
 0x72c   : > { %7747 = vmatpush1.bf16.msra.mxu1 %v13984_v45  ;;  %7778 = vmatprep.mubr.bf16.mxu1 %v14312_v52  ;;  %v14043_v45 = vld [vmem:[%s17511_s5 + $0x96c] ss:$16 sps:$4 sm:$0xff]  }
 0x72d   : > { %7748 = vmatprep.subr.bf16.mxu1 %v13989_v27  ;;  %v14041_v27 = vld [vmem:[%s17511_s5 + $0x968] ss:$16 sps:$4 sm:$0xff]  }
 0x730   : > { %7749 = vmatpush1.bf16.msra.mxu1 %v13987_v10  ;;  %v14046_v10 = vld [vmem:[%s17511_s5 + $0x98c] ss:$16 sps:$4 sm:$0xff]  }
 0x731   : > { %7750 = vmatprep.subr.bf16.mxu1 %v13992_v18  ;;  %v14044_v18 = vld [vmem:[%s17511_s5 + $0x988] ss:$16 sps:$4 sm:$0xff]  }
 0x734   : > { %7751 = vmatpush1.bf16.msra.mxu1 %v13990_v43  ;;  %v14049_v43 = vld [vmem:[%s17511_s5 + $0x9ac] ss:$16 sps:$4 sm:$0xff]  }
 0x735   : > { %7752 = vmatprep.subr.bf16.mxu1 %v13995_v7  ;;  %v14047_v7 = vld [vmem:[%s17511_s5 + $0x9a8] ss:$16 sps:$4 sm:$0xff]  }
 0x738   : > { %7753 = vmatpush1.bf16.msra.mxu1 %v13993_v56  ;;  %v14052_v56 = vld [vmem:[%s17511_s5 + $0x9cc] ss:$16 sps:$4 sm:$0xff]  }
 0x739   : > { %7754 = vmatprep.subr.bf16.mxu1 %v13998_v39 }
 0x73c   : > { %7755 = vmatpush1.bf16.msra.mxu1 %v13996_v42 }
 0x73d   : > { %7756 = vmatprep.subr.bf16.mxu1 %v14001_v58 }
 0x73e   : > { %v6891_v62 = vpop.f32.mrb[96].mxu1 }
 0x73f   : > { %v16804_v1 = vadd.f32 %v6891_v62, %v16689_v44  ;;  %v6893_v48 = vpop.f32.mrb[97].mxu1  ;;  %v14005_v44 = vld [vmem:[%s17511_s5 + $0x8e8] ss:$16 sps:$4 sm:$0xff]  }
 0x740   : > { %v16807_v34 = vadd.f32 %v6893_v48, %v16692_v33  ;;  %v6895_v60 = vpop.f32.mrb[98].mxu1  ;;  %7757 = vmatpush1.bf16.msra.mxu1 %v13999_v15  ;;  %v14010_v33 = vld [vmem:[%s17511_s5 + $0x904] ss:$16 sps:$4 sm:$0xff]   ;;  %v14050_v62 = vld [vmem:[%s17511_s5 + $0x9c8] ss:$16 sps:$4 sm:$0xff]  }
 0x741   : > { %v6896_v4 = vpop.f32.mrb[99].mxu1  ;;  %7758 = vmatprep.subr.bf16.mxu1 %v14004_v3  ;;  %v14055_v60 = vld [vmem:[%s17511_s5 + $0x9ec] ss:$16 sps:$4 sm:$0xff]  }
 0x742   : > { %v14061_v4 = vld [vmem:[%s17511_s5 + $0xa24] ss:$16 sps:$4 sm:$0xff]  }
 0x744   : > { %7759 = vmatpush1.bf16.msra.mxu1 %v14002_v22  ;;  %v14056_v22 = vld [vmem:[%s17511_s5 + $0xa00] ss:$16 sps:$4 sm:$0xff]  }
 0x745   : > { %7760 = vmatprep.subr.bf16.mxu1 %v14007_v38  ;;  %v14059_v38 = vld [vmem:[%s17511_s5 + $0xa20] ss:$16 sps:$4 sm:$0xff]  }
 0x748   : > { %7761 = vmatpush1.bf16.msra.mxu1 %v14005_v44  ;;  %v14064_v44 = vld [vmem:[%s17511_s5 + $0xa44] ss:$16 sps:$4 sm:$0xff]  }
 0x749   : > { %7987 = vmatprep.subr.bf16.mxu1 %v14010_v33  ;;  %v14062_v33 = vld [vmem:[%s17511_s5 + $0xa40] ss:$16 sps:$4 sm:$0xff]  }
 0x74b   : > { %7779 = vmatmul.mubr.bf16.vlgmr.msra.gmra.mrb[124].mxu1 %v16766_v36 }
 0x74c   : > { %7988 = vmatpush1.bf16.msra.mxu1 %v14008_v53  ;;  %8019 = vmatprep.mubr.bf16.mxu1 %v14312_v52  ;;  %v14067_v53 = vld [vmem:[%s17511_s5 + $0xa64] ss:$16 sps:$4 sm:$0xff]  }
 0x74d   : > { %7989 = vmatprep.subr.bf16.mxu1 %v14013_v59  ;;  %v14065_v59 = vld [vmem:[%s17511_s5 + $0xa60] ss:$16 sps:$4 sm:$0xff]  }
 0x750   : > { %7990 = vmatpush1.bf16.msra.mxu1 %v14011_v8  ;;  %v14070_v8 = vld [vmem:[%s17511_s5 + $0xa84] ss:$16 sps:$4 sm:$0xff]  }
 0x751   : > { %7991 = vmatprep.subr.bf16.mxu1 %v14016_v29  ;;  %v14068_v29 = vld [vmem:[%s17511_s5 + $0xa80] ss:$16 sps:$4 sm:$0xff]  }
 0x754   : > { %7992 = vmatpush1.bf16.msra.mxu1 %v14014_v35  ;;  %v14073_v35 = vld [vmem:[%s17511_s5 + $0xaa4] ss:$16 sps:$4 sm:$0xff]  }
 0x755   : > { %7993 = vmatprep.subr.bf16.mxu1 %v14019_v63  ;;  %v14071_v63 = vld [vmem:[%s17511_s5 + $0xaa0] ss:$16 sps:$4 sm:$0xff]  }
 0x758   : > { %7994 = vmatpush1.bf16.msra.mxu1 %v14017_v20  ;;  %v14076_v20 = vld [vmem:[%s17511_s5 + $0xac4] ss:$16 sps:$4 sm:$0xff]  }
 0x759   : > { %7995 = vmatprep.subr.bf16.mxu1 %v14022_v37 }
 0x75c   : > { %7996 = vmatpush1.bf16.msra.mxu1 %v14020_v57 }
 0x75d   : > { %7997 = vmatprep.subr.bf16.mxu1 %v14025_v30 }
 0x75e   : > { %v6932_v26 = vpop.f32.mrb[100].mxu1 }
 0x75f   : > { %v16860_v17 = vadd.f32 %v6932_v26, %v16745_v32  ;;  %v6934_v40 = vpop.f32.mrb[101].mxu1  ;;  %v14029_v32 = vld [vmem:[%s17511_s5 + $0x9e0] ss:$16 sps:$4 sm:$0xff]  }
 0x760   : > { %v16863_v13 = vadd.f32 %v6934_v40, %v16748_v47  ;;  %v6936_v9 = vpop.f32.mrb[102].mxu1  ;;  %7998 = vmatpush1.bf16.msra.mxu1 %v14023_v11  ;;  %v14034_v47 = vld [vmem:[%s17511_s5 + $0x90c] ss:$16 sps:$4 sm:$0xff]   ;;  %v14074_v26 = vld [vmem:[%s17511_s5 + $0xac0] ss:$16 sps:$4 sm:$0xff]  }
 0x761   : > { %v6937_v31 = vpop.f32.mrb[103].mxu1  ;;  %7999 = vmatprep.subr.bf16.mxu1 %v14028_v55  ;;  %v14079_v9 = vld [vmem:[%s17511_s5 + $0xae4] ss:$16 sps:$4 sm:$0xff]  }
 0x762   : > { %v8106_v31 = vrot.slane %v16766_v36, 2 }
 0x764   : > { %8000 = vmatpush1.bf16.msra.mxu1 %v14026_v21  ;;  %v14080_v21 = vld [vmem:[%s17511_s5 + $0xa08] ss:$16 sps:$4 sm:$0xff]  }
 0x765   : > { %8001 = vmatprep.subr.bf16.mxu1 %v14031_v46  ;;  %v14085_v46 = vld [vmem:[%s17511_s5 + $0xa2c] ss:$16 sps:$4 sm:$0xff]  }
 0x768   : > { %8002 = vmatpush1.bf16.msra.mxu1 %v14029_v32  ;;  %v14083_v32 = vld [vmem:[%s17511_s5 + $0xa28] ss:$16 sps:$4 sm:$0xff]  }
 0x769   : > { %8028 = vmatprep.subr.bf16.mxu1 %v14034_v47  ;;  %v14088_v47 = vld [vmem:[%s17511_s5 + $0xa4c] ss:$16 sps:$4 sm:$0xff]  }
 0x76b   : > { %8020 = vmatmul.mubr.bf16.vlgmr.msra.gmra.mrb[128].mxu1 %v7825_v5 }
 0x76c   : > { %8029 = vmatpush1.bf16.msra.mxu1 %v14032_v24  ;;  %8060 = vmatprep.mubr.bf16.mxu1 %v14312_v52  ;;  %v14086_v24 = vld [vmem:[%s17511_s5 + $0xa48] ss:$16 sps:$4 sm:$0xff]  }
 0x76d   : > { %8030 = vmatprep.subr.bf16.mxu1 %v14037_v0  ;;  %v14089_v0 = vld [vmem:[%s17511_s5 + $0xa68] ss:$16 sps:$4 sm:$0xff]  }
 0x770   : > { %8031 = vmatpush1.bf16.msra.mxu1 %v14035_v54  ;;  %v14094_v54 = vld [vmem:[%s17511_s5 + $0xa8c] ss:$16 sps:$4 sm:$0xff]  }
 0x771   : > { %8032 = vmatprep.subr.bf16.mxu1 %v14040_v2  ;;  %v14092_v2 = vld [vmem:[%s17511_s5 + $0xa88] ss:$16 sps:$4 sm:$0xff]  }
 0x774   : > { %8033 = vmatpush1.bf16.msra.mxu1 %v14038_v23  ;;  %v14097_v23 = vld [vmem:[%s17511_s5 + $0xaac] ss:$16 sps:$4 sm:$0xff]  }
 0x775   : > { %8034 = vmatprep.subr.bf16.mxu1 %v14043_v45  ;;  %v14095_v45 = vld [vmem:[%s17511_s5 + $0xaa8] ss:$16 sps:$4 sm:$0xff]  }
 0x778   : > { %8035 = vmatpush1.bf16.msra.mxu1 %v14041_v27  ;;  %v14100_v27 = vld [vmem:[%s17511_s5 + $0xacc] ss:$16 sps:$4 sm:$0xff]  }
 0x779   : > { %8036 = vmatprep.subr.bf16.mxu1 %v14046_v10 }
 0x77c   : > { %8037 = vmatpush1.bf16.msra.mxu1 %v14044_v18 }
 0x77d   : > { %8038 = vmatprep.subr.bf16.mxu1 %v14049_v43 }
 0x77e   : > { %v7172_v39 = vpop.f32.mrb[104].mxu1 }
 0x77f   : > { %v16916_v42 = vadd.f32 %v7172_v39, %v16804_v1  ;;  %v7174_v58 = vpop.f32.mrb[105].mxu1  ;;  %v14053_v1 = vld [vmem:[%s17511_s5 + $0x9e8] ss:$16 sps:$4 sm:$0xff]  }
 0x780   : > { %v16919_v15 = vadd.f32 %v7174_v58, %v16807_v34  ;;  %v7176_v3 = vpop.f32.mrb[106].mxu1  ;;  %8039 = vmatpush1.bf16.msra.mxu1 %v14047_v7  ;;  %v14058_v34 = vld [vmem:[%s17511_s5 + $0xa04] ss:$16 sps:$4 sm:$0xff]   ;;  %v14098_v39 = vld [vmem:[%s17511_s5 + $0xac8] ss:$16 sps:$4 sm:$0xff]  }
 0x781   : > { %v7177_v48 = vpop.f32.mrb[107].mxu1  ;;  %8040 = vmatprep.subr.bf16.mxu1 %v14052_v56  ;;  %v14103_v3 = vld [vmem:[%s17511_s5 + $0xaec] ss:$16 sps:$4 sm:$0xff]  }
 0x782   : > { %v14109_v48 = vld [vmem:[%s17511_s5 + $0xb24] ss:$16 sps:$4 sm:$0xff]  }
 0x784   : > { %8041 = vmatpush1.bf16.msra.mxu1 %v14050_v62  ;;  %v14104_v62 = vld [vmem:[%s17511_s5 + $0xb00] ss:$16 sps:$4 sm:$0xff]  }
 0x785   : > { %8042 = vmatprep.subr.bf16.mxu1 %v14055_v60  ;;  %v14107_v60 = vld [vmem:[%s17511_s5 + $0xb20] ss:$16 sps:$4 sm:$0xff]  }
 0x788   : > { %8043 = vmatpush1.bf16.msra.mxu1 %v14053_v1  ;;  %v14112_v1 = vld [vmem:[%s17511_s5 + $0xb44] ss:$16 sps:$4 sm:$0xff]  }
 0x789   : > { %8268 = vmatprep.subr.bf16.mxu1 %v14058_v34  ;;  %v14110_v34 = vld [vmem:[%s17511_s5 + $0xb40] ss:$16 sps:$4 sm:$0xff]  }
 0x78b   : > { %8061 = vmatmul.mubr.bf16.vlgmr.msra.gmra.mrb[132].mxu1 %v7825_v5  ;;  %v14091_v5 = vld [vmem:[%s17511_s5 + $0xa6c] ss:$16 sps:$4 sm:$0xff]  }
 0x78c   : > { %8269 = vmatpush1.bf16.msra.mxu1 %v14056_v22  ;;  %8300 = vmatprep.mubr.bf16.mxu1 %v14312_v52  ;;  %v14115_v22 = vld [vmem:[%s17511_s5 + $0xb64] ss:$16 sps:$4 sm:$0xff]  }
 0x78d   : > { %8270 = vmatprep.subr.bf16.mxu1 %v14061_v4  ;;  %v14113_v4 = vld [vmem:[%s17511_s5 + $0xb60] ss:$16 sps:$4 sm:$0xff]  }
 0x790   : > { %8271 = vmatpush1.bf16.msra.mxu1 %v14059_v38  ;;  %v14118_v38 = vld [vmem:[%s17511_s5 + $0xb84] ss:$16 sps:$4 sm:$0xff]  }
 0x791   : > { %8272 = vmatprep.subr.bf16.mxu1 %v14064_v44  ;;  %v14116_v44 = vld [vmem:[%s17511_s5 + $0xb80] ss:$16 sps:$4 sm:$0xff]  }
 0x794   : > { %8273 = vmatpush1.bf16.msra.mxu1 %v14062_v33  ;;  %v14121_v33 = vld [vmem:[%s17511_s5 + $0xba4] ss:$16 sps:$4 sm:$0xff]  }
 0x795   : > { %8274 = vmatprep.subr.bf16.mxu1 %v14067_v53  ;;  %v14119_v53 = vld [vmem:[%s17511_s5 + $0xba0] ss:$16 sps:$4 sm:$0xff]  }
 0x798   : > { %8275 = vmatpush1.bf16.msra.mxu1 %v14065_v59  ;;  %v14124_v59 = vld [vmem:[%s17511_s5 + $0xbc4] ss:$16 sps:$4 sm:$0xff]  }
 0x799   : > { %8276 = vmatprep.subr.bf16.mxu1 %v14070_v8 }
 0x79c   : > { %8277 = vmatpush1.bf16.msra.mxu1 %v14068_v29 }
 0x79d   : > { %8278 = vmatprep.subr.bf16.mxu1 %v14073_v35 }
 0x79e   : > { %v7213_v37 = vpop.f32.mrb[108].mxu1 }
 0x79f   : > { %v16971_v57 = vadd.f32 %v7213_v37, %v16860_v17  ;;  %v7215_v30 = vpop.f32.mrb[109].mxu1  ;;  %v14077_v17 = vld [vmem:[%s17511_s5 + $0xae0] ss:$16 sps:$4 sm:$0xff]  }
 0x7a0   : > { %v16974_v11 = vadd.f32 %v7215_v30, %v16863_v13  ;;  %v7217_v55 = vpop.f32.mrb[110].mxu1  ;;  %8279 = vmatpush1.bf16.msra.mxu1 %v14071_v63  ;;  %v14082_v13 = vld [vmem:[%s17511_s5 + $0xa0c] ss:$16 sps:$4 sm:$0xff]   ;;  %v14122_v37 = vld [vmem:[%s17511_s5 + $0xbc0] ss:$16 sps:$4 sm:$0xff]  }
 0x7a1   : > { %v7218_v40 = vpop.f32.mrb[111].mxu1  ;;  %8280 = vmatprep.subr.bf16.mxu1 %v14076_v20  ;;  %v14127_v55 = vld [vmem:[%s17511_s5 + $0xbe4] ss:$16 sps:$4 sm:$0xff]  }
 0x7a2   : > { %v8387_v40 = vrot.slane %v16766_v36, 3  ;;  %v14134_v36 = vld [vmem:[%s17511_s5 + $0xb48] ss:$16 sps:$4 sm:$0xff]  }
 0x7a4   : > { %8281 = vmatpush1.bf16.msra.mxu1 %v14074_v26  ;;  %v14128_v26 = vld [vmem:[%s17511_s5 + $0xb08] ss:$16 sps:$4 sm:$0xff]  }
 0x7a5   : > { %8282 = vmatprep.subr.bf16.mxu1 %v14079_v9  ;;  %v14133_v9 = vld [vmem:[%s17511_s5 + $0xb2c] ss:$16 sps:$4 sm:$0xff]  }
 0x7a8   : > { %8283 = vmatpush1.bf16.msra.mxu1 %v14077_v17  ;;  %v14131_v17 = vld [vmem:[%s17511_s5 + $0xb28] ss:$16 sps:$4 sm:$0xff]  }
 0x7a9   : > { %8309 = vmatprep.subr.bf16.mxu1 %v14082_v13  ;;  %v14136_v13 = vld [vmem:[%s17511_s5 + $0xb4c] ss:$16 sps:$4 sm:$0xff]  }
 0x7ab   : > { %8301 = vmatmul.mubr.bf16.vlgmr.msra.gmra.mrb[136].mxu1 %v8106_v31 }
 0x7ac   : > { %8310 = vmatpush1.bf16.msra.mxu1 %v14080_v21  ;;  %8341 = vmatprep.mubr.bf16.mxu1 %v14312_v52  ;;  %v14139_v21 = vld [vmem:[%s17511_s5 + $0xb6c] ss:$16 sps:$4 sm:$0xff]  }
 0x7ad   : > { %8311 = vmatprep.subr.bf16.mxu1 %v14085_v46  ;;  %v14142_v46 = vld [vmem:[%s17511_s5 + $0xb8c] ss:$16 sps:$4 sm:$0xff]  }
 0x7b0   : > { %8312 = vmatpush1.bf16.msra.mxu1 %v14083_v32  ;;  %v14140_v32 = vld [vmem:[%s17511_s5 + $0xb88] ss:$16 sps:$4 sm:$0xff]  }
 0x7b1   : > { %8313 = vmatprep.subr.bf16.mxu1 %v14088_v47  ;;  %v14145_v47 = vld [vmem:[%s17511_s5 + $0xbac] ss:$16 sps:$4 sm:$0xff]  }
 0x7b4   : > { %8314 = vmatpush1.bf16.msra.mxu1 %v14086_v24  ;;  %v14143_v24 = vld [vmem:[%s17511_s5 + $0xba8] ss:$16 sps:$4 sm:$0xff]  }
 0x7b5   : > { %8315 = vmatprep.subr.bf16.mxu1 %v14091_v5  ;;  %v14148_v5 = vld [vmem:[%s17511_s5 + $0xbcc] ss:$16 sps:$4 sm:$0xff]  }
 0x7b8   : > { %8316 = vmatpush1.bf16.msra.mxu1 %v14089_v0 }
 0x7b9   : > { %8317 = vmatprep.subr.bf16.mxu1 %v14094_v54 }
 0x7bc   : > { %8318 = vmatpush1.bf16.msra.mxu1 %v14092_v2 }
 0x7bd   : > { %8319 = vmatprep.subr.bf16.mxu1 %v14097_v23 }
 0x7be   : > { %v7453_v10 = vpop.f32.mrb[112].mxu1 }
 0x7bf   : > { %v17027_v18 = vadd.f32 %v7453_v10, %v16916_v42  ;;  %v7455_v43 = vpop.f32.mrb[113].mxu1  ;;  %v14101_v42 = vld [vmem:[%s17511_s5 + $0xae8] ss:$16 sps:$4 sm:$0xff]  }
 0x7c0   : > { %v17030_v7 = vadd.f32 %v7455_v43, %v16919_v15  ;;  %v7457_v56 = vpop.f32.mrb[114].mxu1  ;;  %8320 = vmatpush1.bf16.msra.mxu1 %v14095_v45  ;;  %v14106_v15 = vld [vmem:[%s17511_s5 + $0xb04] ss:$16 sps:$4 sm:$0xff]   ;;  %v14151_v43 = vld [vmem:[%s17511_s5 + $0xbec] ss:$16 sps:$4 sm:$0xff]  }
 0x7c1   : > { %v7458_v58 = vpop.f32.mrb[115].mxu1  ;;  %8321 = vmatprep.subr.bf16.mxu1 %v14100_v27  ;;  %v14146_v27 = vld [vmem:[%s17511_s5 + $0xbc8] ss:$16 sps:$4 sm:$0xff]   ;;  %v14152_v56 = vld [vmem:[%s17511_s5 + $0xc00] ss:$16 sps:$4 sm:$0xff]  }
 0x7c2   : > { %v14155_v58 = vld [vmem:[%s17511_s5 + $0xc20] ss:$16 sps:$4 sm:$0xff]  }
 0x7c4   : > { %8322 = vmatpush1.bf16.msra.mxu1 %v14098_v39  ;;  %v14157_v39 = vld [vmem:[%s17511_s5 + $0xc24] ss:$16 sps:$4 sm:$0xff]  }
 0x7c5   : > { %8323 = vmatprep.subr.bf16.mxu1 %v14103_v3  ;;  %v14160_v3 = vld [vmem:[%s17511_s5 + $0xc44] ss:$16 sps:$4 sm:$0xff]  }
 0x7c8   : > { %8324 = vmatpush1.bf16.msra.mxu1 %v14101_v42  ;;  %v14158_v42 = vld [vmem:[%s17511_s5 + $0xc40] ss:$16 sps:$4 sm:$0xff]  }
 0x7c9   : > { %8549 = vmatprep.subr.bf16.mxu1 %v14106_v15  ;;  %v14163_v15 = vld [vmem:[%s17511_s5 + $0xc64] ss:$16 sps:$4 sm:$0xff]  }
 0x7cb   : > { %8342 = vmatmul.mubr.bf16.vlgmr.msra.gmra.mrb[140].mxu1 %v8106_v31  ;;  %v14137_v31 = vld [vmem:[%s17511_s5 + $0xb68] ss:$16 sps:$4 sm:$0xff]  }
 0x7cc   : > { %8550 = vmatpush1.bf16.msra.mxu1 %v14104_v62  ;;  %8581 = vmatprep.mubr.bf16.mxu1 %v14312_v52  ;;  %v14161_v62 = vld [vmem:[%s17511_s5 + $0xc60] ss:$16 sps:$4 sm:$0xff]  }
 0x7cd   : > { %8551 = vmatprep.subr.bf16.mxu1 %v14109_v48  ;;  %v14166_v48 = vld [vmem:[%s17511_s5 + $0xc84] ss:$16 sps:$4 sm:$0xff]  }
 0x7d0   : > { %8552 = vmatpush1.bf16.msra.mxu1 %v14107_v60  ;;  %v14164_v60 = vld [vmem:[%s17511_s5 + $0xc80] ss:$16 sps:$4 sm:$0xff]  }
 0x7d1   : > { %8553 = vmatprep.subr.bf16.mxu1 %v14112_v1  ;;  %v14169_v1 = vld [vmem:[%s17511_s5 + $0xca4] ss:$16 sps:$4 sm:$0xff]  }
 0x7d4   : > { %8554 = vmatpush1.bf16.msra.mxu1 %v14110_v34  ;;  %v14167_v34 = vld [vmem:[%s17511_s5 + $0xca0] ss:$16 sps:$4 sm:$0xff]  }
 0x7d5   : > { %8555 = vmatprep.subr.bf16.mxu1 %v14115_v22  ;;  %v14172_v22 = vld [vmem:[%s17511_s5 + $0xcc4] ss:$16 sps:$4 sm:$0xff]  }
 0x7d8   : > { %8556 = vmatpush1.bf16.msra.mxu1 %v14113_v4 }
 0x7d9   : > { %8557 = vmatprep.subr.bf16.mxu1 %v14118_v38 }
 0x7dc   : > { %8558 = vmatpush1.bf16.msra.mxu1 %v14116_v44 }
 0x7dd   : > { %8559 = vmatprep.subr.bf16.mxu1 %v14121_v33 }
 0x7de   : > { %v7494_v8 = vpop.f32.mrb[116].mxu1 }
 0x7df   : > { %v17082_v29 = vadd.f32 %v7494_v8, %v16971_v57  ;;  %v7496_v35 = vpop.f32.mrb[117].mxu1  ;;  %v14125_v57 = vld [vmem:[%s17511_s5 + $0xbe0] ss:$16 sps:$4 sm:$0xff]  }
 0x7e0   : > { %v17085_v63 = vadd.f32 %v7496_v35, %v16974_v11  ;;  %v7498_v20 = vpop.f32.mrb[118].mxu1  ;;  %8560 = vmatpush1.bf16.msra.mxu1 %v14119_v53  ;;  %v14130_v11 = vld [vmem:[%s17511_s5 + $0xb0c] ss:$16 sps:$4 sm:$0xff]   ;;  %v14175_v35 = vld [vmem:[%s17511_s5 + $0xce4] ss:$16 sps:$4 sm:$0xff]  }
 0x7e1   : > { %v7499_v30 = vpop.f32.mrb[119].mxu1  ;;  %8561 = vmatprep.subr.bf16.mxu1 %v14124_v59  ;;  %v14170_v59 = vld [vmem:[%s17511_s5 + $0xcc0] ss:$16 sps:$4 sm:$0xff]  }
 0x7e2   : > { %v14176_v20 = vld [vmem:[%s17511_s5 + $0xd00] ss:$16 sps:$4 sm:$0xff]  }
 0x7e3   : > { %v14179_v30 = vld [vmem:[%s17511_s5 + $0xd20] ss:$16 sps:$4 sm:$0xff]  }
 0x7e4   : > { %8562 = vmatpush1.bf16.msra.mxu1 %v14122_v37  ;;  %v14181_v37 = vld [vmem:[%s17511_s5 + $0xd24] ss:$16 sps:$4 sm:$0xff]  }
 0x7e5   : > { %8563 = vmatprep.subr.bf16.mxu1 %v14127_v55  ;;  %v14184_v55 = vld [vmem:[%s17511_s5 + $0xd44] ss:$16 sps:$4 sm:$0xff]  }
 0x7e8   : > { %8564 = vmatpush1.bf16.msra.mxu1 %v14125_v57  ;;  %v14182_v57 = vld [vmem:[%s17511_s5 + $0xd40] ss:$16 sps:$4 sm:$0xff]  }
 0x7e9   : > { %8590 = vmatprep.subr.bf16.mxu1 %v14130_v11  ;;  %v14187_v11 = vld [vmem:[%s17511_s5 + $0xd64] ss:$16 sps:$4 sm:$0xff]  }
 0x7eb   : > { %8582 = vmatmul.mubr.bf16.vlgmr.msra.gmra.mrb[144].mxu1 %v8387_v40 }
 0x7ec   : > { %8591 = vmatpush1.bf16.msra.mxu1 %v14128_v26  ;;  %8622 = vmatprep.mubr.bf16.mxu1 %v14312_v52  ;;  %v14185_v26 = vld [vmem:[%s17511_s5 + $0xd60] ss:$16 sps:$4 sm:$0xff]  }
 0x7ed   : > { %8592 = vmatprep.subr.bf16.mxu1 %v14133_v9  ;;  %v14188_v9 = vld [vmem:[%s17511_s5 + $0xd80] ss:$16 sps:$4 sm:$0xff]  }
 0x7f0   : > { %8593 = vmatpush1.bf16.msra.mxu1 %v14131_v17  ;;  %v14193_v17 = vld [vmem:[%s17511_s5 + $0xda4] ss:$16 sps:$4 sm:$0xff]  }
 0x7f1   : > { %8594 = vmatprep.subr.bf16.mxu1 %v14136_v13  ;;  %v14191_v13 = vld [vmem:[%s17511_s5 + $0xda0] ss:$16 sps:$4 sm:$0xff]  }
 0x7f4   : > { %8595 = vmatpush1.bf16.msra.mxu1 %v14134_v36  ;;  %v14196_v36 = vld [vmem:[%s17511_s5 + $0xdc4] ss:$16 sps:$4 sm:$0xff]  }
 0x7f5   : > { %8596 = vmatprep.subr.bf16.mxu1 %v14139_v21 }
 0x7f8   : > { %8597 = vmatpush1.bf16.msra.mxu1 %v14137_v31 }
 0x7f9   : > { %8598 = vmatprep.subr.bf16.mxu1 %v14142_v46 }
 0x7fc   : > { %8599 = vmatpush1.bf16.msra.mxu1 %v14140_v32 }
 0x7fd   : > { %8600 = vmatprep.subr.bf16.mxu1 %v14145_v47 }
 0x7fe   : > { %v7739_v0 = vpop.f32.mrb[120].mxu1 }
 0x7ff   : > { %v17138_v54 = vadd.f32 %v7739_v0, %v17027_v18  ;;  %v7741_v2 = vpop.f32.mrb[121].mxu1  ;;  %v14149_v18 = vld [vmem:[%s17511_s5 + $0xbe8] ss:$16 sps:$4 sm:$0xff]  }
 0x800   : > { %v17141_v23 = vadd.f32 %v7741_v2, %v17030_v7  ;;  %v7743_v45 = vpop.f32.mrb[122].mxu1  ;;  %8601 = vmatpush1.bf16.msra.mxu1 %v14143_v24  ;;  %v14154_v7 = vld [vmem:[%s17511_s5 + $0xc04] ss:$16 sps:$4 sm:$0xff]   ;;  %v14194_v24 = vld [vmem:[%s17511_s5 + $0xdc0] ss:$16 sps:$4 sm:$0xff]  }
 0x801   : > { %v7744_v10 = vpop.f32.mrb[123].mxu1  ;;  %8602 = vmatprep.subr.bf16.mxu1 %v14148_v5  ;;  %v14199_v5 = vld [vmem:[%s17511_s5 + $0xde4] ss:$16 sps:$4 sm:$0xff]   ;;  %v14197_v45 = vld [vmem:[%s17511_s5 + $0xde0] ss:$16 sps:$4 sm:$0xff]  }
 0x802   : > { %v14249_v2 = vld [vmem:[%s17513_s7 + $0x80] sm:$0xff]  }
 0x803   : > { %v14202_v10 = vld [vmem:[%s17511_s5 + $0xe04] ss:$16 sps:$4 sm:$0xff]  }
 0x804   : > { %8603 = vmatpush1.bf16.msra.mxu1 %v14146_v27  ;;  %v14251_v27 = vld [vmem:[%s17513_s7 + $0x88] sm:$0xff]  }
 0x805   : > { %8604 = vmatprep.subr.bf16.mxu1 %v14151_v43  ;;  %v14252_v43 = vld [vmem:[%s17513_s7 + $0xd0] sm:$0xff]  }
 0x808   : > { %8605 = vmatpush1.bf16.msra.mxu1 %v14149_v18  ;;  %v14200_v18 = vld [vmem:[%s17511_s5 + $0xe00] ss:$16 sps:$4 sm:$0xff]  }
 0x809   : > { %8835 = vmatprep.subr.bf16.mxu1 %v14154_v7  ;;  %v14205_v7 = vld [vmem:[%s17511_s5 + $0xe24] ss:$16 sps:$4 sm:$0xff]  }
 0x80b   : > { %8623 = vmatmul.mubr.bf16.vlgmr.msra.gmra.mrb[148].mxu1 %v8387_v40  ;;  %v14190_v40 = vld [vmem:[%s17511_s5 + $0xd84] ss:$16 sps:$4 sm:$0xff]  }
 0x80c   : > { %8836 = vmatpush1.bf16.msra.mxu1 %v14152_v56  ;;  %8867 = vmatprep.mubr.bf16.mxu1 %v14312_v52  ;;  %v14253_v56 = vld [vmem:[%s17513_s7 + $0x90] sm:$0xff]  }
 0x80d   : > { %8837 = vmatprep.subr.bf16.mxu1 %v14157_v39  ;;  %v14254_v39 = vld [vmem:[%s17513_s7 + $0xd8] sm:$0xff]  }
 0x810   : > { %8838 = vmatpush1.bf16.msra.mxu1 %v14155_v58  ;;  %v14203_v58 = vld [vmem:[%s17511_s5 + $0xe20] ss:$16 sps:$4 sm:$0xff]  }
 0x811   : > { %8839 = vmatprep.subr.bf16.mxu1 %v14160_v3  ;;  %v14208_v3 = vld [vmem:[%s17511_s5 + $0xe44] ss:$16 sps:$4 sm:$0xff]  }
 0x814   : > { %8840 = vmatpush1.bf16.msra.mxu1 %v14158_v42  ;;  %v14206_v42 = vld [vmem:[%s17511_s5 + $0xe40] ss:$16 sps:$4 sm:$0xff]  }
 0x815   : > { %8841 = vmatprep.subr.bf16.mxu1 %v14163_v15  ;;  %v14209_v15 = vld [vmem:[%s17511_s5 + $0xe60] ss:$16 sps:$4 sm:$0xff]  }
 0x818   : > { %8842 = vmatpush1.bf16.msra.mxu1 %v14161_v62  ;;  %v14214_v62 = vld [vmem:[%s17511_s5 + $0xe84] ss:$16 sps:$4 sm:$0xff]  }
 0x819   : > { %8843 = vmatprep.subr.bf16.mxu1 %v14166_v48  ;;  %v14212_v48 = vld [vmem:[%s17511_s5 + $0xe80] ss:$16 sps:$4 sm:$0xff]  }
 0x81c   : > { %8844 = vmatpush1.bf16.msra.mxu1 %v14164_v60  ;;  %v14217_v60 = vld [vmem:[%s17511_s5 + $0xea4] ss:$16 sps:$4 sm:$0xff]  }
 0x81d   : > { %8845 = vmatprep.subr.bf16.mxu1 %v14169_v1  ;;  %v14215_v1 = vld [vmem:[%s17511_s5 + $0xea0] ss:$16 sps:$4 sm:$0xff]  }
 0x81e   : > { %v7780_v4 = vpop.f32.mrb[124].mxu1 }
 0x81f   : > { %v17193_v38 = vadd.f32 %v7780_v4, %v17082_v29  ;;  %v7782_v44 = vpop.f32.mrb[125].mxu1  ;;  %v14173_v29 = vld [vmem:[%s17511_s5 + $0xce0] ss:$16 sps:$4 sm:$0xff]  }
 0x820   : > { %v17196_v33 = vadd.f32 %v7782_v44, %v17085_v63  ;;  %v7784_v53 = vpop.f32.mrb[126].mxu1  ;;  %8846 = vmatpush1.bf16.msra.mxu1 %v14167_v34  ;;  %v14178_v63 = vld [vmem:[%s17511_s5 + $0xd04] ss:$16 sps:$4 sm:$0xff]  }
 0x821   : > { %v7785_v8 = vpop.f32.mrb[127].mxu1  ;;  %8847 = vmatprep.subr.bf16.mxu1 %v14172_v22  ;;  %v14220_v34 = vld [vmem:[%s17511_s5 + $0xec4] ss:$16 sps:$4 sm:$0xff]  }
 0x822   : > { %v14218_v8 = vld [vmem:[%s17511_s5 + $0xec0] ss:$16 sps:$4 sm:$0xff]  }
 0x824   : > { %8848 = vmatpush1.bf16.msra.mxu1 %v14170_v59 }
 0x825   : > { %8849 = vmatprep.subr.bf16.mxu1 %v14175_v35 }
 0x828   : > { %8850 = vmatpush1.bf16.msra.mxu1 %v14173_v29  ;;  %v14223_v29 = vld [vmem:[%s17511_s5 + $0xee4] ss:$16 sps:$4 sm:$0xff]  }
 0x829   : > { %9117 = vmatprep.subr.bf16.mxu1 %v14178_v63  ;;  %v14255_v63 = vld [vmem:[%s17513_s7 + $0x98] sm:$0xff]  }
 0x82b   : > { %8868 = vmatmul.mubr.bf16.vlgmr.msra.gmra.mrb[152].mxu1 %v15750_v12  ;;  %v14264_v12 = vld [vmem:[%s17513_s7 + $0x40] sm:$0xff]  }
 0x82c   : > { %9118 = vmatpush1.bf16.msra.mxu1 %v14176_v20  ;;  %9149 = vmatprep.mubr.bf16.mxu1 %v14312_v52  ;;  %v14256_v20 = vld [vmem:[%s17513_s7 + $0xe0] sm:$0xff]  }
 0x82d   : > { %9119 = vmatprep.subr.bf16.mxu1 %v14181_v37  ;;  %v14224_v37 = vld [vmem:[%s17511_s5 + $0xf00] ss:$16 sps:$4 sm:$0xff]  }
 0x830   : > { %9120 = vmatpush1.bf16.msra.mxu1 %v14179_v30  ;;  %v14229_v30 = vld [vmem:[%s17511_s5 + $0xf24] ss:$16 sps:$4 sm:$0xff]  }
 0x831   : > { %9121 = vmatprep.subr.bf16.mxu1 %v14184_v55  ;;  %v14257_v55 = vld [vmem:[%s17513_s7 + $0xa0] sm:$0xff]  }
 0x834   : > { %9122 = vmatpush1.bf16.msra.mxu1 %v14182_v57  ;;  %v14258_v57 = vld [vmem:[%s17513_s7 + $0xe8] sm:$0xff]  }
 0x835   : > { %9123 = vmatprep.subr.bf16.mxu1 %v14187_v11  ;;  %v14227_v11 = vld [vmem:[%s17511_s5 + $0xf20] ss:$16 sps:$4 sm:$0xff]  }
 0x838   : > { %9124 = vmatpush1.bf16.msra.mxu1 %v14185_v26  ;;  %v14232_v26 = vld [vmem:[%s17511_s5 + $0xf44] ss:$16 sps:$4 sm:$0xff]  }
 0x839   : > { %9125 = vmatprep.subr.bf16.mxu1 %v14190_v40  ;;  %v14259_v40 = vld [vmem:[%s17513_s7 + $0xa8] sm:$0xff]  }
 0x83c   : > { %9126 = vmatpush1.bf16.msra.mxu1 %v14188_v9  ;;  %v14235_v9 = vld [vmem:[%s17511_s5 + $0xf64] ss:$16 sps:$4 sm:$0xff]  }
 0x83d   : > { %9127 = vmatprep.subr.bf16.mxu1 %v14193_v17  ;;  %v14261_v17 = vld [vmem:[%s17513_s7 + $0xb0] sm:$0xff]  }
 0x83e   : > { %v8021_v21 = vpop.f32.mrb[128].mxu1 }
 0x83f   : > { %v17249_v31 = vadd.f32 %v8021_v21, %v17138_v54  ;;  %v8023_v46 = vpop.f32.mrb[129].mxu1  ;;  %v14248_v54 = vld [vmem:[%s17513_s7 + $0xc0] sm:$0xff]  }
 0x840   : > { %v17252_v32 = vadd.f32 %v8023_v46, %v17141_v23  ;;  %v8025_v47 = vpop.f32.mrb[130].mxu1  ;;  %9128 = vmatpush1.bf16.msra.mxu1 %v14191_v13  ;;  %v14250_v23 = vld [vmem:[%s17513_s7 + $0xc8] sm:$0xff]   ;;  %12289 = vmatprep.subr.bf16.mxu0 %v14248_v54  ;;  %v14262_v13 = vld [vmem:[%s17513_s7 + $0xf8] sm:$0xff]   ;;  %v14238_v21 = vld [vmem:[%s17511_s5 + $0xf84] ss:$16 sps:$4 sm:$0xff]  }
 0x841   : > { %v8026_v0 = vpop.f32.mrb[131].mxu1  ;;  %9129 = vmatprep.subr.bf16.mxu1 %v14196_v36  ;;  %12290 = vmatpush3.bf16.msra.mxu0 %v14249_v2  ;;  %v14233_v36 = vld [vmem:[%s17511_s5 + $0xf60] ss:$16 sps:$4 sm:$0xff]   ;;  %v14263_v46 = vld [vmem:[%s17513_s7 + $0xb8] sm:$0xff]  }
 0x842   : > { %12291 = vmatprep.subr.bf16.mxu0 %v14250_v23  ;;  %v14236_v47 = vld [vmem:[%s17511_s5 + $0xf80] ss:$16 sps:$4 sm:$0xff]   ;;  %v14244_v0 = vld [vmem:[%s17511_s5 + $0xfc4] ss:$16 sps:$4 sm:$0xff]  }
 0x844   : > { %9130 = vmatpush1.bf16.msra.mxu1 %v14194_v24  ;;  %v14241_v24 = vld [vmem:[%s17511_s5 + $0xfa4] ss:$16 sps:$4 sm:$0xff]  }
 0x845   : > { %9131 = vmatprep.subr.bf16.mxu1 %v14199_v5  ;;  %12292 = vmatpush3.bf16.msra.mxu0 %v14251_v27  ;;  %v14239_v5 = vld [vmem:[%s17511_s5 + $0xfa0] ss:$16 sps:$4 sm:$0xff]  }
 0x846   : > { %12293 = vmatprep.subr.bf16.mxu0 %v14252_v43 }
 0x848   : > { %9132 = vmatpush1.bf16.msra.mxu1 %v14197_v45 }
 0x849   : > { %9398 = vmatprep.subr.bf16.mxu1 %v14202_v10  ;;  %12294 = vmatpush3.bf16.msra.mxu0 %v14253_v56  ;;  %v14242_v10 = vld [vmem:[%s17511_s5 + $0xfc0] ss:$16 sps:$4 sm:$0xff]  }
 0x84a   : > { %12295 = vmatprep.subr.bf16.mxu0 %v14254_v39 }
 0x84b   : > { %9150 = vmatmul.mubr.bf16.vlgmr.msra.gmra.mrb[156].mxu1 %v8955_v28  ;;  %v14211_v28 = vld [vmem:[%s17511_s5 + $0xe64] ss:$16 sps:$4 sm:$0xff]  }
 0x84c   : > { %9399 = vmatpush1.bf16.msra.mxu1 %v14200_v18  ;;  %9430 = vmatprep.mubr.bf16.mxu1 %v14312_v52  ;;  %v14247_v18 = vld [vmem:[%s17511_s5 + $0xfe4] ss:$16 sps:$4 sm:$0xff]  }
 0x84d   : > { %9400 = vmatprep.subr.bf16.mxu1 %v14205_v7  ;;  %12296 = vmatpush3.bf16.msra.mxu0 %v14255_v63 }
 0x84e   : > { %12297 = vmatprep.subr.bf16.mxu0 %v14256_v20 }
 0x850   : > { %9401 = vmatpush1.bf16.msra.mxu1 %v14203_v58 }
 0x851   : > { %9402 = vmatprep.subr.bf16.mxu1 %v14208_v3  ;;  %12298 = vmatpush3.bf16.msra.mxu0 %v14257_v55 }
 0x852   : > { %12299 = vmatprep.subr.bf16.mxu0 %v14258_v57 }
 0x854   : > { %9403 = vmatpush1.bf16.msra.mxu1 %v14206_v42 }
 0x855   : > { %9404 = vmatprep.subr.bf16.mxu1 %v14211_v28  ;;  %12300 = vmatpush3.bf16.msra.mxu0 %v14259_v40  ;;  %v9765_v40 = vld [vmem:[%s17512_s6] sm:$0xf] }
 0x858   : > { %9405 = vmatpush1.bf16.msra.mxu1 %v14209_v15 }
 0x859   : > { %9406 = vmatprep.subr.bf16.mxu1 %v14214_v62 }
 0x85c   : > { %9407 = vmatpush1.bf16.msra.mxu1 %v14212_v48 }
 0x85d   : > { %9408 = vmatprep.subr.bf16.mxu1 %v14217_v60 }
 0x85e   : > { %v8062_v22 = vpop.f32.mrb[132].mxu1 }
 0x85f   : > { %v17327_v4 = vadd.f32 %v8062_v22, %v17193_v38  ;;  %v8064_v44 = vpop.f32.mrb[133].mxu1  ;;  %v14221_v38 = vld [vmem:[%s17511_s5 + $0xee0] ss:$16 sps:$4 sm:$0xff]  }
 0x860   : > { %v17330_v53 = vadd.f32 %v8064_v44, %v17196_v33  ;;  %v8066_v59 = vpop.f32.mrb[134].mxu1  ;;  %9409 = vmatpush1.bf16.msra.mxu1 %v14215_v1  ;;  %v14226_v33 = vld [vmem:[%s17511_s5 + $0xf04] ss:$16 sps:$4 sm:$0xff]   ;;  %v14266_v1 = vld [vmem:[%s17513_s7 + $0x48] sm:$0xff]   ;;  %v14270_v44 = vld [vmem:[%s17513_s7 + $0x58] sm:$0xff]  }
 0x861   : > { %v8067_v35 = vpop.f32.mrb[135].mxu1  ;;  %9410 = vmatprep.subr.bf16.mxu1 %v14220_v34  ;;  %v14267_v34 = vld [vmem:[%s17513_s7 + $0x8] sm:$0xff]   ;;  %v14268_v22 = vld [vmem:[%s17513_s7 + $0x50] sm:$0xff]   ;;  %v14272_v59 = vld [vmem:[%s17513_s7 + $0x60] sm:$0xff]  }
 0x862   : > { %v14274_v35 = vld [vmem:[%s17513_s7 + $0x68] sm:$0xff]  }
 0x864   : > { %9411 = vmatpush1.bf16.msra.mxu1 %v14218_v8  ;;  %v14273_v8 = vld [vmem:[%s17513_s7 + $0x20] sm:$0xff]  }
 0x865   : > { %9412 = vmatprep.subr.bf16.mxu1 %v14223_v29  ;;  %v9767_v29 = vlaneseq }
 0x868   : > { %9413 = vmatpush1.bf16.msra.mxu1 %v14221_v38  ;;  %v17462_v38 = vshrl.u32 %v9767_v29, 7 }
 0x869   : > { %9679 = vmatprep.subr.bf16.mxu1 %v14226_v33 }
 0x86b   : > { %9431 = vmatmul.mubr.bf16.vlgmr.msra.gmra.mrb[160].mxu1 %v9236_v16  ;;  %v14260_v16 = vld [vmem:[%s17513_s7 + $0xf0] sm:$0xff]  }
 0x86c   : > { %9680 = vmatpush1.bf16.msra.mxu1 %v14224_v37  ;;  %9711 = vmatprep.mubr.bf16.mxu1 %v14312_v52  ;;  %v14230_v52 = vld [vmem:[%s17511_s5 + $0xf40] ss:$16 sps:$4 sm:$0xff]  }
 0x86d   : > { %9681 = vmatprep.subr.bf16.mxu1 %v14229_v30  ;;  %12301 = vmatprep.subr.bf16.mxu0 %v14260_v16  ;;  %v9781_v16 = vsub.s32 3, %v17462_v38 }
 0x86e   : > { %12302 = vmatpush3.bf16.msra.mxu0 %v14261_v17 }
 0x86f   : > { %12303 = vmatprep.subr.bf16.mxu0 %v14262_v13 }
 0x870   : > { %9682 = vmatpush1.bf16.msra.mxu1 %v14227_v11  ;;  %v9777_v11 = vsub.s32 2, %v17462_v38 }
 0x871   : > { %9683 = vmatprep.subr.bf16.mxu1 %v14232_v26 }
 0x872   : > { %12304 = vmatpush3.bf16.msra.mxu0 %v14263_v46  ;;  %v9778_v13 = vrot.slane %v9765_v40, %v9777_v11 }
 0x874   : > { %9684 = vmatpush1.bf16.msra.mxu1 %v14230_v52 }
 0x875   : > { %9685 = vmatprep.subr.bf16.mxu1 %v14235_v9 }
 0x878   : > { %9686 = vmatpush1.bf16.msra.mxu1 %v14233_v36 }
 0x879   : > { %9687 = vmatprep.subr.bf16.mxu1 %v14238_v21  ;;  %v14276_v21 = vld [vmem:[%s17513_s7 + $0x70] sm:$0xff]  }
 0x87c   : > { %9688 = vmatpush1.bf16.msra.mxu1 %v14236_v47 }
 0x87d   : > { %9689 = vmatprep.subr.bf16.mxu1 %v14241_v24 }
 0x87e   : > { %v8302_v54 = vpop.f32.mrb[136].mxu1 }
 0x87f   : > { %v8350_v2 = vadd.f32 %v8302_v54, %v17249_v31  ;;  %v8304_v23 = vpop.f32.mrb[137].mxu1  ;;  %v14245_v31 = vld [vmem:[%s17511_s5 + $0xfe0] ss:$16 sps:$4 sm:$0xff]  }
 0x880   : > { %v8351_v45 = vadd.f32 %v8304_v23, %v17252_v32  ;;  %v8306_v27 = vpop.f32.mrb[138].mxu1  ;;  %9690 = vmatpush1.bf16.msra.mxu1 %v14239_v5 }
 0x881   : > { %v8307_v43 = vpop.f32.mrb[139].mxu1  ;;  %9691 = vmatprep.subr.bf16.mxu1 %v14244_v0 }
 0x884   : > { %9692 = vmatpush1.bf16.msra.mxu1 %v14242_v10 }
 0x885   : > { %9693 = vmatprep.subr.bf16.mxu1 %v14247_v18 }
 0x888   : > { %9694 = vmatpush1.bf16.msra.mxu1 %v14245_v31 }
 0x889   : > { %12267 = vmatprep.subr.bf16.mxu1 %v14264_v12 }
 0x88b   : > { %9712 = vmatmul.mubr.bf16.vlgmr.msra.gmra.mrb[164].mxu1 %v9517_v61  ;;  %v14265_v61 = vld [vmem:[%s17513_s7] sm:$0xff]  }
 0x88c   : > { %12268 = vmatpush3.bf16.msra.mxu1 %v14265_v61 }
 0x88d   : > { %12269 = vmatprep.subr.bf16.mxu1 %v14266_v1 }
 0x890   : > { %12270 = vmatpush3.bf16.msra.mxu1 %v14267_v34 }
 0x891   : > { %12271 = vmatprep.subr.bf16.mxu1 %v14268_v22 }
 0x89e   : > { %v8343_v32 = vpop.f32.mrb[140].mxu1 }
 0x89f   : > { %v8352_v7 = vadd.f32 %v8343_v32, %v17327_v4  ;;  %v8345_v56 = vpop.f32.mrb[141].mxu1  ;;  %v14269_v4 = vld [vmem:[%s17513_s7 + $0x10] sm:$0xff]  }
 0x8a0   : > { %v8353_v39 = vadd.f32 %v8345_v56, %v17330_v53  ;;  %v8347_v58 = vpop.f32.mrb[142].mxu1  ;;  %12272 = vmatpush3.bf16.msra.mxu1 %v14269_v4  ;;  %v14271_v53 = vld [vmem:[%s17513_s7 + $0x18] sm:$0xff]  }
 0x8a1   : > { %v8348_v3 = vpop.f32.mrb[143].mxu1  ;;  %12273 = vmatprep.subr.bf16.mxu1 %v14270_v44 }
 0x8a4   : > { %12274 = vmatpush3.bf16.msra.mxu1 %v14271_v53 }
 0x8a5   : > { %12275 = vmatprep.subr.bf16.mxu1 %v14272_v59 }
 0x8a8   : > { %12276 = vmatpush3.bf16.msra.mxu1 %v14273_v8 }
 0x8a9   : > { %12277 = vmatprep.subr.bf16.mxu1 %v14274_v35 }
 0x8be   : > { %v8583_v42 = vpop.f32.mrb[144].mxu1 }
 0x8bf   : > { %v17425_v28 = vadd.f32 %v8583_v42, %v8350_v2  ;;  %v8585_v15 = vpop.f32.mrb[145].mxu1 }
 0x8c0   : > { %v17427_v62 = vadd.f32 %v8585_v15, %v8351_v45  ;;  %v8587_v48 = vpop.f32.mrb[146].mxu1 }
 0x8c1   : > { %v8588_v60 = vpop.f32.mrb[147].mxu1 }
 0x8c2   : > { %v9769_v60 = vsub.s32 0, %v17462_v38 }
 0x8c4   : > { %v9770_v12 = vrot.slane %v9765_v40, %v9769_v60 }
 0x8de   : > { %v8624_v33 = vpop.f32.mrb[148].mxu1 }
 0x8df   : > { %v8633_v63 = vadd.f32 %v8624_v33, %v8352_v7  ;;  %v8626_v20 = vpop.f32.mrb[149].mxu1 }
 0x8e0   : > { %v8634_v37 = vadd.f32 %v8626_v20, %v8353_v39  ;;  %v8628_v30 = vpop.f32.mrb[150].mxu1 }
 0x8e1   : > { %v8919_v55 = vadd.f32 %v16237_v25, %v8633_v63  ;;  %v8629_v57 = vpop.f32.mrb[151].mxu1  ;;  %v14275_v25 = vld [vmem:[%s17513_s7 + $0x28] sm:$0xff]  }
 0x8e2   : > { %v8920_v26 = vadd.f32 %v16239_v6, %v8634_v37  ;;  %v9782_v6 = vrot.slane %v9765_v40, %v9781_v16  ;;  %12278 = vmatpush3.bf16.msra.mxu1 %v14275_v25  ;;  %v9863_v57 = vld [vmem:[%s17514_s8] sm:$0x1] }
 0x8e3   : > { %v9201_v52 = vadd.f32 %v16296_v51, %v8919_v55  ;;  %v14277_v51 = vld [vmem:[%s17513_s7 + $0x30] sm:$0xff]   ;;  %12279 = vmatprep.subr.bf16.mxu1 %v14276_v21 }
 0x8e4   : > { %v9202_v9 = vadd.f32 %v16298_v50, %v8920_v26 }
 0x8e5   : > { %v9482_v17 = vadd.f32 %v16358_v41, %v9201_v52  ;;  %v14278_v41 = vld [vmem:[%s17513_s7 + $0x78] sm:$0xff]  }
 0x8e6   : > { %v9483_v36 = vadd.f32 %v16360_v14, %v9202_v9  ;;  %12280 = vmatpush3.bf16.msra.mxu1 %v14277_v51 }
 0x8e7   : > { %v9763_v46 = vadd.f32 %v16418_v49, %v9482_v17  ;;  %v14279_v49 = vld [vmem:[%s17513_s7 + $0x38] sm:$0xff]   ;;  %12281 = vmatprep.subr.bf16.mxu1 %v14278_v41 }
 0x8e8   : > { %v9764_v50 = vadd.f32 %v16420_v19, %v9483_v36 }
 0x8e9   : > { %v9789_v14 = vadd.f32 %v9778_v13, %v9763_v46 }
 0x8ea   : > { %v9790_v47 = vadd.f32 %v9782_v6, %v9764_v50  ;;  %12282 = vmatpush3.bf16.msra.mxu1 %v14279_v49 }
 0x8eb   : > { %v9793_v24 = vmax.f32 %v9789_v14, 0.0 }
 0x8ec   : > { %v9794_v5 = vmax.f32 %v9790_v47, 0.0 }
 0x8ed   : > { %v9797_v54 = vpack.c.bf16 %v9793_v24, %v9793_v24 }
 0x8ee   : > { %v9798_v0 = vpack.c.bf16 %v9794_v5, %v9794_v5 }
 0x8f0   : > { %10128 = vmatprep.mubr.bf16.mxu0 %v9798_v0 }
 0x8f1   : > { %10129 = vmatmul.mubr.bf16.vlgmr.msra.gmra.mrb[64].mxu0 %v9797_v54 }
 0x8fe   : > { %v8869_v19 = vpop.f32.mrb[152].mxu1 }
 0x8ff   : > { %v8917_v2 = vadd.f32 %v8869_v19, %v17425_v28  ;;  %v8871_v23 = vpop.f32.mrb[153].mxu1  ;;  %v9773_v28 = vsub.s32 1, %v17462_v38 }
 0x900   : > { %v8918_v45 = vadd.f32 %v8871_v23, %v17427_v62  ;;  %v8873_v27 = vpop.f32.mrb[154].mxu1 }
 0x901   : > { %v8874_v10 = vpop.f32.mrb[155].mxu1  ;;  %v9774_v61 = vrot.slane %v9765_v40, %v9773_v28 }
 0x91e   : > { %v9151_v43 = vpop.f32.mrb[156].mxu1 }
 0x91f   : > { %v9199_v18 = vadd.f32 %v9151_v43, %v8917_v2  ;;  %v9153_v31 = vpop.f32.mrb[157].mxu1 }
 0x920   : > { %v9200_v32 = vadd.f32 %v9153_v31, %v8918_v45  ;;  %v9155_v7 = vpop.f32.mrb[158].mxu1 }
 0x921   : > { %v9156_v56 = vpop.f32.mrb[159].mxu1 }
 0x93e   : > { %v9432_v39 = vpop.f32.mrb[160].mxu1 }
 0x93f   : > { %v9480_v58 = vadd.f32 %v9432_v39, %v9199_v18  ;;  %v9434_v3 = vpop.f32.mrb[161].mxu1 }
 0x940   : > { %v9481_v42 = vadd.f32 %v9434_v3, %v9200_v32  ;;  %v9436_v15 = vpop.f32.mrb[162].mxu1 }
 0x941   : > { %v9437_v48 = vpop.f32.mrb[163].mxu1 }
 0x95e   : > { %v9713_v62 = vpop.f32.mrb[164].mxu1 }
 0x95f   : > { %v9761_v1 = vadd.f32 %v9713_v62, %v9480_v58  ;;  %v9715_v34 = vpop.f32.mrb[165].mxu1 }
 0x960   : > { %v9762_v22 = vadd.f32 %v9715_v34, %v9481_v42  ;;  %v9717_v4 = vpop.f32.mrb[166].mxu1 }
 0x961   : > { %v9787_v44 = vadd.f32 %v9770_v12, %v9761_v1  ;;  %v9718_v53 = vpop.f32.mrb[167].mxu1 }
 0x962   : > { %v9788_v59 = vadd.f32 %v9774_v61, %v9762_v22 }
 0x963   : > { %v9791_v8 = vmax.f32 %v9787_v44, 0.0 }
 0x964   : > { %v9792_v35 = vmax.f32 %v9788_v59, 0.0 }
 0x965   : > { %v9795_v33 = vpack.c.bf16 %v9791_v8, %v9791_v8 }
 0x966   : > { %v9796_v29 = vpack.c.bf16 %v9792_v35, %v9792_v35 }
 0x968   : > { %10088 = vmatprep.mubr.bf16.mxu1 %v9796_v29 }
 0x969   : > { %10089 = vmatmul.mubr.bf16.vlgmr.msra.gmra.mrb[168].mxu1 %v9795_v33 }
 0x9c4   : > { %v12305_v63 = vpop.f32.mrb[64].mxu0 }
 0x9c5   : > { %v12306_v20 = vpop.f32.mrb[65].mxu0 }
 0x9c6   : > { %v12307_v38 = vadd.f32 %v12306_v20, %v12305_v63  ;;  %v12308_v37 = vpop.f32.mrb[66].mxu0 }
 0x9c7   : > { %v12309_v30 = vpop.f32.mrb[67].mxu0 }
 0xa3c   : > { %v12283_v55 = vpop.f32.mrb[168].mxu1 }
 0xa3d   : > { %v12284_v11 = vpop.f32.mrb[169].mxu1 }
 0xa3e   : > { %v12285_v26 = vadd.f32 %v12284_v11, %v12283_v55  ;;  %v12286_v40 = vpop.f32.mrb[170].mxu1 }
 0xa3f   : > { %v12287_v16 = vpop.f32.mrb[171].mxu1 }
 0xa40   : > { %v10091_v52 = vadd.f32 %v12285_v26, %v9863_v57 }
 0xa42   : > { %v10131_v9 = vadd.f32 %v12307_v38, %v10091_v52 }
 0xa44   : > { %v10139_v17 = vrot.slane %v10131_v9, %v9769_v60 }
 0xa46   : > { %10140 = vst [vmem:[%s330_s19] sm:$0xff] %v10139_v17 }
 0xa47 PF: > { %s19_s30 = sadd.s32 1, %s14309_s30  }
 0xa48   : > { %p16_p4 = scmp.ge.s32.totalorder %s19_s30, 4  }
 0xa4a   :  { %18 = sbr.rel (!%p16_p4) target bundleno = 1 (0x1), region = 129 }

</bundles_post_ra>
